<compile_context>
chip_gen: v7x
topology: tpu7x:2x2x1
jax: 0.10.0
libtpu: 0.0.40
codegen_flags: <defaults>
</compile_context>

<pallas_src>
import functools

import jax
import jax.numpy as jnp
from jax import lax
from jax.experimental import pallas as pl
from jax.experimental.pallas import tpu as pltpu

EPS = 1e-5
LANE = 128


# --------------------------------------------------------------------------- #
# Kernels
# --------------------------------------------------------------------------- #
def _conv1x1_stats_kernel(x_ref, w_ref, y_ref, stats_ref):
    """y1 = x @ w1 (bf16 in, f32 acc), stored bf16, + per-tile BN1 sum/sumsq."""
    _, TH, W, Cin = x_ref.shape
    P = w_ref.shape[1]
    x = x_ref[...].reshape(TH * W, Cin).astype(jnp.bfloat16)
    y = jnp.dot(x, w_ref[...], preferred_element_type=jnp.float32)   # (TH*W, P)
    yq = y.astype(jnp.bfloat16)          # bf16 storage halves HBM traffic
    yf = yq.astype(jnp.float32)          # stats over the values actually stored
    s = jnp.sum(yf, axis=0, keepdims=True)
    ss = jnp.sum(yf * yf, axis=0, keepdims=True)
    stats_ref[...] = jnp.concatenate([s, ss], axis=0).reshape(1, 1, 2, P)
    y_ref[...] = yq.reshape(1, TH, W, P)


def _bn_relu_conv3x3_stats_kernel(d, TH, H,
                                  y1c_ref, sb_ref, w2_ref, y1_hbm,
                                  y2_ref, stats_ref,
                                  top_buf, bot_buf, sems):
    """relu(bn1(y1)) -> 3x3 dilated conv (3 accumulated K=3*P matmuls) + BN2 stats.

    The TH-row center tile arrives through the auto-pipelined BlockSpec
    (y1c_ref, overlapped by Pallas).  Only the d-row top/bottom halos are
    fetched manually from HBM; those tiny DMAs overlap the center BN+ReLU.
    Halo rows outside the image are fetched from a clamped-but-valid offset and
    zeroed *after* BN+ReLU, reproducing conv2's zero padding exactly.
    """
    n = pl.program_id(0)
    t = pl.program_id(1)
    _, _, W, P = y1c_ref.shape
    row0 = t * TH

    top_src = jnp.clip(row0 - d, 0, H - d)
    bot_src = jnp.clip(row0 + TH, 0, H - d)
    cp_top = pltpu.make_async_copy(y1_hbm.at[n, pl.ds(top_src, d)], top_buf,
                                   sems.at[0])
    cp_bot = pltpu.make_async_copy(y1_hbm.at[n, pl.ds(bot_src, d)], bot_buf,
                                   sems.at[1])
    cp_top.start()
    cp_bot.start()

    sb = sb_ref[...]                                     # (2, P): scale, bias
    scale = sb[0:1, :].reshape(1, 1, P)
    bias = sb[1:2, :].reshape(1, 1, P)

    # BN1 + ReLU on the center tile in f32 (overlaps the halo DMAs), bf16 out.
    hc = jnp.maximum(y1c_ref[...].reshape(TH, W, P).astype(jnp.float32) * scale
                     + bias, 0.0).astype(jnp.bfloat16)

    cp_top.wait()
    cp_bot.wait()
    rt = lax.broadcasted_iota(jnp.int32, (d, 1, 1), 0) + (row0 - d)
    ht = jnp.maximum(top_buf[...].astype(jnp.float32) * scale + bias, 0.0)
    ht = jnp.where(rt >= 0, ht, 0.0).astype(jnp.bfloat16)
    rb = lax.broadcasted_iota(jnp.int32, (d, 1, 1), 0) + (row0 + TH)
    hb = jnp.maximum(bot_buf[...].astype(jnp.float32) * scale + bias, 0.0)
    hb = jnp.where(rb < H, hb, 0.0).astype(jnp.bfloat16)

    h = jnp.concatenate([ht, hc, hb], axis=0)            # (TH+2d, W, P) bf16
    hp = jnp.pad(h, ((0, 0), (d, d), (0, 0)))            # zero pad along W (bf16)
    # Only the 3 kw column shifts are materialized; kh offsets are handled by
    # cheap contiguous row slices feeding 3 accumulated matmuls (K = 3*P).
    slab = jnp.concatenate([hp[:, kw * d:kw * d + W, :] for kw in range(3)],
                           axis=-1)                      # (TH+2d, W, 3P) bf16

    acc = jnp.zeros((TH * W, P), jnp.float32)
    for kh in range(3):
        acc = acc + jnp.dot(slab[kh * d:kh * d + TH].reshape(TH * W, 3 * P),
                            w2_ref[kh], preferred_element_type=jnp.float32)

    yq = acc.astype(jnp.bfloat16)
    yf = yq.astype(jnp.float32)
    s = jnp.sum(yf, axis=0, keepdims=True)
    ss = jnp.sum(yf * yf, axis=0, keepdims=True)
    stats_ref[...] = jnp.concatenate([s, ss], axis=0).reshape(1, 1, 2, P)
    y2_ref[...] = yq.reshape(1, TH, W, P)


def _bn_relu_gram_kernel(y2_ref, sb_ref, gram_ref, hsum_ref):
    """h2 = relu(bn2(y2)); emit per-tile sum(h2) and Gram = h2^T h2.

    BN3 statistics are later derived analytically from these, so the wide f32
    y3 tensor never touches HBM.
    """
    _, TH, W, P = y2_ref.shape
    sb = sb_ref[...]
    y = y2_ref[...].reshape(TH * W, P).astype(jnp.float32)
    hf = jnp.maximum(y * sb[0:1, :] + sb[1:2, :], 0.0)       # f32
    h = hf.astype(jnp.bfloat16)                              # conv3 input dtype
    hsum_ref[...] = jnp.sum(h.astype(jnp.float32), axis=0,
                            keepdims=True).reshape(1, 1, 1, P)
    gram_ref[...] = jnp.dot(hf.T.astype(jnp.bfloat16), h,
                            preferred_element_type=jnp.float32).reshape(1, 1, P, P)


def _conv1x1_bn_add_relu_kernel(y2_ref, x_ref, sb2_ref, sb3_ref, w3_ref, o_ref):
    """out = relu(bn3(relu(bn2(y2)) @ w3) + residual), fused in one pass."""
    _, TH, W, P = y2_ref.shape
    Co = w3_ref.shape[1]
    sb2 = sb2_ref[...]
    y = y2_ref[...].reshape(TH * W, P).astype(jnp.float32)
    h = jnp.maximum(y * sb2[0:1, :] + sb2[1:2, :], 0.0).astype(jnp.bfloat16)
    o = jnp.dot(h, w3_ref[...], preferred_element_type=jnp.float32)  # (TH*W, Co)
    sb3 = sb3_ref[...]
    res = x_ref[...].reshape(TH * W, Co)
    out = jnp.maximum(o * sb3[0:1, :] + sb3[1:2, :] + res, 0.0)
    o_ref[...] = out.reshape(1, TH, W, Co)


# --------------------------------------------------------------------------- #
# Wrapper helpers
# --------------------------------------------------------------------------- #
def _round_up(x, m):
    return (x + m - 1) // m * m


def _pad_axis(a, axis, target):
    pad = target - a.shape[axis]
    if pad == 0:
        return a
    widths = [(0, 0)] * a.ndim
    widths[axis] = (0, pad)
    return jnp.pad(a, widths)


def _default_vmem_limit_bytes():
    """~3/4 of physical VMEM: ~96 MiB on v5e/v6e, ~48 MiB on v7x, safe fallback."""
    cap = 64 * 1024 * 1024                      # conservative (v7x per-TC)
    try:
        info_cap = int(pltpu.get_tpu_info().vmem_capacity_bytes)
        if info_cap > 0:
            cap = info_cap
    except Exception:
        pass
    return max((cap * 3) // 4, 32 * 1024 * 1024)


def _pick_tile_h(H, W, Pp, Cp, d, budget_bytes):
    """Largest divisor of H whose per-step working set fits the VMEM budget."""
    for th in range(H, 0, -1):
        if H % th:
            continue
        rows = th + 2 * d
        stage2 = (2 * 2 * th * W * Pp * 2          # dbuf bf16 y1-in + y2-out
                  + rows * W * Pp * 2              # assembled halo'd h (bf16)
                  + rows * (W + 2 * d) * Pp * 2    # W-padded h (bf16)
                  + rows * W * 3 * Pp * 2          # bf16 im2col slab (3 taps)
                  + th * W * Pp * 4                # f32 accumulator
                  + 2 * 9 * Pp * Pp * 2)           # conv2 weights (dbuf)
        stage4 = (2 * 2 * th * W * Cp * 4          # dbuf f32 residual-in + out
                  + 2 * th * W * Pp * 2            # dbuf bf16 y2-in
                  + th * W * Pp * 4                # f32 h
                  + th * W * Cp * 4                # f32 conv3 result
                  + 2 * Pp * Cp * 2)               # conv3 weights (dbuf)
        if max(stage2, stage4) <= budget_bytes:
            return th
    return 1


def _bn_scale_bias(stats, gamma, beta, count):
    """Per-tile (sum, sumsq) partials -> per-channel (scale, bias)."""
    tot = jnp.sum(stats, axis=(0, 1))                      # (2, C)
    mean = tot[0] / count
    var = jnp.maximum(tot[1] / count - mean * mean, 0.0)   # biased variance
    scale = gamma * lax.rsqrt(var + EPS)
    bias = beta - mean * scale
    return jnp.stack([scale, bias], axis=0)                # (2, C) f32


# --------------------------------------------------------------------------- #
# Forward
# --------------------------------------------------------------------------- #
def bottleneck_forward_nhwc(x_nhwc, params, dilation, tile_h=None,
                            vmem_limit_bytes=None):
    """x_nhwc: (N, H, W, Cin) f32. Returns (N, H, W, Cout) f32."""
    w1, g1, b1, w2, g2, b2, w3, g3, b3 = params
    N, H, W, Cin = x_nhwc.shape
    P = w1.shape[1]
    Cout = w3.shape[1]
    assert Cin == Cout, "downsample=None requires inplanes == planes*4"
    d = int(dilation)

    Cp = _round_up(Cin, LANE)       # padded residual / output channels
    Pp = _round_up(P, LANE)         # padded bottleneck width

    x = _pad_axis(x_nhwc.astype(jnp.float32), 3, Cp)

    w1p = _pad_axis(_pad_axis(w1, 0, Cp), 1, Pp).astype(jnp.bfloat16)
    # (9, P, P) -> (3, 3*Pp, Pp): per kh, taps (kh,0..2) concatenated along K.
    w2p = _pad_axis(_pad_axis(w2, 1, Pp), 2, Pp).reshape(3, 3 * Pp, Pp)
    w2p = w2p.astype(jnp.bfloat16)
    w3p = _pad_axis(_pad_axis(w3, 0, Pp), 1, Cp).astype(jnp.bfloat16)
    g1p = _pad_axis(g1.reshape(-1).astype(jnp.float32), 0, Pp)
    b1p = _pad_axis(b1.reshape(-1).astype(jnp.float32), 0, Pp)
    g2p = _pad_axis(g2.reshape(-1).astype(jnp.float32), 0, Pp)
    b2p = _pad_axis(b2.reshape(-1).astype(jnp.float32), 0, Pp)
    g3p = _pad_axis(g3.reshape(-1).astype(jnp.float32), 0, Cp)
    b3p = _pad_axis(b3.reshape(-1).astype(jnp.float32), 0, Cp)

    vmem_limit = int(vmem_limit_bytes if vmem_limit_bytes is not None
                     else _default_vmem_limit_bytes())
    TH = tile_h if tile_h is not None else _pick_tile_h(
        H, W, Pp, Cp, d, (vmem_limit * 4) // 5)
    assert H % TH == 0, "tile_h must divide H"
    nT = H // TH
    count = float(N * H * W)

    cparams = pltpu.CompilerParams(
        dimension_semantics=("parallel", "parallel"),
        vmem_limit_bytes=vmem_limit)
    grid = (N, nT)
    tile = lambda C: pl.BlockSpec((1, TH, W, C), lambda n, t: (n, t, 0, 0))
    stat = lambda C: pl.BlockSpec((1, 1, 2, C), lambda n, t: (n, t, 0, 0))
    rep = lambda shape: pl.BlockSpec(shape, lambda n, t: (0,) * len(shape))

    # ---- stage 1: conv1 (1x1) + BN1 partial stats, y1 stored bf16 ---------
    y1, st1 = pl.pallas_call(
        _conv1x1_stats_kernel,
        grid=grid,
        in_specs=[tile(Cp), rep((Cp, Pp))],
        out_specs=[tile(Pp), stat(Pp)],
        out_shape=(jax.ShapeDtypeStruct((N, H, W, Pp), jnp.bfloat16),
                   jax.ShapeDtypeStruct((N, nT, 2, Pp), jnp.float32)),
        compiler_params=cparams,
    )(x, w1p)
    sb1 = _bn_scale_bias(st1, g1p, b1p, count)

    # ---- stage 2: BN1+ReLU -> conv2 (3x3 dilated) + BN2 stats, y2 bf16 ----
    y2, st2 = pl.pallas_call(
        functools.partial(_bn_relu_conv3x3_stats_kernel, d, TH, H),
        grid=grid,
        in_specs=[tile(Pp), rep((2, Pp)), rep((3, 3 * Pp, Pp)),
                  pl.BlockSpec(memory_space=pl.ANY)],
        out_specs=[tile(Pp), stat(Pp)],
        out_shape=(jax.ShapeDtypeStruct((N, H, W, Pp), jnp.bfloat16),
                   jax.ShapeDtypeStruct((N, nT, 2, Pp), jnp.float32)),
        scratch_shapes=[pltpu.VMEM((d, W, Pp), jnp.bfloat16),
                        pltpu.VMEM((d, W, Pp), jnp.bfloat16),
                        pltpu.SemaphoreType.DMA((2,))],
        compiler_params=cparams,
    )(y1, sb1, w2p, y1)
    sb2 = _bn_scale_bias(st2, g2p, b2p, count)

    # ---- stage 3: BN2+ReLU -> per-tile sum(h2) and Gram (analytic BN3) ----
    gram, hsum = pl.pallas_call(
        _bn_relu_gram_kernel,
        grid=grid,
        in_specs=[tile(Pp), rep((2, Pp))],
        out_specs=[pl.BlockSpec((1, 1, Pp, Pp), lambda n, t: (n, t, 0, 0)),
                   pl.BlockSpec((1, 1, 1, Pp), lambda n, t: (n, t, 0, 0))],
        out_shape=(jax.ShapeDtypeStruct((N, nT, Pp, Pp), jnp.float32),
                   jax.ShapeDtypeStruct((N, nT, 1, Pp), jnp.float32)),
        compiler_params=cparams,
    )(y2, sb2)

    # Analytic BN3 statistics: sum(y3) = sum(h2) @ w3, sumsq(y3) = diag(w3^T G w3).
    w3f = w3p.astype(jnp.float32)                    # bf16 values, exact in f32
    G = jnp.sum(gram, axis=(0, 1))                   # (Pp, Pp)
    hs = jnp.sum(hsum, axis=(0, 1, 2))               # (Pp,)
    s3 = hs @ w3f                                    # (Cp,)
    ss3 = jnp.sum(w3f * (G @ w3f), axis=0)           # (Cp,)
    mean3 = s3 / count
    var3 = jnp.maximum(ss3 / count - mean3 * mean3, 0.0)
    scale3 = g3p * lax.rsqrt(var3 + EPS)
    bias3 = b3p - mean3 * scale3
    sb3 = jnp.stack([scale3, bias3], axis=0)         # (2, Cp)

    # ---- stage 4: fused conv3 (1x1) + BN3 + residual + ReLU ----------------
    out = pl.pallas_call(
        _conv1x1_bn_add_relu_kernel,
        grid=grid,
        in_specs=[tile(Pp), tile(Cp), rep((2, Pp)), rep((2, Cp)), rep((Pp, Cp))],
        out_specs=tile(Cp),
        out_shape=jax.ShapeDtypeStruct((N, H, W, Cp), jnp.float32),
        compiler_params=cparams,
    )(y2, x, sb2, sb3, w3p)

    if Cp != Cout:
        out = out[..., :Cout]
    return out


def bottleneck_forward(x_nchw, params, dilation, tile_h=None,
                       vmem_limit_bytes=None):
    """PyTorch-layout wrapper: (N, Cin, H, W) f32 in, NCHW f32 out."""
    # TODO(synk): keep the surrounding model NHWC to avoid this transpose
    # round trip (an extra HBM read+write of the widest activation).
    x = jnp.transpose(x_nchw, (0, 2, 3, 1))
    out = bottleneck_forward_nhwc(x, params, dilation, tile_h=tile_h,
                                  vmem_limit_bytes=vmem_limit_bytes)
    return jnp.transpose(out, (0, 3, 1, 2))


# --------------------------------------------------------------------------- #
# Pure-JAX reference (PyTorch semantics; conv inputs and the bf16-stored
# intermediates y1/y2 are rounded to bf16 to mirror the kernel's storage and
# MXU-input dtypes; all BN math in f32).
# --------------------------------------------------------------------------- #
def _reference(x_nchw, params, dilation):
    w1, g1, b1, w2, g2, b2, w3, g3, b3 = params
    P = w1.shape[1]
    q = lambda t: t.astype(jnp.bfloat16).astype(jnp.float32)

    def bn(y, g, b, relu):
        mean = y.mean(axis=(0, 2, 3), keepdims=True)
        var = ((y - mean) ** 2).mean(axis=(0, 2, 3), keepdims=True)
        out = (y - mean) / jnp.sqrt(var + EPS) * g.reshape(1, -1, 1, 1) \
            + b.reshape(1, -1, 1, 1)
        return jnp.maximum(out, 0.0) if relu else out

    dn = ('NCHW', 'OIHW', 'NCHW')
    w1_oihw = q(w1).T[:, :, None, None]
    w2_oihw = q(w2).reshape(3, 3, P, P).transpose(3, 2, 0, 1)
    w3_oihw = q(w3).T[:, :, None, None]

    h = lax.conv_general_dilated(q(x_nchw), w1_oihw, (1, 1), 'VALID',
                                 dimension_numbers=dn)
    h = bn(q(h), g1, b1, True)          # y1 is stored bf16 by the kernel
    h = lax.conv_general_dilated(q(h), w2_oihw, (1, 1),
                                 ((dilation, dilation), (dilation, dilation)),
                                 rhs_dilation=(dilation, dilation),
                                 dimension_numbers=dn)
    h = bn(q(h), g2, b2, True)          # y2 is stored bf16 by the kernel
    h = lax.conv_general_dilated(q(h), w3_oihw, (1, 1), 'VALID',
                                 dimension_numbers=dn)
    h = bn(h, g3, b3, False)
    return jnp.maximum(h + x_nchw, 0.0)


if __name__ == "__main__":
    # planes=4, inplanes=planes*4=16, stride=1, dilation=2, downsample=None.
    N, H, W = 2, 16, 16
    planes = 4
    inplanes = planes * 4
    dilation = 2

    key = jax.random.PRNGKey(0)
    keys = jax.random.split(key, 10)

    # Weight layouts (matmul-friendly):
    #   w1: (Cin, P)    == torch conv1.weight[:, :, 0, 0].T
    #   w2: (9, P, P)   == torch conv2.weight[:, :, kh, kw].T per tap (kh*3+kw)
    #   w3: (P, 4P)     == torch conv3.weight[:, :, 0, 0].T
    w1 = jax.random.normal(keys[0], (inplanes, planes), jnp.float32) * 0.1
    w2 = jax.random.normal(keys[1], (9, planes, planes), jnp.float32) * 0.1
    w3 = jax.random.normal(keys[2], (planes, planes * 4), jnp.float32) * 0.1
    g1 = 1.0 + 0.1 * jax.random.normal(keys[3], (planes,), jnp.float32)
    b1 = 0.1 * jax.random.normal(keys[4], (planes,), jnp.float32)
    g2 = 1.0 + 0.1 * jax.random.normal(keys[5], (planes,), jnp.float32)
    b2 = 0.1 * jax.random.normal(keys[6], (planes,), jnp.float32)
    g3 = 1.0 + 0.1 * jax.random.normal(keys[7], (planes * 4,), jnp.float32)
    b3 = 0.1 * jax.random.normal(keys[8], (planes * 4,), jnp.float32)
    params = (w1, g1, b1, w2, g2, b2, w3, g3, b3)

    x = jax.random.normal(keys[9], (N, inplanes, H, W), jnp.float32)

    # tile_h=8 -> 2 row tiles per image, exercising the halo-DMA and the
    # multi-tile statistics-reduction paths.
    fwd = jax.jit(lambda xx, pp: bottleneck_forward(xx, pp, dilation, tile_h=8))
    out = jax.block_until_ready(fwd(x, params))
    ref = jax.block_until_ready(_reference(x, params, dilation))

    assert out.shape == (N, inplanes, H, W)
    err = float(jnp.max(jnp.abs(out - ref)))
    # bf16 roundings are mirrored in the reference; remaining differences are
    # f32 accumulation-order and rsqrt-vs-sqrt noise.
    assert err < 1e-2, err
    print("KERNEL_OK")
</pallas_src>

<mosaic_0001>
module attributes {stable_mosaic.version = 11 : i64} {
  func.func @_conv1x1_stats_kernel(%arg0: i32, %arg1: i32, %arg2: memref<1x8x16x128xf32, #tpu.memory_space<vmem>>, %arg3: memref<128x128xbf16, #tpu.memory_space<vmem>>, %arg4: memref<1x8x16x128xbf16, #tpu.memory_space<vmem>>, %arg5: memref<1x1x2x128xf32, #tpu.memory_space<vmem>>) attributes {dimension_semantics = [#tpu.dimension_semantics<parallel>, #tpu.dimension_semantics<parallel>], iteration_bounds = array<i64: 2, 2>, scalar_prefetch = 0 : i64, scratch_operands = 0 : i64, tpu.core_type = #tpu.core_type<tc>, window_params = [{transform_indices = @transform_0, window_bounds = array<i64: 1, 8, 16, 128>}, {pipeline_mode = #tpu.pipeline_mode<synchronous>, transform_indices = @transform_1, window_bounds = array<i64: 128, 128>}, {transform_indices = @transform_2, window_bounds = array<i64: 1, 8, 16, 128>}, {transform_indices = @transform_3, window_bounds = array<i64: 1, 1, 2, 128>}]} {
    %c0 = arith.constant 0 : index
    %c0_0 = arith.constant 0 : index
    %c0_1 = arith.constant 0 : index
    %c0_2 = arith.constant 0 : index
    %0 = vector.load %arg2[%c0, %c0_0, %c0_1, %c0_2] : memref<1x8x16x128xf32, #tpu.memory_space<vmem>>, vector<1x8x16x128xf32>
    %1 = vector.shape_cast %0 : vector<1x8x16x128xf32> to vector<128x128xf32>
    %2 = arith.truncf %1 : vector<128x128xf32> to vector<128x128xbf16>
    %c0_3 = arith.constant 0 : index
    %c0_4 = arith.constant 0 : index
    %3 = vector.load %arg3[%c0_3, %c0_4] : memref<128x128xbf16, #tpu.memory_space<vmem>>, vector<128x128xbf16>
    %cst = arith.constant dense<0.000000e+00> : vector<128x128xf32>
    %4 = tpu.matmul %2, %3, %cst {dimension_numbers = #tpu.dot_dimension_numbers<[1], [0], [0], [1], [0, 0, 1, 1], [], []>} : vector<128x128xbf16>, vector<128x128xbf16>, vector<128x128xf32> -> vector<128x128xf32>
    %5 = arith.truncf %4 : vector<128x128xf32> to vector<128x128xbf16>
    %6 = arith.extf %5 : vector<128x128xbf16> to vector<128x128xf32>
    %cst_5 = arith.constant dense<0.000000e+00> : vector<128xf32>
    %7 = vector.multi_reduction <add>, %6, %cst_5 [0] : vector<128x128xf32> to vector<128xf32>
    %8 = vector.shape_cast %7 : vector<128xf32> to vector<1x128xf32>
    %9 = arith.mulf %6, %6 : vector<128x128xf32>
    %cst_6 = arith.constant dense<0.000000e+00> : vector<128xf32>
    %10 = vector.multi_reduction <add>, %9, %cst_6 [0] : vector<128x128xf32> to vector<128xf32>
    %11 = vector.shape_cast %10 : vector<128xf32> to vector<1x128xf32>
    %12 = tpu.concatenate %8, %11 in 0 : vector<1x128xf32>, vector<1x128xf32> -> vector<2x128xf32>
    %13 = vector.shape_cast %12 : vector<2x128xf32> to vector<1x1x2x128xf32>
    %c0_7 = arith.constant 0 : index
    %c0_8 = arith.constant 0 : index
    %c0_9 = arith.constant 0 : index
    %c0_10 = arith.constant 0 : index
    %14 = vector.load %arg5[%c0_7, %c0_8, %c0_9, %c0_10] : memref<1x1x2x128xf32, #tpu.memory_space<vmem>>, vector<1x1x2x128xf32>
    tpu.vector_store %arg5[%c0_7, %c0_8, %c0_9, %c0_10], %13 {strides = array<i32>} : memref<1x1x2x128xf32, #tpu.memory_space<vmem>>, vector<1x1x2x128xf32>,
    %15 = vector.shape_cast %5 : vector<128x128xbf16> to vector<1x8x16x128xbf16>
    %c0_11 = arith.constant 0 : index
    %c0_12 = arith.constant 0 : index
    %c0_13 = arith.constant 0 : index
    %c0_14 = arith.constant 0 : index
    %16 = vector.load %arg4[%c0_11, %c0_12, %c0_13, %c0_14] : memref<1x8x16x128xbf16, #tpu.memory_space<vmem>>, vector<1x8x16x128xbf16>
    tpu.vector_store %arg4[%c0_11, %c0_12, %c0_13, %c0_14], %15 {strides = array<i32>} : memref<1x8x16x128xbf16, #tpu.memory_space<vmem>>, vector<1x8x16x128xbf16>,
    return
  }
  func.func @transform_0(%arg0: i32, %arg1: i32) -> (i32, i32, i32, i32) {
    %c0_i32 = arith.constant 0 : i32
    %c0_i32_0 = arith.constant 0 : i32
    %c0_i32_1 = arith.constant 0 : i32
    return %arg0, %arg1, %c0_i32, %c0_i32_0 : i32, i32, i32, i32
  }
  func.func @transform_1(%arg0: i32, %arg1: i32) -> (i32, i32) {
    %c0_i32 = arith.constant 0 : i32
    %c0_i32_0 = arith.constant 0 : i32
    %c0_i32_1 = arith.constant 0 : i32
    return %c0_i32, %c0_i32_0 : i32, i32
  }
  func.func @transform_2(%arg0: i32, %arg1: i32) -> (i32, i32, i32, i32) {
    %c0_i32 = arith.constant 0 : i32
    %c0_i32_0 = arith.constant 0 : i32
    %c0_i32_1 = arith.constant 0 : i32
    return %arg0, %arg1, %c0_i32, %c0_i32_0 : i32, i32, i32, i32
  }
  func.func @transform_3(%arg0: i32, %arg1: i32) -> (i32, i32, i32, i32) {
    %c0_i32 = arith.constant 0 : i32
    %c0_i32_0 = arith.constant 0 : i32
    %c0_i32_1 = arith.constant 0 : i32
    return %arg0, %arg1, %c0_i32, %c0_i32_0 : i32, i32, i32, i32
  }
}

module attributes {stable_mosaic.version = 11 : i64} {
  func.func @_bn_relu_gram_kernel(%arg0: i32, %arg1: i32, %arg2: memref<1x8x16x128xbf16, #tpu.memory_space<vmem>>, %arg3: memref<2x128xf32, #tpu.memory_space<vmem>>, %arg4: memref<1x1x128x128xf32, #tpu.memory_space<vmem>>, %arg5: memref<1x1x1x128xf32, #tpu.memory_space<vmem>>) attributes {dimension_semantics = [#tpu.dimension_semantics<parallel>, #tpu.dimension_semantics<parallel>], iteration_bounds = array<i64: 2, 2>, scalar_prefetch = 0 : i64, scratch_operands = 0 : i64, tpu.core_type = #tpu.core_type<tc>, window_params = [{transform_indices = @transform_0, window_bounds = array<i64: 1, 8, 16, 128>}, {pipeline_mode = #tpu.pipeline_mode<synchronous>, transform_indices = @transform_1, window_bounds = array<i64: 2, 128>}, {transform_indices = @transform_2, window_bounds = array<i64: 1, 1, 128, 128>}, {transform_indices = @transform_3, window_bounds = array<i64: 1, 1, 1, 128>}]} {
    %c0 = arith.constant 0 : index
    %c0_0 = arith.constant 0 : index
    %0 = vector.load %arg3[%c0, %c0_0] : memref<2x128xf32, #tpu.memory_space<vmem>>, vector<2x128xf32>
    %c0_1 = arith.constant 0 : index
    %c0_2 = arith.constant 0 : index
    %c0_3 = arith.constant 0 : index
    %c0_4 = arith.constant 0 : index
    %1 = vector.load %arg2[%c0_1, %c0_2, %c0_3, %c0_4] : memref<1x8x16x128xbf16, #tpu.memory_space<vmem>>, vector<1x8x16x128xbf16>
    %2 = vector.shape_cast %1 : vector<1x8x16x128xbf16> to vector<128x128xbf16>
    %3 = arith.extf %2 : vector<128x128xbf16> to vector<128x128xf32>
    %4 = vector.extract_strided_slice %0 {offsets = [0, 0], sizes = [1, 128], strides = [1, 1]} : vector<2x128xf32> to vector<1x128xf32>
    %5 = vector.broadcast %4 : vector<1x128xf32> to vector<128x128xf32>
    %6 = arith.mulf %3, %5 : vector<128x128xf32>
    %7 = vector.extract_strided_slice %0 {offsets = [1, 0], sizes = [1, 128], strides = [1, 1]} : vector<2x128xf32> to vector<1x128xf32>
    %8 = vector.broadcast %7 : vector<1x128xf32> to vector<128x128xf32>
    %9 = arith.addf %6, %8 : vector<128x128xf32>
    %cst = arith.constant 0.000000e+00 : f32
    %10 = vector.broadcast %cst : f32 to vector<128x128xf32>
    %11 = arith.maximumf %9, %10 : vector<128x128xf32>
    %12 = arith.truncf %11 : vector<128x128xf32> to vector<128x128xbf16>
    %13 = arith.extf %12 : vector<128x128xbf16> to vector<128x128xf32>
    %cst_5 = arith.constant dense<0.000000e+00> : vector<128xf32>
    %14 = vector.multi_reduction <add>, %13, %cst_5 [0] : vector<128x128xf32> to vector<128xf32>
    %15 = vector.shape_cast %14 : vector<128xf32> to vector<1x128xf32>
    %16 = vector.shape_cast %15 : vector<1x128xf32> to vector<1x1x1x128xf32>
    %c0_6 = arith.constant 0 : index
    %c0_7 = arith.constant 0 : index
    %c0_8 = arith.constant 0 : index
    %c0_9 = arith.constant 0 : index
    %17 = vector.load %arg5[%c0_6, %c0_7, %c0_8, %c0_9] : memref<1x1x1x128xf32, #tpu.memory_space<vmem>>, vector<1x1x1x128xf32>
    tpu.vector_store %arg5[%c0_6, %c0_7, %c0_8, %c0_9], %16 {strides = array<i32>} : memref<1x1x1x128xf32, #tpu.memory_space<vmem>>, vector<1x1x1x128xf32>,
    %18 = tpu.transpose %11, [1, 0] : vector<128x128xf32> -> vector<128x128xf32>
    %19 = arith.truncf %18 : vector<128x128xf32> to vector<128x128xbf16>
    %cst_10 = arith.constant dense<0.000000e+00> : vector<128x128xf32>
    %20 = tpu.matmul %19, %12, %cst_10 {dimension_numbers = #tpu.dot_dimension_numbers<[1], [0], [0], [1], [0, 0, 1, 1], [], []>} : vector<128x128xbf16>, vector<128x128xbf16>, vector<128x128xf32> -> vector<128x128xf32>
    %21 = vector.shape_cast %20 : vector<128x128xf32> to vector<1x1x128x128xf32>
    %c0_11 = arith.constant 0 : index
    %c0_12 = arith.constant 0 : index
    %c0_13 = arith.constant 0 : index
    %c0_14 = arith.constant 0 : index
    %22 = vector.load %arg4[%c0_11, %c0_12, %c0_13, %c0_14] : memref<1x1x128x128xf32, #tpu.memory_space<vmem>>, vector<1x1x128x128xf32>
    tpu.vector_store %arg4[%c0_11, %c0_12, %c0_13, %c0_14], %21 {strides = array<i32>} : memref<1x1x128x128xf32, #tpu.memory_space<vmem>>, vector<1x1x128x128xf32>,
    return
  }
  func.func @transform_0(%arg0: i32, %arg1: i32) -> (i32, i32, i32, i32) {
    %c0_i32 = arith.constant 0 : i32
    %c0_i32_0 = arith.constant 0 : i32
    %c0_i32_1 = arith.constant 0 : i32
    return %arg0, %arg1, %c0_i32, %c0_i32_0 : i32, i32, i32, i32
  }
  func.func @transform_1(%arg0: i32, %arg1: i32) -> (i32, i32) {
    %c0_i32 = arith.constant 0 : i32
    %c0_i32_0 = arith.constant 0 : i32
    %c0_i32_1 = arith.constant 0 : i32
    return %c0_i32, %c0_i32_0 : i32, i32
  }
  func.func @transform_2(%arg0: i32, %arg1: i32) -> (i32, i32, i32, i32) {
    %c0_i32 = arith.constant 0 : i32
    %c0_i32_0 = arith.constant 0 : i32
    %c0_i32_1 = arith.constant 0 : i32
    return %arg0, %arg1, %c0_i32, %c0_i32_0 : i32, i32, i32, i32
  }
  func.func @transform_3(%arg0: i32, %arg1: i32) -> (i32, i32, i32, i32) {
    %c0_i32 = arith.constant 0 : i32
    %c0_i32_0 = arith.constant 0 : i32
    %c0_i32_1 = arith.constant 0 : i32
    return %arg0, %arg1, %c0_i32, %c0_i32_0 : i32, i32, i32, i32
  }
}

module attributes {stable_mosaic.version = 11 : i64} {
  func.func @_bn_relu_conv3x3_stats_kernel(%arg0: i32, %arg1: i32, %arg2: memref<1x8x16x128xbf16, #tpu.memory_space<vmem>>, %arg3: memref<2x128xf32, #tpu.memory_space<vmem>>, %arg4: memref<3x384x128xbf16, #tpu.memory_space<vmem>>, %arg5: memref<2x16x16x128xbf16, #tpu.memory_space<any>>, %arg6: memref<1x8x16x128xbf16, #tpu.memory_space<vmem>>, %arg7: memref<1x1x2x128xf32, #tpu.memory_space<vmem>>, %arg8: memref<2x16x128xbf16, #tpu.memory_space<vmem>>, %arg9: memref<2x16x128xbf16, #tpu.memory_space<vmem>>, %arg10: memref<2x!tpu.dma_semaphore, #tpu.memory_space<semaphore_mem>>) attributes {dimension_semantics = [#tpu.dimension_semantics<parallel>, #tpu.dimension_semantics<parallel>], iteration_bounds = array<i64: 2, 2>, scalar_prefetch = 0 : i64, scratch_operands = 3 : i64, tpu.core_type = #tpu.core_type<tc>, window_params = [{transform_indices = @transform_0, window_bounds = array<i64: 1, 8, 16, 128>}, {pipeline_mode = #tpu.pipeline_mode<synchronous>, transform_indices = @transform_1, window_bounds = array<i64: 2, 128>}, {pipeline_mode = #tpu.pipeline_mode<synchronous>, transform_indices = @transform_2, window_bounds = array<i64: 3, 384, 128>}, {}, {transform_indices = @transform_4, window_bounds = array<i64: 1, 8, 16, 128>}, {transform_indices = @transform_5, window_bounds = array<i64: 1, 1, 2, 128>}]} {
    %c8_i32 = arith.constant 8 : i32
    %0 = arith.muli %arg1, %c8_i32 : i32
    %c2_i32 = arith.constant 2 : i32
    %1 = arith.subi %0, %c2_i32 : i32
    %c0_i32 = arith.constant 0 : i32
    %c14_i32 = arith.constant 14 : i32
    %2 = arith.maxsi %c0_i32, %1 : i32
    %3 = arith.minsi %c14_i32, %2 : i32
    %c8_i32_0 = arith.constant 8 : i32
    %4 = arith.addi %0, %c8_i32_0 : i32
    %c0_i32_1 = arith.constant 0 : i32
    %c14_i32_2 = arith.constant 14 : i32
    %5 = arith.maxsi %c0_i32_1, %4 : i32
    %6 = arith.minsi %c14_i32_2, %5 : i32
    %c0_i32_3 = arith.constant 0 : i32
    %c0_i32_4 = arith.constant 0 : i32
    %c0_i32_5 = arith.constant 0 : i32
    %7 = tpu.memref_slice %arg5[%arg0, %3, %c0_i32_4, %c0_i32_5] : memref<2x16x16x128xbf16, #tpu.memory_space<any>> -> memref<1x2x16x128xbf16, #tpu.memory_space<any>>
    %8 = tpu.memref_squeeze %7 : memref<1x2x16x128xbf16, #tpu.memory_space<any>> -> memref<2x16x128xbf16, #tpu.memory_space<any>>
    %9 = tpu.memref_slice %arg10[%c0_i32_3] : memref<2x!tpu.dma_semaphore, #tpu.memory_space<semaphore_mem>> -> memref<1x!tpu.dma_semaphore, #tpu.memory_space<semaphore_mem>>
    %10 = tpu.memref_squeeze %9 : memref<1x!tpu.dma_semaphore, #tpu.memory_space<semaphore_mem>> -> memref<!tpu.dma_semaphore, #tpu.memory_space<semaphore_mem>>
    tpu.enqueue_dma source(%8 : memref<2x16x128xbf16, #tpu.memory_space<any>>) target(%arg8 : memref<2x16x128xbf16, #tpu.memory_space<vmem>>) target_semaphore(%10 : memref<!tpu.dma_semaphore, #tpu.memory_space<semaphore_mem>>)
    %c1_i32 = arith.constant 1 : i32
    %c0_i32_6 = arith.constant 0 : i32
    %c0_i32_7 = arith.constant 0 : i32
    %11 = tpu.memref_slice %arg5[%arg0, %6, %c0_i32_6, %c0_i32_7] : memref<2x16x16x128xbf16, #tpu.memory_space<any>> -> memref<1x2x16x128xbf16, #tpu.memory_space<any>>
    %12 = tpu.memref_squeeze %11 : memref<1x2x16x128xbf16, #tpu.memory_space<any>> -> memref<2x16x128xbf16, #tpu.memory_space<any>>
    %13 = tpu.memref_slice %arg10[%c1_i32] : memref<2x!tpu.dma_semaphore, #tpu.memory_space<semaphore_mem>> -> memref<1x!tpu.dma_semaphore, #tpu.memory_space<semaphore_mem>>
    %14 = tpu.memref_squeeze %13 : memref<1x!tpu.dma_semaphore, #tpu.memory_space<semaphore_mem>> -> memref<!tpu.dma_semaphore, #tpu.memory_space<semaphore_mem>>
    tpu.enqueue_dma source(%12 : memref<2x16x128xbf16, #tpu.memory_space<any>>) target(%arg9 : memref<2x16x128xbf16, #tpu.memory_space<vmem>>) target_semaphore(%14 : memref<!tpu.dma_semaphore, #tpu.memory_space<semaphore_mem>>)
    %c0 = arith.constant 0 : index
    %c0_8 = arith.constant 0 : index
    %15 = vector.load %arg3[%c0, %c0_8] : memref<2x128xf32, #tpu.memory_space<vmem>>, vector<2x128xf32>
    %16 = vector.extract_strided_slice %15 {offsets = [0, 0], sizes = [1, 128], strides = [1, 1]} : vector<2x128xf32> to vector<1x128xf32>
    %17 = vector.shape_cast %16 : vector<1x128xf32> to vector<1x1x128xf32>
    %18 = vector.extract_strided_slice %15 {offsets = [1, 0], sizes = [1, 128], strides = [1, 1]} : vector<2x128xf32> to vector<1x128xf32>
    %19 = vector.shape_cast %18 : vector<1x128xf32> to vector<1x1x128xf32>
    %c0_9 = arith.constant 0 : index
    %c0_10 = arith.constant 0 : index
    %c0_11 = arith.constant 0 : index
    %c0_12 = arith.constant 0 : index
    %20 = vector.load %arg2[%c0_9, %c0_10, %c0_11, %c0_12] : memref<1x8x16x128xbf16, #tpu.memory_space<vmem>>, vector<1x8x16x128xbf16>
    %21 = vector.shape_cast %20 : vector<1x8x16x128xbf16> to vector<8x16x128xbf16>
    %22 = arith.extf %21 : vector<8x16x128xbf16> to vector<8x16x128xf32>
    %23 = vector.broadcast %17 : vector<1x1x128xf32> to vector<8x16x128xf32>
    %24 = arith.mulf %22, %23 : vector<8x16x128xf32>
    %25 = vector.broadcast %19 : vector<1x1x128xf32> to vector<8x16x128xf32>
    %26 = arith.addf %24, %25 : vector<8x16x128xf32>
    %cst = arith.constant 0.000000e+00 : f32
    %27 = vector.broadcast %cst : f32 to vector<8x16x128xf32>
    %28 = arith.maximumf %26, %27 : vector<8x16x128xf32>
    %29 = arith.truncf %28 : vector<8x16x128xf32> to vector<8x16x128xbf16>
    %c0_i32_13 = arith.constant 0 : i32
    %c0_i32_14 = arith.constant 0 : i32
    %c0_i32_15 = arith.constant 0 : i32
    %30 = tpu.memref_slice %arg5[%arg0, %3, %c0_i32_14, %c0_i32_15] : memref<2x16x16x128xbf16, #tpu.memory_space<any>> -> memref<1x2x16x128xbf16, #tpu.memory_space<any>>
    %31 = tpu.memref_squeeze %30 : memref<1x2x16x128xbf16, #tpu.memory_space<any>> -> memref<2x16x128xbf16, #tpu.memory_space<any>>
    %32 = tpu.memref_slice %arg10[%c0_i32_13] : memref<2x!tpu.dma_semaphore, #tpu.memory_space<semaphore_mem>> -> memref<1x!tpu.dma_semaphore, #tpu.memory_space<semaphore_mem>>
    %33 = tpu.memref_squeeze %32 : memref<1x!tpu.dma_semaphore, #tpu.memory_space<semaphore_mem>> -> memref<!tpu.dma_semaphore, #tpu.memory_space<semaphore_mem>>
    tpu.wait_dma2 semaphore(%33 : memref<!tpu.dma_semaphore, #tpu.memory_space<semaphore_mem>>) src(%31 : memref<2x16x128xbf16, #tpu.memory_space<any>>) dst(%arg8 : memref<2x16x128xbf16, #tpu.memory_space<vmem>>)
    %c1_i32_16 = arith.constant 1 : i32
    %c0_i32_17 = arith.constant 0 : i32
    %c0_i32_18 = arith.constant 0 : i32
    %34 = tpu.memref_slice %arg5[%arg0, %6, %c0_i32_17, %c0_i32_18] : memref<2x16x16x128xbf16, #tpu.memory_space<any>> -> memref<1x2x16x128xbf16, #tpu.memory_space<any>>
    %35 = tpu.memref_squeeze %34 : memref<1x2x16x128xbf16, #tpu.memory_space<any>> -> memref<2x16x128xbf16, #tpu.memory_space<any>>
    %36 = tpu.memref_slice %arg10[%c1_i32_16] : memref<2x!tpu.dma_semaphore, #tpu.memory_space<semaphore_mem>> -> memref<1x!tpu.dma_semaphore, #tpu.memory_space<semaphore_mem>>
    %37 = tpu.memref_squeeze %36 : memref<1x!tpu.dma_semaphore, #tpu.memory_space<semaphore_mem>> -> memref<!tpu.dma_semaphore, #tpu.memory_space<semaphore_mem>>
    tpu.wait_dma2 semaphore(%37 : memref<!tpu.dma_semaphore, #tpu.memory_space<semaphore_mem>>) src(%35 : memref<2x16x128xbf16, #tpu.memory_space<any>>) dst(%arg9 : memref<2x16x128xbf16, #tpu.memory_space<vmem>>)
    %38 = tpu.iota {dimensions = array<i32: 0>} : vector<2x1x1xi32>
    %c2_i32_19 = arith.constant 2 : i32
    %39 = arith.subi %0, %c2_i32_19 : i32
    %40 = vector.broadcast %39 : i32 to vector<2x1x1xi32>
    %41 = arith.addi %38, %40 : vector<2x1x1xi32>
    %c0_20 = arith.constant 0 : index
    %c0_21 = arith.constant 0 : index
    %c0_22 = arith.constant 0 : index
    %42 = vector.load %arg8[%c0_20, %c0_21, %c0_22] : memref<2x16x128xbf16, #tpu.memory_space<vmem>>, vector<2x16x128xbf16>
    %43 = arith.extf %42 : vector<2x16x128xbf16> to vector<2x16x128xf32>
    %44 = vector.broadcast %17 : vector<1x1x128xf32> to vector<2x16x128xf32>
    %45 = arith.mulf %43, %44 : vector<2x16x128xf32>
    %46 = vector.broadcast %19 : vector<1x1x128xf32> to vector<2x16x128xf32>
    %47 = arith.addf %45, %46 : vector<2x16x128xf32>
    %cst_23 = arith.constant 0.000000e+00 : f32
    %48 = vector.broadcast %cst_23 : f32 to vector<2x16x128xf32>
    %49 = arith.maximumf %47, %48 : vector<2x16x128xf32>
    %c0_i32_24 = arith.constant 0 : i32
    %50 = vector.broadcast %c0_i32_24 : i32 to vector<2x1x1xi32>
    %51 = arith.cmpi sge, %41, %50 : vector<2x1x1xi32>
    %cst_25 = arith.constant 0.000000e+00 : f32
    %52 = vector.shape_cast %51 : vector<2x1x1xi1> to vector<2x1x1xi1>
    %53 = vector.broadcast %52 : vector<2x1x1xi1> to vector<2x16x128xi1>
    %54 = vector.broadcast %cst_25 : f32 to vector<2x16x128xf32>
    %55 = arith.select %53, %49, %54 : vector<2x16x128xi1>, vector<2x16x128xf32>
    %56 = arith.truncf %55 : vector<2x16x128xf32> to vector<2x16x128xbf16>
    %57 = tpu.iota {dimensions = array<i32: 0>} : vector<2x1x1xi32>
    %c8_i32_26 = arith.constant 8 : i32
    %58 = arith.addi %0, %c8_i32_26 : i32
    %59 = vector.broadcast %58 : i32 to vector<2x1x1xi32>
    %60 = arith.addi %57, %59 : vector<2x1x1xi32>
    %c0_27 = arith.constant 0 : index
    %c0_28 = arith.constant 0 : index
    %c0_29 = arith.constant 0 : index
    %61 = vector.load %arg9[%c0_27, %c0_28, %c0_29] : memref<2x16x128xbf16, #tpu.memory_space<vmem>>, vector<2x16x128xbf16>
    %62 = arith.extf %61 : vector<2x16x128xbf16> to vector<2x16x128xf32>
    %63 = vector.broadcast %17 : vector<1x1x128xf32> to vector<2x16x128xf32>
    %64 = arith.mulf %62, %63 : vector<2x16x128xf32>
    %65 = vector.broadcast %19 : vector<1x1x128xf32> to vector<2x16x128xf32>
    %66 = arith.addf %64, %65 : vector<2x16x128xf32>
    %cst_30 = arith.constant 0.000000e+00 : f32
    %67 = vector.broadcast %cst_30 : f32 to vector<2x16x128xf32>
    %68 = arith.maximumf %66, %67 : vector<2x16x128xf32>
    %c16_i32 = arith.constant 16 : i32
    %69 = vector.broadcast %c16_i32 : i32 to vector<2x1x1xi32>
    %70 = arith.cmpi slt, %60, %69 : vector<2x1x1xi32>
    %cst_31 = arith.constant 0.000000e+00 : f32
    %71 = vector.shape_cast %70 : vector<2x1x1xi1> to vector<2x1x1xi1>
    %72 = vector.broadcast %71 : vector<2x1x1xi1> to vector<2x16x128xi1>
    %73 = vector.broadcast %cst_31 : f32 to vector<2x16x128xf32>
    %74 = arith.select %72, %68, %73 : vector<2x16x128xi1>, vector<2x16x128xf32>
    %75 = arith.truncf %74 : vector<2x16x128xf32> to vector<2x16x128xbf16>
    %76 = tpu.concatenate %56, %29, %75 in 0 : vector<2x16x128xbf16>, vector<8x16x128xbf16>, vector<2x16x128xbf16> -> vector<12x16x128xbf16>
    %c0_i32_32 = arith.constant 0 : i32
    %77 = arith.sitofp %c0_i32_32 : i32 to bf16
    %78 = vector.broadcast %77 : bf16 to vector<12x2x128xbf16>
    %79 = tpu.concatenate %78, %76 in 1 : vector<12x2x128xbf16>, vector<12x16x128xbf16> -> vector<12x18x128xbf16>
    %80 = vector.broadcast %77 : bf16 to vector<12x2x128xbf16>
    %81 = tpu.concatenate %79, %80 in 1 : vector<12x18x128xbf16>, vector<12x2x128xbf16> -> vector<12x20x128xbf16>
    %82 = vector.extract_strided_slice %81 {offsets = [0, 0, 0], sizes = [12, 16, 128], strides = [1, 1, 1]} : vector<12x20x128xbf16> to vector<12x16x128xbf16>
    %83 = vector.extract_strided_slice %81 {offsets = [0, 2, 0], sizes = [12, 16, 128], strides = [1, 1, 1]} : vector<12x20x128xbf16> to vector<12x16x128xbf16>
    %84 = vector.extract_strided_slice %81 {offsets = [0, 4, 0], sizes = [12, 16, 128], strides = [1, 1, 1]} : vector<12x20x128xbf16> to vector<12x16x128xbf16>
    %85 = tpu.concatenate %82, %83, %84 in 2 : vector<12x16x128xbf16>, vector<12x16x128xbf16>, vector<12x16x128xbf16> -> vector<12x16x384xbf16>
    %cst_33 = arith.constant 0.000000e+00 : f32
    %86 = vector.broadcast %cst_33 : f32 to vector<128x128xf32>
    %87 = vector.extract_strided_slice %85 {offsets = [0, 0, 0], sizes = [8, 16, 384], strides = [1, 1, 1]} : vector<12x16x384xbf16> to vector<8x16x384xbf16>
    %88 = vector.shape_cast %87 : vector<8x16x384xbf16> to vector<128x384xbf16>
    %c0_34 = arith.constant 0 : index
    %c0_35 = arith.constant 0 : index
    %c0_36 = arith.constant 0 : index
    %89 = vector.load %arg4[%c0_34, %c0_35, %c0_36] : memref<3x384x128xbf16, #tpu.memory_space<vmem>>, vector<1x384x128xbf16>
    %90 = vector.shape_cast %89 : vector<1x384x128xbf16> to vector<384x128xbf16>
    %cst_37 = arith.constant dense<0.000000e+00> : vector<128x128xf32>
    %91 = tpu.matmul %88, %90, %cst_37 {dimension_numbers = #tpu.dot_dimension_numbers<[1], [0], [0], [1], [0, 0, 1, 1], [], []>} : vector<128x384xbf16>, vector<384x128xbf16>, vector<128x128xf32> -> vector<128x128xf32>
    %92 = arith.addf %86, %91 : vector<128x128xf32>
    %93 = vector.extract_strided_slice %85 {offsets = [2, 0, 0], sizes = [8, 16, 384], strides = [1, 1, 1]} : vector<12x16x384xbf16> to vector<8x16x384xbf16>
    %94 = vector.shape_cast %93 : vector<8x16x384xbf16> to vector<128x384xbf16>
    %c1 = arith.constant 1 : index
    %c0_38 = arith.constant 0 : index
    %c0_39 = arith.constant 0 : index
    %95 = vector.load %arg4[%c1, %c0_38, %c0_39] : memref<3x384x128xbf16, #tpu.memory_space<vmem>>, vector<1x384x128xbf16>
    %96 = vector.shape_cast %95 : vector<1x384x128xbf16> to vector<384x128xbf16>
    %cst_40 = arith.constant dense<0.000000e+00> : vector<128x128xf32>
    %97 = tpu.matmul %94, %96, %cst_40 {dimension_numbers = #tpu.dot_dimension_numbers<[1], [0], [0], [1], [0, 0, 1, 1], [], []>} : vector<128x384xbf16>, vector<384x128xbf16>, vector<128x128xf32> -> vector<128x128xf32>
    %98 = arith.addf %92, %97 : vector<128x128xf32>
    %99 = vector.extract_strided_slice %85 {offsets = [4, 0, 0], sizes = [8, 16, 384], strides = [1, 1, 1]} : vector<12x16x384xbf16> to vector<8x16x384xbf16>
    %100 = vector.shape_cast %99 : vector<8x16x384xbf16> to vector<128x384xbf16>
    %c2 = arith.constant 2 : index
    %c0_41 = arith.constant 0 : index
    %c0_42 = arith.constant 0 : index
    %101 = vector.load %arg4[%c2, %c0_41, %c0_42] : memref<3x384x128xbf16, #tpu.memory_space<vmem>>, vector<1x384x128xbf16>
    %102 = vector.shape_cast %101 : vector<1x384x128xbf16> to vector<384x128xbf16>
    %cst_43 = arith.constant dense<0.000000e+00> : vector<128x128xf32>
    %103 = tpu.matmul %100, %102, %cst_43 {dimension_numbers = #tpu.dot_dimension_numbers<[1], [0], [0], [1], [0, 0, 1, 1], [], []>} : vector<128x384xbf16>, vector<384x128xbf16>, vector<128x128xf32> -> vector<128x128xf32>
    %104 = arith.addf %98, %103 : vector<128x128xf32>
    %105 = arith.truncf %104 : vector<128x128xf32> to vector<128x128xbf16>
    %106 = arith.extf %105 : vector<128x128xbf16> to vector<128x128xf32>
    %cst_44 = arith.constant dense<0.000000e+00> : vector<128xf32>
    %107 = vector.multi_reduction <add>, %106, %cst_44 [0] : vector<128x128xf32> to vector<128xf32>
    %108 = vector.shape_cast %107 : vector<128xf32> to vector<1x128xf32>
    %109 = arith.mulf %106, %106 : vector<128x128xf32>
    %cst_45 = arith.constant dense<0.000000e+00> : vector<128xf32>
    %110 = vector.multi_reduction <add>, %109, %cst_45 [0] : vector<128x128xf32> to vector<128xf32>
    %111 = vector.shape_cast %110 : vector<128xf32> to vector<1x128xf32>
    %112 = tpu.concatenate %108, %111 in 0 : vector<1x128xf32>, vector<1x128xf32> -> vector<2x128xf32>
    %113 = vector.shape_cast %112 : vector<2x128xf32> to vector<1x1x2x128xf32>
    %c0_46 = arith.constant 0 : index
    %c0_47 = arith.constant 0 : index
    %c0_48 = arith.constant 0 : index
    %c0_49 = arith.constant 0 : index
    %114 = vector.load %arg7[%c0_46, %c0_47, %c0_48, %c0_49] : memref<1x1x2x128xf32, #tpu.memory_space<vmem>>, vector<1x1x2x128xf32>
    tpu.vector_store %arg7[%c0_46, %c0_47, %c0_48, %c0_49], %113 {strides = array<i32>} : memref<1x1x2x128xf32, #tpu.memory_space<vmem>>, vector<1x1x2x128xf32>,
    %115 = vector.shape_cast %105 : vector<128x128xbf16> to vector<1x8x16x128xbf16>
    %c0_50 = arith.constant 0 : index
    %c0_51 = arith.constant 0 : index
    %c0_52 = arith.constant 0 : index
    %c0_53 = arith.constant 0 : index
    %116 = vector.load %arg6[%c0_50, %c0_51, %c0_52, %c0_53] : memref<1x8x16x128xbf16, #tpu.memory_space<vmem>>, vector<1x8x16x128xbf16>
    tpu.vector_store %arg6[%c0_50, %c0_51, %c0_52, %c0_53], %115 {strides = array<i32>} : memref<1x8x16x128xbf16, #tpu.memory_space<vmem>>, vector<1x8x16x128xbf16>,
    return
  }
  func.func @transform_0(%arg0: i32, %arg1: i32) -> (i32, i32, i32, i32) {
    %c0_i32 = arith.constant 0 : i32
    %c0_i32_0 = arith.constant 0 : i32
    %c0_i32_1 = arith.constant 0 : i32
    return %arg0, %arg1, %c0_i32, %c0_i32_0 : i32, i32, i32, i32
  }
  func.func @transform_1(%arg0: i32, %arg1: i32) -> (i32, i32) {
    %c0_i32 = arith.constant 0 : i32
    %c0_i32_0 = arith.constant 0 : i32
    %c0_i32_1 = arith.constant 0 : i32
    return %c0_i32, %c0_i32_0 : i32, i32
  }
  func.func @transform_2(%arg0: i32, %arg1: i32) -> (i32, i32, i32) {
    %c0_i32 = arith.constant 0 : i32
    %c0_i32_0 = arith.constant 0 : i32
    %c0_i32_1 = arith.constant 0 : i32
    %c0_i32_2 = arith.constant 0 : i32
    return %c0_i32, %c0_i32_0, %c0_i32_1 : i32, i32, i32
  }
  func.func @transform_4(%arg0: i32, %arg1: i32) -> (i32, i32, i32, i32) {
    %c0_i32 = arith.constant 0 : i32
    %c0_i32_0 = arith.constant 0 : i32
    %c0_i32_1 = arith.constant 0 : i32
    return %arg0, %arg1, %c0_i32, %c0_i32_0 : i32, i32, i32, i32
  }
  func.func @transform_5(%arg0: i32, %arg1: i32) -> (i32, i32, i32, i32) {
    %c0_i32 = arith.constant 0 : i32
    %c0_i32_0 = arith.constant 0 : i32
    %c0_i32_1 = arith.constant 0 : i32
    return %arg0, %arg1, %c0_i32, %c0_i32_0 : i32, i32, i32, i32
  }
}

module attributes {stable_mosaic.version = 11 : i64} {
  func.func @_conv1x1_bn_add_relu_kernel(%arg0: i32, %arg1: i32, %arg2: memref<1x8x16x128xbf16, #tpu.memory_space<vmem>>, %arg3: memref<1x8x16x128xf32, #tpu.memory_space<vmem>>, %arg4: memref<2x128xf32, #tpu.memory_space<vmem>>, %arg5: memref<2x128xf32, #tpu.memory_space<vmem>>, %arg6: memref<128x128xbf16, #tpu.memory_space<vmem>>, %arg7: memref<1x8x16x128xf32, #tpu.memory_space<vmem>>) attributes {dimension_semantics = [#tpu.dimension_semantics<parallel>, #tpu.dimension_semantics<parallel>], iteration_bounds = array<i64: 2, 2>, scalar_prefetch = 0 : i64, scratch_operands = 0 : i64, tpu.core_type = #tpu.core_type<tc>, window_params = [{transform_indices = @transform_0, window_bounds = array<i64: 1, 8, 16, 128>}, {transform_indices = @transform_1, window_bounds = array<i64: 1, 8, 16, 128>}, {pipeline_mode = #tpu.pipeline_mode<synchronous>, transform_indices = @transform_2, window_bounds = array<i64: 2, 128>}, {pipeline_mode = #tpu.pipeline_mode<synchronous>, transform_indices = @transform_3, window_bounds = array<i64: 2, 128>}, {pipeline_mode = #tpu.pipeline_mode<synchronous>, transform_indices = @transform_4, window_bounds = array<i64: 128, 128>}, {transform_indices = @transform_5, window_bounds = array<i64: 1, 8, 16, 128>}]} {
    %c0 = arith.constant 0 : index
    %c0_0 = arith.constant 0 : index
    %0 = vector.load %arg4[%c0, %c0_0] : memref<2x128xf32, #tpu.memory_space<vmem>>, vector<2x128xf32>
    %c0_1 = arith.constant 0 : index
    %c0_2 = arith.constant 0 : index
    %c0_3 = arith.constant 0 : index
    %c0_4 = arith.constant 0 : index
    %1 = vector.load %arg2[%c0_1, %c0_2, %c0_3, %c0_4] : memref<1x8x16x128xbf16, #tpu.memory_space<vmem>>, vector<1x8x16x128xbf16>
    %2 = vector.shape_cast %1 : vector<1x8x16x128xbf16> to vector<128x128xbf16>
    %3 = arith.extf %2 : vector<128x128xbf16> to vector<128x128xf32>
    %4 = vector.extract_strided_slice %0 {offsets = [0, 0], sizes = [1, 128], strides = [1, 1]} : vector<2x128xf32> to vector<1x128xf32>
    %5 = vector.broadcast %4 : vector<1x128xf32> to vector<128x128xf32>
    %6 = arith.mulf %3, %5 : vector<128x128xf32>
    %7 = vector.extract_strided_slice %0 {offsets = [1, 0], sizes = [1, 128], strides = [1, 1]} : vector<2x128xf32> to vector<1x128xf32>
    %8 = vector.broadcast %7 : vector<1x128xf32> to vector<128x128xf32>
    %9 = arith.addf %6, %8 : vector<128x128xf32>
    %cst = arith.constant 0.000000e+00 : f32
    %10 = vector.broadcast %cst : f32 to vector<128x128xf32>
    %11 = arith.maximumf %9, %10 : vector<128x128xf32>
    %12 = arith.truncf %11 : vector<128x128xf32> to vector<128x128xbf16>
    %c0_5 = arith.constant 0 : index
    %c0_6 = arith.constant 0 : index
    %13 = vector.load %arg6[%c0_5, %c0_6] : memref<128x128xbf16, #tpu.memory_space<vmem>>, vector<128x128xbf16>
    %cst_7 = arith.constant dense<0.000000e+00> : vector<128x128xf32>
    %14 = tpu.matmul %12, %13, %cst_7 {dimension_numbers = #tpu.dot_dimension_numbers<[1], [0], [0], [1], [0, 0, 1, 1], [], []>} : vector<128x128xbf16>, vector<128x128xbf16>, vector<128x128xf32> -> vector<128x128xf32>
    %c0_8 = arith.constant 0 : index
    %c0_9 = arith.constant 0 : index
    %15 = vector.load %arg5[%c0_8, %c0_9] : memref<2x128xf32, #tpu.memory_space<vmem>>, vector<2x128xf32>
    %c0_10 = arith.constant 0 : index
    %c0_11 = arith.constant 0 : index
    %c0_12 = arith.constant 0 : index
    %c0_13 = arith.constant 0 : index
    %16 = vector.load %arg3[%c0_10, %c0_11, %c0_12, %c0_13] : memref<1x8x16x128xf32, #tpu.memory_space<vmem>>, vector<1x8x16x128xf32>
    %17 = vector.shape_cast %16 : vector<1x8x16x128xf32> to vector<128x128xf32>
    %18 = vector.extract_strided_slice %15 {offsets = [0, 0], sizes = [1, 128], strides = [1, 1]} : vector<2x128xf32> to vector<1x128xf32>
    %19 = vector.broadcast %18 : vector<1x128xf32> to vector<128x128xf32>
    %20 = arith.mulf %14, %19 : vector<128x128xf32>
    %21 = vector.extract_strided_slice %15 {offsets = [1, 0], sizes = [1, 128], strides = [1, 1]} : vector<2x128xf32> to vector<1x128xf32>
    %22 = vector.broadcast %21 : vector<1x128xf32> to vector<128x128xf32>
    %23 = arith.addf %20, %22 : vector<128x128xf32>
    %24 = arith.addf %23, %17 : vector<128x128xf32>
    %cst_14 = arith.constant 0.000000e+00 : f32
    %25 = vector.broadcast %cst_14 : f32 to vector<128x128xf32>
    %26 = arith.maximumf %24, %25 : vector<128x128xf32>
    %27 = vector.shape_cast %26 : vector<128x128xf32> to vector<1x8x16x128xf32>
    %c0_15 = arith.constant 0 : index
    %c0_16 = arith.constant 0 : index
    %c0_17 = arith.constant 0 : index
    %c0_18 = arith.constant 0 : index
    %28 = vector.load %arg7[%c0_15, %c0_16, %c0_17, %c0_18] : memref<1x8x16x128xf32, #tpu.memory_space<vmem>>, vector<1x8x16x128xf32>
    tpu.vector_store %arg7[%c0_15, %c0_16, %c0_17, %c0_18], %27 {strides = array<i32>} : memref<1x8x16x128xf32, #tpu.memory_space<vmem>>, vector<1x8x16x128xf32>,
    return
  }
  func.func @transform_0(%arg0: i32, %arg1: i32) -> (i32, i32, i32, i32) {
    %c0_i32 = arith.constant 0 : i32
    %c0_i32_0 = arith.constant 0 : i32
    %c0_i32_1 = arith.constant 0 : i32
    return %arg0, %arg1, %c0_i32, %c0_i32_0 : i32, i32, i32, i32
  }
  func.func @transform_1(%arg0: i32, %arg1: i32) -> (i32, i32, i32, i32) {
    %c0_i32 = arith.constant 0 : i32
    %c0_i32_0 = arith.constant 0 : i32
    %c0_i32_1 = arith.constant 0 : i32
    return %arg0, %arg1, %c0_i32, %c0_i32_0 : i32, i32, i32, i32
  }
  func.func @transform_2(%arg0: i32, %arg1: i32) -> (i32, i32) {
    %c0_i32 = arith.constant 0 : i32
    %c0_i32_0 = arith.constant 0 : i32
    %c0_i32_1 = arith.constant 0 : i32
    return %c0_i32, %c0_i32_0 : i32, i32
  }
  func.func @transform_3(%arg0: i32, %arg1: i32) -> (i32, i32) {
    %c0_i32 = arith.constant 0 : i32
    %c0_i32_0 = arith.constant 0 : i32
    %c0_i32_1 = arith.constant 0 : i32
    return %c0_i32, %c0_i32_0 : i32, i32
  }
  func.func @transform_4(%arg0: i32, %arg1: i32) -> (i32, i32) {
    %c0_i32 = arith.constant 0 : i32
    %c0_i32_0 = arith.constant 0 : i32
    %c0_i32_1 = arith.constant 0 : i32
    return %c0_i32, %c0_i32_0 : i32, i32
  }
  func.func @transform_5(%arg0: i32, %arg1: i32) -> (i32, i32, i32, i32) {
    %c0_i32 = arith.constant 0 : i32
    %c0_i32_0 = arith.constant 0 : i32
    %c0_i32_1 = arith.constant 0 : i32
    return %arg0, %arg1, %c0_i32, %c0_i32_0 : i32, i32, i32, i32
  }
}

</mosaic_0001>

<bundles_post_ra>
// kernel: _lambda_.4
= control target key start
LH: loop header
LB: loop body
LE: loop exit
PB: predicated region body
PF: predicated region fallthrough
CT: control target
= control target key end

     0   :  { %s1001_s12 = smov 0   ;;  %s1003_s13 = smov 0   ;;  %s1120_s0 = inlined_call_operand.vmem [shape: f32[2,16,16,128], index: 0, kind: input, shape index: {}]   ;;  %s1121_s1 = inlined_call_operand.vmem [shape: bf16[128,128], index: 1, kind: input, shape index: {}]   ;;  %s1122_s2 = inlined_call_operand.vmem [shape: bf16[2,16,16,128], index: 2, kind: output, shape index: {0}]   ;;  %s1123_s3 = inlined_call_operand.vmem [shape: f32[2,2,2,128], index: 3, kind: output, shape index: {1}]  }
   0x1   :  { %s1005_s14 = smov 0   ;;  %s1007_s15 = smov 0  }
   0x2   :  { %s1009_s16 = smov 0  }
   0x3 LB: > { %s23_s17 = sadd.s32 1, %s971_s14  ;;  %s26_s18 = sadd.s32 1, %s975_s15  ;;  %s979_s16 = sphi %s1009_s16, %s14_s16   ;;  %s975_s15 = sphi %s1007_s15, %s1127_s15   ;;  %s971_s14 = sphi %s1005_s14, %s1126_s14   ;;  %s967_s13 = sphi %s1003_s13, %s1125_s13   ;;  %s963_s12 = sphi %s1001_s12, %s1124_s12  }
   0x4   : > { %p24_p0 = scmp.ge.s32.totalorder %s23_s17, 2  ;;  %p729_p1 = scmp.ge.s32.totalorder %s979_s16, 1 }
   0x5   : > { %p164_p2 = scmp.lt.s32.totalorder %s979_s16, 5 }
   0x6   : > { %s1129_s17 = smov (%p24_p0, %s23_s17), 0  ;;  %s1131_s18 = smov (!%p24_p0, %s26_s18), %s975_s15 }
   0x7   : > { %p165_p3 = pnand %p729_p1, %p164_p2  ;;  %p28_p4 = scmp.ge.s32.totalorder %s1131_s18, 2 }
   0x8   : > { %v933_v0 = vld [vmem:[%s1121_s1] sm:$0xff] (!%p165_p3)   ;;  %s730_s21 = sshll.u32 (!%p165_p3), %s963_s12, 3  ;;  %v934_v1 = vld [vmem:[%s1121_s1 + $0x8] sm:$0xff] (!%p165_p3)   ;;  %p207_p5 = scmp.lt.s32.totalorder (!%p165_p3), %s967_s13, 1  ;;  %v935_v2 = vld [vmem:[%s1121_s1 + $0x10] sm:$0xff] (!%p165_p3)   ;;  %vm504_vm0 = vcmask (!%p165_p3), 1040384  }
   0x9   : > { %s1133_s18 = smov (%p28_p4, %s1131_s18), 0  ;;  %168 = sbr.rel (%p165_p3) target bundleno = 309 (0x135), region = 28 }
   0xa   : > { %845 = vmatprep.subr.bf16.mxu0 (!%p165_p3), %v933_v0  ;;  %877 = vmatprep.subr.bf16.mxu1 (!%p165_p3), %v933_v0  ;;  %p209_p6 = scmp.lt.s32.totalorder (!%p165_p3), %s730_s21, 15  ;;  %v936_v3 = vld [vmem:[%s1121_s1 + $0x18] sm:$0xff] (!%p165_p3)   ;;  %v937_v7 = vld [vmem:[%s1121_s1 + $0x20] sm:$0xff] (!%p165_p3)   ;;  %v938_v11 = vld [vmem:[%s1121_s1 + $0x28] sm:$0xff] (!%p165_p3)   ;;  %p230_p7 = scmp.lt.s32.totalorder (!%p165_p3), %s963_s12, 1 }
   0xb   : > { %846 = vmatpush3.bf16.msra.mxu0 (!%p165_p3), %v933_v0  ;;  %885 = vmatpush3.bf16.msra.mxu1 (!%p165_p3), %v933_v0  ;;  %v939_v12 = vld [vmem:[%s1121_s1 + $0x30] sm:$0xff] (!%p165_p3)   ;;  %v940_v13 = vld [vmem:[%s1121_s1 + $0x38] sm:$0xff] (!%p165_p3)  }
   0xc   : > { %847 = vmatprep.subr.bf16.mxu0 (!%p165_p3), %v934_v1  ;;  %878 = vmatprep.subr.bf16.mxu1 (!%p165_p3), %v934_v1 }
   0xf   : > { %848 = vmatpush3.bf16.msra.mxu0 (!%p165_p3), %v934_v1  ;;  %886 = vmatpush3.bf16.msra.mxu1 (!%p165_p3), %v934_v1 }
  0x10   : > { %s1135_s13 = smov (!%p207_p5, %s967_s13), 1  ;;  %s1137_s21 = smov (!%p209_p6, %s730_s21), 15  ;;  %849 = vmatprep.subr.bf16.mxu0 %v935_v2  ;;  %879 = vmatprep.subr.bf16.mxu1 %v935_v2 }
  0x11   : > { %s732_s26 = sshll.u32 %s1135_s13, 5  ;;  %s731_s27 = sshll.u32 %s1137_s21, 1 }
  0x12   : > { %s1046_s28 = sadd.s32 %s732_s26, %s731_s27  ;;  %s1139_s12 = smov (!%p230_p7, %s963_s12), 1 }
  0x13   : > { %s733_s4 = sshll.u32 %s1046_s28, 3  ;;  %850 = vmatpush3.bf16.msra.mxu0 %v935_v2  ;;  %887 = vmatpush3.bf16.msra.mxu1 %v935_v2  ;;  %s737_s23 = sshll.u32 %s1046_s28, 2 }
  0x14   : > { %s1055_s7 = scalar_lea.vmem %s1120_s0, %s733_s4  ;;  %851 = vmatprep.subr.bf16.mxu0 %v936_v3  ;;  %880 = vmatprep.subr.bf16.mxu1 %v936_v3  ;;  %s1089_s26 = scalar_lea.vmem %s1122_s2, %s737_s23 }
  0x15   : > { %v237_v4 = vld [vmem:[%s1055_s7] sm:$0xff]  ;;  %v238_v5 = vld [vmem:[%s1055_s7 + $0x8] sm:$0xff]  ;;  %v239_v14 = vld [vmem:[%s1055_s7 + $0x10] sm:$0xff]  ;;  %s738_s27 = sshll.u32 %s1135_s13, 1 }
  0x16   : > { %v253_v6 = vpack.c.bf16 %v238_v5, %v237_v4  ;;  %v245_v8 = vld [vmem:[%s1055_s7 + $0x40] sm:$0xff]  ;;  %v246_v9 = vld [vmem:[%s1055_s7 + $0x48] sm:$0xff]  ;;  %v240_v15 = vld [vmem:[%s1055_s7 + $0x18] sm:$0xff]  ;;  %s233_s28 = sadd.s32 %s738_s27, %s1139_s12 }
  0x17   : > { %v257_v10 = vpack.c.bf16 %v246_v9, %v245_v8  ;;  %852 = vmatpush3.bf16.msra.mxu0 %v936_v3  ;;  %888 = vmatpush3.bf16.msra.mxu1 %v936_v3  ;;  %v241_v16 = vld [vmem:[%s1055_s7 + $0x20] sm:$0xff]  ;;  %v247_v17 = vld [vmem:[%s1055_s7 + $0x50] sm:$0xff]  ;;  %v248_v18 = vld [vmem:[%s1055_s7 + $0x58] sm:$0xff]  ;;  %v254_v22 = vpack.c.bf16 %v240_v15, %v239_v14  ;;  %s739_s29 = sshll.u32 %s233_s28, 1 }
  0x18   : > { %861 = vmatprep.mubr.bf16.mxu0 %v253_v6  ;;  %853 = vmatprep.subr.bf16.mxu0 %v937_v7  ;;  %v242_v19 = vld [vmem:[%s1055_s7 + $0x28] sm:$0xff]  ;;  %v249_v20 = vld [vmem:[%s1055_s7 + $0x60] sm:$0xff]  ;;  %v258_v23 = vpack.c.bf16 %v248_v18, %v247_v17  ;;  %v243_v26 = vld [vmem:[%s1055_s7 + $0x30] sm:$0xff]  ;;  %s235_s5 = scalar_lea.vmem %s1123_s3, %s739_s29 }
  0x19   : > { %881 = vmatprep.subr.bf16.mxu1 %v937_v7  ;;  %869 = vmatprep.mubr.bf16.mxu1 %v257_v10  ;;  %v250_v21 = vld [vmem:[%s1055_s7 + $0x68] sm:$0xff]  ;;  %v255_v24 = vpack.c.bf16 %v242_v19, %v241_v16  ;;  %v244_v27 = vld [vmem:[%s1055_s7 + $0x38] sm:$0xff]  ;;  %v251_v28 = vld [vmem:[%s1055_s7 + $0x70] sm:$0xff] }
  0x1a   : > { %v259_v25 = vpack.c.bf16 %v250_v21, %v249_v20  ;;  %v252_v29 = vld [vmem:[%s1055_s7 + $0x78] sm:$0xff]  ;;  %v256_v30 = vpack.c.bf16 %v244_v27, %v243_v26 }
  0x1b   : > { %854 = vmatpush3.bf16.msra.mxu0 %v937_v7  ;;  %889 = vmatpush3.bf16.msra.mxu1 %v937_v7  ;;  %v260_v31 = vpack.c.bf16 %v252_v29, %v251_v28 }
  0x1c   : > { %855 = vmatprep.subr.bf16.mxu0 %v938_v11  ;;  %882 = vmatprep.subr.bf16.mxu1 %v938_v11 }
  0x1f   : > { %856 = vmatpush3.bf16.msra.mxu0 %v938_v11  ;;  %890 = vmatpush3.bf16.msra.mxu1 %v938_v11 }
  0x20   : > { %857 = vmatprep.subr.bf16.mxu0 %v939_v12  ;;  %883 = vmatprep.subr.bf16.mxu1 %v939_v12 }
  0x23   : > { %858 = vmatpush3.bf16.msra.mxu0 %v939_v12  ;;  %891 = vmatpush3.bf16.msra.mxu1 %v939_v12 }
  0x24   : > { %859 = vmatprep.subr.bf16.mxu0 %v940_v13  ;;  %884 = vmatprep.subr.bf16.mxu1 %v940_v13 }
  0x27   : > { %860 = vmatpush3.bf16.msra.mxu0 %v940_v13  ;;  %892 = vmatpush3.bf16.msra.mxu1 %v940_v13 }
  0x2a   : > { %862 = vmatmul.mubr.bf16.vlgmr.msra.gmra.mrb[0].mxu0 %v254_v22  ;;  %870 = vmatmul.mubr.bf16.vlgmr.msra.gmra.mrb[0].mxu1 %v258_v23 }
  0x2b   : > { %865 = vmatprep.mubr.bf16.mxu0 %v255_v24  ;;  %873 = vmatprep.mubr.bf16.mxu1 %v259_v25 }
  0x32   : > { %866 = vmatmul.mubr.bf16.gmra.mrb[4].mxu0 %v256_v30  ;;  %874 = vmatmul.mubr.bf16.gmra.mrb[4].mxu1 %v260_v31 }
  0xfd   : > { %v863_v32 = vpop.f32.mrb[0].mxu0  ;;  %v871_v33 = vpop.f32.mrb[0].mxu1 }
  0xfe   : > { %v359_v34 = vpop.f32.mrb[1].mxu0  ;;  %v391_v35 = vpop.f32.mrb[1].mxu1 }
  0xff   : > { %v864_v36 = vpop.f32.mrb[2].mxu0  ;;  %v872_v37 = vpop.f32.mrb[2].mxu1 }
 0x100   : > { %v423_v38 = vpack.c.bf16 %v864_v36, %v863_v32  ;;  %v362_v39 = vpop.f32.mrb[3].mxu0  ;;  %v427_v40 = vpack.c.bf16 %v872_v37, %v871_v33  ;;  %v394_v41 = vpop.f32.mrb[3].mxu1 }
 0x101   : > { %v422_v42 = vpack.c.bf16 %v362_v39, %v359_v34  ;;  %v426_v43 = vpack.c.bf16 %v394_v41, %v391_v35 }
 0x102   : > { %822 = vst [vmem:[%s1089_s26 + $0x8] sm:$0xff] %v423_v38   ;;  %826 = vst [vmem:[%s1089_s26 + $0x28] sm:$0xff] %v427_v40   ;;  %v432_v44 = vunpack.c.l.bf16 %v423_v38  ;;  %v433_v47 = vunpack.c.h.bf16 %v423_v38  ;;  %v440_v23 = vunpack.c.l.bf16 %v427_v40  ;;  %v441_v27 = vunpack.c.h.bf16 %v427_v40 }
 0x103   : > { %v430_v45 = vunpack.c.l.bf16 %v422_v42  ;;  %v431_v46 = vunpack.c.h.bf16 %v422_v42  ;;  %786 = vst [vmem:[%s1089_s26] sm:$0xff] %v422_v42   ;;  %825 = vst [vmem:[%s1089_s26 + $0x20] sm:$0xff] %v426_v43   ;;  %v438_v18 = vunpack.c.l.bf16 %v426_v43  ;;  %v439_v21 = vunpack.c.h.bf16 %v426_v43 }
 0x104   : > { %v469_v55 = vmul.f32 %v432_v44, %v432_v44  ;;  %v470_v60 = vmul.f32 %v433_v47, %v433_v47  ;;  %v477_v31 = vmul.f32 %v440_v23, %v440_v23  ;;  %v478_v35 = vmul.f32 %v441_v27, %v441_v27 }
 0x105   : > { %v446_v48 = vadd.f32 %v431_v46, %v430_v45  ;;  %v467_v49 = vmul.f32 %v430_v45, %v430_v45  ;;  %v468_v50 = vmul.f32 %v431_v46, %v431_v46  ;;  %v867_v51 = vpop.f32.mrb[4].mxu0  ;;  %v875_v52 = vpop.f32.mrb[4].mxu1  ;;  %v475_v25 = vmul.f32 %v438_v18, %v438_v18 }
 0x106   : > { %v375_v53 = vpop.f32.mrb[5].mxu0  ;;  %v407_v54 = vpop.f32.mrb[5].mxu1  ;;  %v476_v29 = vmul.f32 %v439_v21, %v439_v21 }
 0x107   : > { %v447_v56 = vadd.f32 %v446_v48, %v432_v44  ;;  %v483_v57 = vadd.f32 %v468_v50, %v467_v49  ;;  %v868_v58 = vpop.f32.mrb[6].mxu0  ;;  %v876_v59 = vpop.f32.mrb[6].mxu1 }
 0x108   : > { %v425_v61 = vpack.c.bf16 %v868_v58, %v867_v51  ;;  %v378_v62 = vpop.f32.mrb[7].mxu0  ;;  %v429_v63 = vpack.c.bf16 %v876_v59, %v875_v52  ;;  %v410_v0 = vpop.f32.mrb[7].mxu1 }
 0x109   : > { %v484_v1 = vadd.f32 %v483_v57, %v469_v55  ;;  %v424_v2 = vpack.c.bf16 %v378_v62, %v375_v53  ;;  %v448_v3 = vadd.f32 %v447_v56, %v433_v47  ;;  %v428_v4 = vpack.c.bf16 %v410_v0, %v407_v54 }
 0x10a   : > { %824 = vst [vmem:[%s1089_s26 + $0x18] sm:$0xff] %v425_v61   ;;  %828 = vst [vmem:[%s1089_s26 + $0x38] sm:$0xff] %v429_v63   ;;  %v436_v8 = vunpack.c.l.bf16 %v425_v61  ;;  %v437_v11 = vunpack.c.h.bf16 %v425_v61  ;;  %v444_v39 = vunpack.c.l.bf16 %v429_v63  ;;  %v445_v44 = vunpack.c.h.bf16 %v429_v63 }
 0x10b   : > { %v434_v5 = vunpack.c.l.bf16 %v424_v2  ;;  %v435_v6 = vunpack.c.h.bf16 %v424_v2  ;;  %v485_v7 = vadd.f32 %v484_v1, %v470_v60  ;;  %823 = vst [vmem:[%s1089_s26 + $0x10] sm:$0xff] %v424_v2   ;;  %827 = vst [vmem:[%s1089_s26 + $0x30] sm:$0xff] %v428_v4   ;;  %v442_v34 = vunpack.c.l.bf16 %v428_v4 }
 0x10c   : > { %v473_v15 = vmul.f32 %v436_v8, %v436_v8  ;;  %v474_v19 = vmul.f32 %v437_v11, %v437_v11  ;;  %v443_v37 = vunpack.c.h.bf16 %v428_v4  ;;  %v481_v47 = vmul.f32 %v444_v39, %v444_v39 }
 0x10d   : > { %v449_v9 = vadd.f32 %v448_v3, %v434_v5  ;;  %v471_v10 = vmul.f32 %v434_v5, %v434_v5  ;;  %v472_v13 = vmul.f32 %v435_v6, %v435_v6  ;;  %v479_v42 = vmul.f32 %v442_v34, %v442_v34 }
 0x10e   : > { %v480_v45 = vmul.f32 %v443_v37, %v443_v37  ;;  %v482_v50 = vmul.f32 %v445_v44, %v445_v44 }
 0x10f   : > { %v450_v12 = vadd.f32 %v449_v9, %v435_v6  ;;  %v486_v14 = vadd.f32 %v485_v7, %v471_v10 }
 0x111   : > { %v451_v16 = vadd.f32 %v450_v12, %v436_v8  ;;  %v487_v17 = vadd.f32 %v486_v14, %v472_v13 }
 0x113   : > { %v488_v20 = vadd.f32 %v487_v17, %v473_v15  ;;  %v452_v22 = vadd.f32 %v451_v16, %v437_v11 }
 0x115   : > { %v453_v24 = vadd.f32 %v452_v22, %v438_v18  ;;  %v489_v26 = vadd.f32 %v488_v20, %v474_v19 }
 0x117   : > { %v454_v28 = vadd.f32 %v453_v24, %v439_v21  ;;  %v490_v30 = vadd.f32 %v489_v26, %v475_v25 }
 0x119   : > { %v455_v32 = vadd.f32 %v454_v28, %v440_v23  ;;  %v491_v33 = vadd.f32 %v490_v30, %v476_v29 }
 0x11b   : > { %v492_v36 = vadd.f32 %v491_v33, %v477_v31  ;;  %v456_v38 = vadd.f32 %v455_v32, %v441_v27 }
 0x11d   : > { %v457_v41 = vadd.f32 %v456_v38, %v442_v34  ;;  %v493_v43 = vadd.f32 %v492_v36, %v478_v35 }
 0x11f   : > { %v458_v40 = vadd.f32 %v457_v41, %v443_v37  ;;  %v494_v46 = vadd.f32 %v493_v43, %v479_v42 }
 0x121   : > { %v459_v48 = vadd.f32 %v458_v40, %v444_v39  ;;  %v495_v49 = vadd.f32 %v494_v46, %v480_v45 }
 0x123   : > { %v460_v51 = vadd.f32 %v459_v48, %v445_v44  ;;  %v496_v52 = vadd.f32 %v495_v49, %v481_v47 }
 0x125   : > { %v461_v53 = vrot.slane %v460_v51, 4  ;;  %v497_v54 = vadd.f32 %v496_v52, %v482_v50 }
 0x127   : > { %v462_v55 = vadd.f32 %v461_v53, %v460_v51  ;;  %v498_v56 = vrot.slane %v497_v54, 4 }
 0x129   : > { %v463_v57 = vrot.slane %v462_v55, 2  ;;  %v499_v58 = vadd.f32 %v498_v56, %v497_v54 }
 0x12b   : > { %v464_v59 = vadd.f32 %v463_v57, %v462_v55  ;;  %v500_v60 = vrot.slane %v499_v58, 2 }
 0x12d   : > { %v465_v61 = vrot.slane %v464_v59, 1  ;;  %v501_v62 = vadd.f32 %v500_v60, %v499_v58 }
 0x12f   : > { %v502_v63 = vrot.slane %v501_v62, 1  ;;  %v466_v0 = vadd.f32 %v465_v61, %v464_v59 }
 0x131   : > { %v503_v1 = vadd.f32 %v502_v63, %v501_v62 }
 0x133   : > { %v505_v2 = vsel %vm504_vm0, %v466_v0, %v503_v1 }
 0x134   : > { %506 = vst [vmem:[%s235_s5] sm:$0x3] %v505_v2 }
 0x135 PF: > { %s14_s16 = sadd.s32 1, %s979_s16   ;;  %s1124_s12 = smov %s971_s14 }
 0x136   : > { %p11_p8 = scmp.ge.s32.totalorder %s14_s16, 6   ;;  %s1125_s13 = smov %s975_s15 }
 0x137   : > { %s1126_s14 = smov %s1129_s17  ;;  %s1127_s15 = smov %s1133_s18 }
 0x138   :  { %13 = sbr.rel (!%p11_p8) target bundleno = 3 (0x3), region = 70 }

// kernel: _lambda_.6
= control target key start
LH: loop header
LB: loop body
LE: loop exit
PB: predicated region body
PF: predicated region fallthrough
CT: control target
= control target key end

     0   :  { %s874_s12 = smov 0   ;;  %s876_s13 = smov 0   ;;  %s1076_s0 = inlined_call_operand.vmem [shape: bf16[2,16,16,128], index: 0, kind: input, shape index: {}]   ;;  %s1077_s1 = inlined_call_operand.vmem [shape: f32[2,128], index: 1, kind: input, shape index: {}]   ;;  %s1078_s2 = inlined_call_operand.vmem [shape: f32[2,2,128,128], index: 2, kind: output, shape index: {0}]   ;;  %s1079_s3 = inlined_call_operand.vmem [shape: f32[2,2,1,128], index: 3, kind: output, shape index: {1}]  }
   0x1   :  { %s878_s14 = smov 0   ;;  %s880_s15 = smov 0  }
   0x2   :  { %s882_s16 = smov 0  }
   0x3 LB: > { %s23_s17 = sadd.s32 1, %s844_s14  ;;  %s26_s18 = sadd.s32 1, %s848_s15  ;;  %s852_s16 = sphi %s882_s16, %s14_s16   ;;  %s848_s15 = sphi %s880_s15, %s1083_s15   ;;  %s844_s14 = sphi %s878_s14, %s1082_s14   ;;  %s840_s13 = sphi %s876_s13, %s1081_s13   ;;  %s836_s12 = sphi %s874_s12, %s1080_s12  }
   0x4   : > { %p24_p0 = scmp.ge.s32.totalorder %s23_s17, 2  ;;  %p660_p1 = scmp.ge.s32.totalorder %s852_s16, 1 }
   0x5   : > { %p164_p2 = scmp.lt.s32.totalorder %s852_s16, 5 }
   0x6   : > { %s1085_s17 = smov (%p24_p0, %s23_s17), 0  ;;  %s1087_s18 = smov (!%p24_p0, %s26_s18), %s848_s15 }
   0x7   : > { %p165_p3 = pnand %p660_p1, %p164_p2  ;;  %p28_p4 = scmp.ge.s32.totalorder %s1087_s18, 2 }
   0x8   : > { %s661_s19 = sshll.u32 (!%p165_p3), %s836_s12, 3  ;;  %p205_p5 = scmp.lt.s32.totalorder (!%p165_p3), %s840_s13, 1  ;;  %v265_v0 = vlaneseq (!%p165_p3)  ;;  %v232_v3 = vld [vmem:[%s1077_s1] sm:$0x3] (!%p165_p3) }
   0x9   : > { %s1089_s18 = smov (%p28_p4, %s1087_s18), 0  ;;  %168 = sbr.rel (%p165_p3) target bundleno = 437 (0x1b5), region = 28 }
   0xa   : > { %p207_p6 = scmp.lt.s32.totalorder (!%p165_p3), %s661_s19, 15  ;;  %v266_v1 = vshrl.u32 (!%p165_p3), %v265_v0, 7  ;;  %p217_p7 = scmp.lt.s32.totalorder (!%p165_p3), %s836_s12, 1 }
   0xc   : > { %v267_v2 = vsub.s32 (!%p165_p3), 0, %v266_v1  ;;  %v287_v4 = vsub.s32 (!%p165_p3), 1, %v266_v1 }
   0xe   : > { %v919_v5 = vrot.slane (!%p165_p3), %v232_v3, %v267_v2  ;;  %v925_v7 = vrot.slane (!%p165_p3), %v232_v3, %v287_v4 }
  0x10   : > { %s1091_s13 = smov (!%p205_p5, %s840_s13), 1  ;;  %s1093_s19 = smov (!%p207_p6, %s661_s19), 15 }
  0x11   : > { %s663_s20 = sshll.u32 %s1091_s13, 5  ;;  %s662_s21 = sshll.u32 %s1093_s19, 1 }
  0x12   : > { %s211_s24 = sadd.s32 %s663_s20, %s662_s21  ;;  %s1095_s12 = smov (!%p217_p7, %s836_s12), 1 }
  0x13   : > { %s664_s25 = sshll.u32 %s211_s24, 2  ;;  %s665_s29 = sshll.u32 %s1095_s12, 4 }
  0x14   : > { %s917_s28 = scalar_lea.vmem %s1076_s0, %s664_s25  ;;  %s931_s30 = sadd.s32 %s665_s29, %s663_s20 }
  0x15   : > { %v672_v6 = vld [vmem:[%s917_s28] sm:$0xff]   ;;  %v703_v8 = vld [vmem:[%s917_s28 + $0x8] sm:$0xff]   ;;  %v704_v9 = vld [vmem:[%s917_s28 + $0x10] sm:$0xff]   ;;  %s668_s4 = sshll.u32 %s1091_s13, 1  ;;  %s667_s9 = sshll.u32 %s931_s30, 3 }
  0x16   : > { %v673_v10 = vunpack.c.l.bf16 %v672_v6  ;;  %v674_v11 = vunpack.c.h.bf16 %v672_v6  ;;  %v677_v12 = vunpack.c.l.bf16 %v703_v8  ;;  %v678_v13 = vunpack.c.h.bf16 %v703_v8  ;;  %v705_v14 = vld [vmem:[%s917_s28 + $0x18] sm:$0xff]   ;;  %v706_v35 = vld [vmem:[%s917_s28 + $0x20] sm:$0xff]   ;;  %v707_v40 = vld [vmem:[%s917_s28 + $0x28] sm:$0xff]   ;;  %s229_s5 = sadd.s32 %s668_s4, %s1095_s12  ;;  %s1043_s12 = scalar_lea.vmem %s1078_s2, %s667_s9 }
  0x17   : > { %v681_v15 = vunpack.c.l.bf16 %v704_v9  ;;  %v682_v16 = vunpack.c.h.bf16 %v704_v9  ;;  %v685_v17 = vunpack.c.l.bf16 %v705_v14  ;;  %v686_v18 = vunpack.c.h.bf16 %v705_v14  ;;  %v708_v54 = vld [vmem:[%s917_s28 + $0x30] sm:$0xff]   ;;  %v709_v1 = vld [vmem:[%s917_s28 + $0x38] sm:$0xff]   ;;  %s230_s8 = scalar_lea.vmem %s1079_s3, %s229_s5 }
  0x18   : > { %v269_v19 = vmul.f32 %v673_v10, %v919_v5  ;;  %v270_v20 = vmul.f32 %v674_v11, %v919_v5  ;;  %v271_v21 = vmul.f32 %v677_v12, %v919_v5  ;;  %v272_v22 = vmul.f32 %v678_v13, %v919_v5 }
  0x19   : > { %v273_v23 = vmul.f32 %v681_v15, %v919_v5  ;;  %v274_v24 = vmul.f32 %v682_v16, %v919_v5  ;;  %v275_v25 = vmul.f32 %v685_v17, %v919_v5  ;;  %v276_v26 = vmul.f32 %v686_v18, %v919_v5 }
  0x1a   : > { %v289_v27 = vadd.f32 %v925_v7, %v269_v19  ;;  %v290_v28 = vadd.f32 %v925_v7, %v270_v20  ;;  %v291_v29 = vadd.f32 %v925_v7, %v271_v21  ;;  %v945_v30 = vadd.f32 %v925_v7, %v272_v22 }
  0x1b   : > { %v948_v31 = vadd.f32 %v925_v7, %v273_v23  ;;  %v951_v32 = vadd.f32 %v925_v7, %v274_v24  ;;  %v954_v33 = vadd.f32 %v925_v7, %v275_v25  ;;  %v957_v34 = vadd.f32 %v925_v7, %v276_v26 }
  0x1c   : > { %v305_v36 = vmax.f32 %v289_v27, 0.0  ;;  %v306_v37 = vmax.f32 %v290_v28, 0.0  ;;  %v307_v38 = vmax.f32 %v291_v29, 0.0  ;;  %v308_v39 = vmax.f32 %v945_v30, 0.0 }
  0x1d   : > { %v309_v41 = vmax.f32 %v948_v31, 0.0  ;;  %v310_v42 = vmax.f32 %v951_v32, 0.0  ;;  %v689_v45 = vunpack.c.l.bf16 %v706_v35  ;;  %v690_v46 = vunpack.c.h.bf16 %v706_v35 }
  0x1e   : > { %367 = vxpose.xlu0.b32.start [1/16] %v305_v36, 128  ;;  %v321_v43 = vpack.c.bf16 %v306_v37, %v305_v36  ;;  %v322_v44 = vpack.c.bf16 %v308_v39, %v307_v38  ;;  %v311_v47 = vmax.f32 %v954_v33, 0.0  ;;  %v312_v48 = vmax.f32 %v957_v34, 0.0 }
  0x1f   : > { %v693_v49 = vunpack.c.l.bf16 %v707_v40  ;;  %v694_v50 = vunpack.c.h.bf16 %v707_v40  ;;  %v323_v55 = vpack.c.bf16 %v310_v42, %v309_v41  ;;  %v277_v59 = vmul.f32 %v689_v45, %v919_v5 }
  0x20   : > { %v329_v51 = vunpack.c.l.bf16 %v321_v43  ;;  %v330_v52 = vunpack.c.h.bf16 %v321_v43  ;;  %v331_v53 = vunpack.c.l.bf16 %v322_v44  ;;  %726 = vmatprep.subr.bf16.mxu0 %v321_v43  ;;  %758 = vmatprep.subr.bf16.mxu1 %v321_v43  ;;  %v324_v56 = vpack.c.bf16 %v312_v48, %v311_v47 }
  0x21   : > { %727 = vmatpush3.bf16.msra.mxu0 %v321_v43  ;;  %766 = vmatpush3.bf16.msra.mxu1 %v321_v43  ;;  %v332_v58 = vunpack.c.h.bf16 %v322_v44  ;;  %v278_v60 = vmul.f32 %v690_v46, %v919_v5  ;;  %v279_v61 = vmul.f32 %v693_v49, %v919_v5  ;;  %v280_v62 = vmul.f32 %v694_v50, %v919_v5 }
  0x22   : > { %v345_v57 = vadd.f32 %v330_v52, %v329_v51  ;;  %368 = vxpose.xlu0.b32.cont [2/16] %v306_v37, 128  ;;  %v697_v63 = vunpack.c.l.bf16 %v708_v54  ;;  %v698_v0 = vunpack.c.h.bf16 %v708_v54  ;;  %728 = vmatprep.subr.bf16.mxu0 %v322_v44  ;;  %v333_v3 = vunpack.c.l.bf16 %v323_v55 }
  0x23   : > { %759 = vmatprep.subr.bf16.mxu1 %v322_v44  ;;  %v981_v4 = vadd.f32 %v925_v7, %v277_v59  ;;  %v984_v6 = vadd.f32 %v925_v7, %v278_v60  ;;  %v334_v9 = vunpack.c.h.bf16 %v323_v55  ;;  %v335_v10 = vunpack.c.l.bf16 %v324_v56 }
  0x24   : > { %v346_v2 = vadd.f32 %v345_v57, %v331_v53  ;;  %v701_v11 = vunpack.c.l.bf16 %v709_v1  ;;  %v987_v12 = vadd.f32 %v925_v7, %v279_v61  ;;  %v990_v13 = vadd.f32 %v925_v7, %v280_v62 }
  0x25   : > { %729 = vmatpush3.bf16.msra.mxu0 %v322_v44  ;;  %v281_v14 = vmul.f32 %v697_v63, %v919_v5  ;;  %v282_v15 = vmul.f32 %v698_v0, %v919_v5  ;;  %767 = vmatpush3.bf16.msra.mxu1 %v322_v44  ;;  %v313_v17 = vmax.f32 %v981_v4, 0.0  ;;  %v314_v18 = vmax.f32 %v984_v6, 0.0 }
  0x26   : > { %369 = vxpose.xlu0.b32.cont [3/16] %v307_v38, 128  ;;  %v347_v8 = vadd.f32 %v346_v2, %v332_v58  ;;  %730 = vmatprep.subr.bf16.mxu0 %v323_v55  ;;  %v702_v19 = vunpack.c.h.bf16 %v709_v1  ;;  %v336_v21 = vunpack.c.h.bf16 %v324_v56  ;;  %v315_v23 = vmax.f32 %v987_v12, 0.0 }
  0x27   : > { %760 = vmatprep.subr.bf16.mxu1 %v323_v55  ;;  %v325_v22 = vpack.c.bf16 %v314_v18, %v313_v17  ;;  %v316_v24 = vmax.f32 %v990_v13, 0.0  ;;  %v1003_v25 = vadd.f32 %v925_v7, %v281_v14  ;;  %v283_v26 = vmul.f32 %v701_v11, %v919_v5 }
  0x28   : > { %v348_v16 = vadd.f32 %v347_v8, %v333_v3  ;;  %v1007_v29 = vadd.f32 %v925_v7, %v282_v15  ;;  %v284_v30 = vmul.f32 %v702_v19, %v919_v5 }
  0x29   : > { %731 = vmatpush3.bf16.msra.mxu0 %v323_v55  ;;  %768 = vmatpush3.bf16.msra.mxu1 %v323_v55  ;;  %v337_v28 = vunpack.c.l.bf16 %v325_v22  ;;  %v338_v36 = vunpack.c.h.bf16 %v325_v22  ;;  %v326_v37 = vpack.c.bf16 %v316_v24, %v315_v23  ;;  %v317_v38 = vmax.f32 %v1003_v25, 0.0 }
  0x2a   : > { %370 = vxpose.xlu0.b32.cont [4/16] %v308_v39, 128  ;;  %v349_v20 = vadd.f32 %v348_v16, %v334_v9  ;;  %732 = vmatprep.subr.bf16.mxu0 %v324_v56  ;;  %v303_v39 = vadd.f32 %v925_v7, %v283_v26  ;;  %v318_v43 = vmax.f32 %v1007_v29, 0.0  ;;  %v304_v31 = vadd.f32 %v925_v7, %v284_v30 }
  0x2b   : > { %761 = vmatprep.subr.bf16.mxu1 %v324_v56  ;;  %v339_v5 = vunpack.c.l.bf16 %v326_v37  ;;  %v340_v44 = vunpack.c.h.bf16 %v326_v37 }
  0x2c   : > { %v350_v27 = vadd.f32 %v349_v20, %v335_v10  ;;  %v327_v45 = vpack.c.bf16 %v318_v43, %v317_v38  ;;  %v319_v50 = vmax.f32 %v303_v39, 0.0  ;;  %v320_v51 = vmax.f32 %v304_v31, 0.0 }
  0x2d   : > { %733 = vmatpush3.bf16.msra.mxu0 %v324_v56  ;;  %769 = vmatpush3.bf16.msra.mxu1 %v324_v56 }
  0x2e   : > { %371 = vxpose.xlu0.b32.cont [5/16] %v309_v41, 128  ;;  %v351_v35 = vadd.f32 %v350_v27, %v336_v21  ;;  %734 = vmatprep.subr.bf16.mxu0 %v325_v22  ;;  %v341_v49 = vunpack.c.l.bf16 %v327_v45  ;;  %v342_v52 = vunpack.c.h.bf16 %v327_v45  ;;  %v328_v53 = vpack.c.bf16 %v320_v51, %v319_v50 }
  0x2f   : > { %762 = vmatprep.subr.bf16.mxu1 %v325_v22 }
  0x30   : > { %v352_v40 = vadd.f32 %v351_v35, %v337_v28  ;;  %v344_v55 = vunpack.c.h.bf16 %v328_v53 }
  0x31   : > { %735 = vmatpush3.bf16.msra.mxu0 %v325_v22  ;;  %770 = vmatpush3.bf16.msra.mxu1 %v325_v22 }
  0x32   : > { %372 = vxpose.xlu0.b32.cont [6/16] %v310_v42, 128  ;;  %v353_v41 = vadd.f32 %v352_v40, %v338_v36  ;;  %736 = vmatprep.subr.bf16.mxu0 %v326_v37  ;;  %v343_v42 = vunpack.c.l.bf16 %v328_v53 }
  0x33   : > { %763 = vmatprep.subr.bf16.mxu1 %v326_v37 }
  0x34   : > { %v354_v46 = vadd.f32 %v353_v41, %v339_v5 }
  0x35   : > { %737 = vmatpush3.bf16.msra.mxu0 %v326_v37  ;;  %771 = vmatpush3.bf16.msra.mxu1 %v326_v37 }
  0x36   : > { %373 = vxpose.xlu0.b32.cont [7/16] %v311_v47, 128  ;;  %v355_v7 = vadd.f32 %v354_v46, %v340_v44  ;;  %738 = vmatprep.subr.bf16.mxu0 %v327_v45 }
  0x37   : > { %764 = vmatprep.subr.bf16.mxu1 %v327_v45 }
  0x38   : > { %v356_v32 = vadd.f32 %v355_v7, %v341_v49 }
  0x39   : > { %739 = vmatpush3.bf16.msra.mxu0 %v327_v45  ;;  %772 = vmatpush3.bf16.msra.mxu1 %v327_v45 }
  0x3a   : > { %374 = vxpose.xlu0.b32.cont [8/16] %v312_v48, 128  ;;  %v357_v54 = vadd.f32 %v356_v32, %v342_v52  ;;  %740 = vmatprep.subr.bf16.mxu0 %v328_v53 }
  0x3b   : > { %765 = vmatprep.subr.bf16.mxu1 %v328_v53 }
  0x3c   : > { %v358_v33 = vadd.f32 %v357_v54, %v343_v42 }
  0x3d   : > { %741 = vmatpush3.bf16.msra.mxu0 %v328_v53  ;;  %773 = vmatpush3.bf16.msra.mxu1 %v328_v53 }
  0x3e   : > { %375 = vxpose.xlu0.b32.cont [9/16] %v313_v17, 128  ;;  %v359_v47 = vadd.f32 %v358_v33, %v344_v55 }
  0x40   : > { %v360_v56 = vrot.slane %v359_v47, 4 }
  0x42   : > { %376 = vxpose.xlu0.b32.cont [10/16] %v314_v18, 128  ;;  %v361_v57 = vadd.f32 %v360_v56, %v359_v47 }
  0x44   : > { %v362_v34 = vrot.slane %v361_v57, 2 }
  0x46   : > { %377 = vxpose.xlu0.b32.cont [11/16] %v315_v23, 128  ;;  %v363_v48 = vadd.f32 %v362_v34, %v361_v57 }
  0x48   : > { %v364_v58 = vrot.slane %v363_v48, 1 }
  0x4a   : > { %378 = vxpose.xlu0.b32.cont [12/16] %v316_v24, 128  ;;  %v365_v59 = vadd.f32 %v364_v58, %v363_v48 }
  0x4c   : > { %366 = vst [vmem:[%s230_s8] sm:$0x1] %v365_v59 }
  0x4e   : > { %379 = vxpose.xlu0.b32.cont [13/16] %v317_v38, 128 }
  0x52   : > { %380 = vxpose.xlu0.b32.cont [14/16] %v318_v43, 128 }
  0x56   : > { %381 = vxpose.xlu0.b32.cont [15/16] %v319_v50, 128 }
  0x5a   : > { %382 = vxpose.xlu0.b32.end [16/16] %v320_v51, 128 }
  0x9e   : > { %v383_v60 = vpop.trf.xlu0 }
  0xa2   : > { %v384_v61 = vpop.trf.xlu0 }
  0xa3   : > { %v399_v62 = vpack.c.bf16 %v384_v61, %v383_v60 }
  0xa5   : > { %742 = vmatprep.mubr.bf16.mxu0 %v399_v62 }
  0xa6   : > { %v385_v63 = vpop.trf.xlu0 }
  0xaa   : > { %v386_v0 = vpop.trf.xlu0 }
  0xab   : > { %v400_v1 = vpack.c.bf16 %v386_v0, %v385_v63 }
  0xad   : > { %743 = vmatmul.mubr.bf16.vlgmr.msra.gmra.mrb[0].mxu0 %v400_v1 }
  0xae   : > { %v387_v2 = vpop.trf.xlu0 }
  0xb2   : > { %v388_v3 = vpop.trf.xlu0 }
  0xb3   : > { %v401_v4 = vpack.c.bf16 %v388_v3, %v387_v2 }
  0xb5   : > { %746 = vmatprep.mubr.bf16.mxu0 %v401_v4 }
  0xb6   : > { %v389_v6 = vpop.trf.xlu0 }
  0xba   : > { %v390_v8 = vpop.trf.xlu0 }
  0xbb   : > { %v402_v9 = vpack.c.bf16 %v390_v8, %v389_v6 }
  0xbd   : > { %747 = vmatmul.mubr.bf16.gmra.mrb[4].mxu0 %v402_v9 }
  0xbe   : > { %v391_v10 = vpop.trf.xlu0 }
  0xc2   : > { %v392_v11 = vpop.trf.xlu0 }
  0xc3   : > { %v403_v12 = vpack.c.bf16 %v392_v11, %v391_v10 }
  0xc5   : > { %750 = vmatprep.mubr.bf16.mxu1 %v403_v12 }
  0xc6   : > { %v393_v13 = vpop.trf.xlu0 }
  0xca   : > { %v394_v14 = vpop.trf.xlu0 }
  0xcb   : > { %v404_v15 = vpack.c.bf16 %v394_v14, %v393_v13 }
  0xcd   : > { %751 = vmatmul.mubr.bf16.vlgmr.msra.gmra.mrb[0].mxu1 %v404_v15 }
  0xce   : > { %v395_v16 = vpop.trf.xlu0 }
  0xd2   : > { %v396_v17 = vpop.trf.xlu0 }
  0xd3   : > { %v405_v18 = vpack.c.bf16 %v396_v17, %v395_v16 }
  0xd5   : > { %754 = vmatprep.mubr.bf16.mxu1 %v405_v18 }
  0xd6   : > { %v397_v19 = vpop.trf.xlu0 }
  0xda   : > { %v398_v20 = vpop.trf.xlu0 }
  0xdb   : > { %v406_v21 = vpack.c.bf16 %v398_v20, %v397_v19 }
  0xdd   : > { %755 = vmatmul.mubr.bf16.gmra.mrb[4].mxu1 %v406_v21 }
 0x180   : > { %v744_v22 = vpop.f32.mrb[0].mxu0 }
 0x181   : > { %506 = vst [vmem:[%s1043_s12 + $0x10] sm:$0xff] %v744_v22  ;;  %v441_v23 = vpop.f32.mrb[1].mxu0 }
 0x182   : > { %504 = vst [vmem:[%s1043_s12] sm:$0xff] %v441_v23  ;;  %v745_v24 = vpop.f32.mrb[2].mxu0 }
 0x183   : > { %507 = vst [vmem:[%s1043_s12 + $0x18] sm:$0xff] %v745_v24  ;;  %v444_v25 = vpop.f32.mrb[3].mxu0 }
 0x184   : > { %505 = vst [vmem:[%s1043_s12 + $0x8] sm:$0xff] %v444_v25 }
 0x190   : > { %v748_v26 = vpop.f32.mrb[4].mxu0 }
 0x191   : > { %510 = vst [vmem:[%s1043_s12 + $0x30] sm:$0xff] %v748_v26  ;;  %v457_v27 = vpop.f32.mrb[5].mxu0 }
 0x192   : > { %508 = vst [vmem:[%s1043_s12 + $0x20] sm:$0xff] %v457_v27  ;;  %v749_v28 = vpop.f32.mrb[6].mxu0 }
 0x193   : > { %511 = vst [vmem:[%s1043_s12 + $0x38] sm:$0xff] %v749_v28  ;;  %v460_v29 = vpop.f32.mrb[7].mxu0 }
 0x194   : > { %509 = vst [vmem:[%s1043_s12 + $0x28] sm:$0xff] %v460_v29 }
 0x1a0   : > { %v752_v30 = vpop.f32.mrb[0].mxu1 }
 0x1a1   : > { %514 = vst [vmem:[%s1043_s12 + $0x50] sm:$0xff] %v752_v30  ;;  %v473_v35 = vpop.f32.mrb[1].mxu1 }
 0x1a2   : > { %512 = vst [vmem:[%s1043_s12 + $0x40] sm:$0xff] %v473_v35  ;;  %v753_v36 = vpop.f32.mrb[2].mxu1 }
 0x1a3   : > { %515 = vst [vmem:[%s1043_s12 + $0x58] sm:$0xff] %v753_v36  ;;  %v476_v37 = vpop.f32.mrb[3].mxu1 }
 0x1a4   : > { %513 = vst [vmem:[%s1043_s12 + $0x48] sm:$0xff] %v476_v37 }
 0x1b0   : > { %v756_v38 = vpop.f32.mrb[4].mxu1 }
 0x1b1   : > { %518 = vst [vmem:[%s1043_s12 + $0x70] sm:$0xff] %v756_v38  ;;  %v489_v39 = vpop.f32.mrb[5].mxu1 }
 0x1b2   : > { %516 = vst [vmem:[%s1043_s12 + $0x60] sm:$0xff] %v489_v39  ;;  %v757_v40 = vpop.f32.mrb[6].mxu1 }
 0x1b3   : > { %519 = vst [vmem:[%s1043_s12 + $0x78] sm:$0xff] %v757_v40  ;;  %v492_v5 = vpop.f32.mrb[7].mxu1 }
 0x1b4   : > { %517 = vst [vmem:[%s1043_s12 + $0x68] sm:$0xff] %v492_v5 }
 0x1b5 PF: > { %s14_s16 = sadd.s32 1, %s852_s16   ;;  %s1080_s12 = smov %s844_s14 }
 0x1b6   : > { %p11_p8 = scmp.ge.s32.totalorder %s14_s16, 6   ;;  %s1081_s13 = smov %s848_s15 }
 0x1b7   : > { %s1082_s14 = smov %s1085_s17  ;;  %s1083_s15 = smov %s1089_s18 }
 0x1b8   :  { %13 = sbr.rel (!%p11_p8) target bundleno = 3 (0x3), region = 70 }

// kernel: _lambda_.7
= control target key start
LH: loop header
LB: loop body
LE: loop exit
PB: predicated region body
PF: predicated region fallthrough
CT: control target
= control target key end

     0   :  { %s1040_s18 = smov 0   ;;  %s1042_s19 = smov 0   ;;  %s1265_s0 = inlined_call_operand.vmem [shape: bf16[2,16,16,128], index: 0, kind: input, shape index: {}]   ;;  %s1266_s1 = inlined_call_operand.vmem [shape: f32[2,16,16,128], index: 1, kind: input, shape index: {}]   ;;  %s1267_s2 = inlined_call_operand.vmem [shape: f32[2,128], index: 2, kind: input, shape index: {}]   ;;  %s1268_s3 = inlined_call_operand.vmem [shape: f32[2,128], index: 3, kind: input, shape index: {}]   ;;  %s1269_s4 = inlined_call_operand.vmem [shape: bf16[128,128], index: 4, kind: input, shape index: {}]   ;;  %s1270_s5 = inlined_call_operand.vmem [shape: f32[2,16,16,128], index: 5, kind: output, shape index: {}]  }
   0x1   :  { %s1044_s20 = smov 0   ;;  %s1046_s21 = smov 0  }
   0x2   :  { %s1048_s22 = smov 0  }
   0x3 LB: > { %s24_s23 = sadd.s32 1, %s1000_s20  ;;  %s27_s24 = sadd.s32 1, %s1004_s21  ;;  %s1008_s22 = sphi %s1048_s22, %s15_s22   ;;  %s1004_s21 = sphi %s1046_s21, %s1274_s21   ;;  %s1000_s20 = sphi %s1044_s20, %s1273_s20   ;;  %s996_s19 = sphi %s1042_s19, %s1272_s19   ;;  %s992_s18 = sphi %s1040_s18, %s1271_s18  }
   0x4   : > { %p25_p0 = scmp.ge.s32.totalorder %s24_s23, 2  ;;  %p796_p1 = scmp.ge.s32.totalorder %s1008_s22, 1 }
   0x5   : > { %p227_p2 = scmp.lt.s32.totalorder %s1008_s22, 5 }
   0x6   : > { %s1276_s23 = smov (%p25_p0, %s24_s23), 0  ;;  %s1278_s24 = smov (!%p25_p0, %s27_s24), %s1004_s21 }
   0x7   : > { %p228_p3 = pnand %p796_p1, %p227_p2  ;;  %p29_p4 = scmp.ge.s32.totalorder %s1278_s24, 2 }
   0x8   : > { %v962_v0 = vld [vmem:[%s1269_s4] sm:$0xff] (!%p228_p3)   ;;  %s797_s27 = sshll.u32 (!%p228_p3), %s992_s18, 3  ;;  %v963_v1 = vld [vmem:[%s1269_s4 + $0x8] sm:$0xff] (!%p228_p3)   ;;  %p276_p5 = scmp.lt.s32.totalorder (!%p228_p3), %s996_s19, 1  ;;  %v342_v2 = vlaneseq (!%p228_p3)  ;;  %v964_v3 = vld [vmem:[%s1269_s4 + $0x10] sm:$0xff] (!%p228_p3)  }
   0x9   : > { %s1280_s24 = smov (%p29_p4, %s1278_s24), 0  ;;  %231 = sbr.rel (%p228_p3) target bundleno = 275 (0x113), region = 40 }
   0xa   : > { %874 = vmatprep.subr.bf16.mxu0 (!%p228_p3), %v962_v0  ;;  %906 = vmatprep.subr.bf16.mxu1 (!%p228_p3), %v962_v0  ;;  %p278_p6 = scmp.lt.s32.totalorder (!%p228_p3), %s797_s27, 15  ;;  %v1084_v4 = vshrl.u32 (!%p228_p3), %v342_v2, 7  ;;  %v965_v5 = vld [vmem:[%s1269_s4 + $0x18] sm:$0xff] (!%p228_p3)   ;;  %v309_v6 = vld [vmem:[%s1267_s2] sm:$0x3] (!%p228_p3)  ;;  %v967_v33 = vld [vmem:[%s1269_s4 + $0x28] sm:$0xff] (!%p228_p3)  }
   0xb   : > { %875 = vmatpush3.bf16.msra.mxu0 (!%p228_p3), %v962_v0  ;;  %914 = vmatpush3.bf16.msra.mxu1 (!%p228_p3), %v962_v0  ;;  %v966_v17 = vld [vmem:[%s1269_s4 + $0x20] sm:$0xff] (!%p228_p3)   ;;  %v968_v49 = vld [vmem:[%s1269_s4 + $0x30] sm:$0xff] (!%p228_p3)  }
   0xc   : > { %876 = vmatprep.subr.bf16.mxu0 (!%p228_p3), %v963_v1  ;;  %907 = vmatprep.subr.bf16.mxu1 (!%p228_p3), %v963_v1  ;;  %v344_v7 = vsub.s32 (!%p228_p3), 0, %v1084_v4  ;;  %v364_v8 = vsub.s32 (!%p228_p3), 1, %v1084_v4 }
   0xe   : > { %v1105_v14 = vrot.slane (!%p228_p3), %v309_v6, %v344_v7  ;;  %v1109_v15 = vrot.slane (!%p228_p3), %v309_v6, %v364_v8 }
   0xf   : > { %877 = vmatpush3.bf16.msra.mxu0 (!%p228_p3), %v963_v1  ;;  %915 = vmatpush3.bf16.msra.mxu1 (!%p228_p3), %v963_v1  ;;  %v969_v1 = vld [vmem:[%s1269_s4 + $0x38] sm:$0xff] (!%p228_p3)  }
  0x10   : > { %s1282_s19 = smov (!%p276_p5, %s996_s19), 1  ;;  %s1284_s27 = smov (!%p278_p6, %s797_s27), 15  ;;  %878 = vmatprep.subr.bf16.mxu0 %v964_v3  ;;  %908 = vmatprep.subr.bf16.mxu1 %v964_v3 }
  0x11   : > { %s799_s7 = sshll.u32 %s1282_s19, 5  ;;  %s798_s8 = sshll.u32 %s1284_s27, 1 }
  0x12   : > { %s1082_s9 = sadd.s32 %s799_s7, %s798_s8 }
  0x13   : > { %s800_s12 = sshll.u32 %s1082_s9, 2  ;;  %879 = vmatpush3.bf16.msra.mxu0 %v964_v3  ;;  %916 = vmatpush3.bf16.msra.mxu1 %v964_v3  ;;  %s804_s8 = sshll.u32 %s1082_s9, 3 }
  0x14   : > { %s1096_s17 = scalar_lea.vmem %s1265_s0, %s800_s12  ;;  %880 = vmatprep.subr.bf16.mxu0 %v965_v5  ;;  %909 = vmatprep.subr.bf16.mxu1 %v965_v5  ;;  %s1173_s12 = scalar_lea.vmem %s1266_s1, %s804_s8 }
  0x15   : > { %v820_v9 = vld [vmem:[%s1096_s17] sm:$0xff]   ;;  %v851_v11 = vld [vmem:[%s1096_s17 + $0x8] sm:$0xff]   ;;  %v852_v22 = vld [vmem:[%s1096_s17 + $0x10] sm:$0xff]   ;;  %s1206_s15 = scalar_lea.vmem %s1270_s5, %s804_s8 }
  0x16   : > { %v854_v10 = vld [vmem:[%s1096_s17 + $0x20] sm:$0xff]   ;;  %v821_v12 = vunpack.c.l.bf16 %v820_v9  ;;  %v822_v13 = vunpack.c.h.bf16 %v820_v9  ;;  %v855_v16 = vld [vmem:[%s1096_s17 + $0x28] sm:$0xff]   ;;  %v825_v20 = vunpack.c.l.bf16 %v851_v11  ;;  %v826_v21 = vunpack.c.h.bf16 %v851_v11  ;;  %v856_v42 = vld [vmem:[%s1096_s17 + $0x30] sm:$0xff]  }
  0x17   : > { %v837_v18 = vunpack.c.l.bf16 %v854_v10  ;;  %v838_v19 = vunpack.c.h.bf16 %v854_v10  ;;  %v841_v25 = vunpack.c.l.bf16 %v855_v16  ;;  %v842_v26 = vunpack.c.h.bf16 %v855_v16  ;;  %881 = vmatpush3.bf16.msra.mxu0 %v965_v5  ;;  %917 = vmatpush3.bf16.msra.mxu1 %v965_v5  ;;  %v853_v48 = vld [vmem:[%s1096_s17 + $0x18] sm:$0xff]  }
  0x18   : > { %v346_v23 = vmul.f32 %v821_v12, %v1105_v14  ;;  %v347_v24 = vmul.f32 %v822_v13, %v1105_v14  ;;  %v348_v31 = vmul.f32 %v825_v20, %v1105_v14  ;;  %v829_v32 = vunpack.c.l.bf16 %v852_v22  ;;  %882 = vmatprep.subr.bf16.mxu0 %v966_v17  ;;  %910 = vmatprep.subr.bf16.mxu1 %v966_v17  ;;  %v857_v54 = vld [vmem:[%s1096_s17 + $0x38] sm:$0xff]  }
  0x19   : > { %v354_v27 = vmul.f32 %v837_v18, %v1105_v14  ;;  %v355_v28 = vmul.f32 %v838_v19, %v1105_v14  ;;  %v349_v36 = vmul.f32 %v826_v21, %v1105_v14  ;;  %v830_v37 = vunpack.c.h.bf16 %v852_v22 }
  0x1a   : > { %v366_v29 = vadd.f32 %v1109_v15, %v346_v23  ;;  %v367_v30 = vadd.f32 %v1109_v15, %v347_v24  ;;  %v356_v40 = vmul.f32 %v841_v25, %v1105_v14  ;;  %v357_v41 = vmul.f32 %v842_v26, %v1105_v14 }
  0x1b   : > { %v374_v34 = vadd.f32 %v1109_v15, %v354_v27  ;;  %v375_v35 = vadd.f32 %v1109_v15, %v355_v28  ;;  %883 = vmatpush3.bf16.msra.mxu0 %v966_v17  ;;  %918 = vmatpush3.bf16.msra.mxu1 %v966_v17  ;;  %v368_v46 = vadd.f32 %v1109_v15, %v348_v31  ;;  %v845_v53 = vunpack.c.l.bf16 %v856_v42 }
  0x1c   : > { %v382_v38 = vmax.f32 %v366_v29, 0.0  ;;  %v383_v39 = vmax.f32 %v367_v30, 0.0  ;;  %v350_v47 = vmul.f32 %v829_v32, %v1105_v14  ;;  %884 = vmatprep.subr.bf16.mxu0 %v967_v33  ;;  %911 = vmatprep.subr.bf16.mxu1 %v967_v33  ;;  %v369_v51 = vadd.f32 %v1109_v15, %v349_v36 }
  0x1d   : > { %v390_v43 = vmax.f32 %v374_v34, 0.0  ;;  %v391_v44 = vmax.f32 %v375_v35, 0.0  ;;  %v351_v52 = vmul.f32 %v830_v37, %v1105_v14  ;;  %v376_v55 = vadd.f32 %v1109_v15, %v356_v40 }
  0x1e   : > { %v398_v45 = vpack.c.bf16 %v383_v39, %v382_v38  ;;  %v377_v56 = vadd.f32 %v1109_v15, %v357_v41  ;;  %v846_v57 = vunpack.c.h.bf16 %v856_v42  ;;  %v370_v58 = vadd.f32 %v1109_v15, %v350_v47  ;;  %v570_v42 = vld [vmem:[%s1173_s12 + $0x10] sm:$0xff] }
  0x1f   : > { %v402_v50 = vpack.c.bf16 %v391_v44, %v390_v43  ;;  %v358_v59 = vmul.f32 %v845_v53, %v1105_v14  ;;  %v833_v60 = vunpack.c.l.bf16 %v853_v48  ;;  %v834_v61 = vunpack.c.h.bf16 %v853_v48  ;;  %885 = vmatpush3.bf16.msra.mxu0 %v967_v33  ;;  %919 = vmatpush3.bf16.msra.mxu1 %v967_v33  ;;  %v578_v43 = vld [vmem:[%s1173_s12 + $0x50] sm:$0xff]  ;;  %v568_v48 = vld [vmem:[%s1173_s12] sm:$0xff] }
  0x20   : > { %890 = vmatprep.mubr.bf16.mxu0 %v398_v45  ;;  %v371_v62 = vadd.f32 %v1109_v15, %v351_v52  ;;  %v359_v63 = vmul.f32 %v846_v57, %v1105_v14  ;;  %v849_v0 = vunpack.c.l.bf16 %v857_v54  ;;  %886 = vmatprep.subr.bf16.mxu0 %v968_v49  ;;  %v384_v2 = vmax.f32 %v368_v46, 0.0  ;;  %v579_v57 = vld [vmem:[%s1173_s12 + $0x58] sm:$0xff] }
  0x21   : > { %898 = vmatprep.mubr.bf16.mxu1 %v402_v50  ;;  %912 = vmatprep.subr.bf16.mxu1 %v968_v49  ;;  %v385_v3 = vmax.f32 %v369_v51, 0.0  ;;  %v378_v5 = vadd.f32 %v1109_v15, %v358_v59  ;;  %v392_v6 = vmax.f32 %v376_v55, 0.0  ;;  %v393_v9 = vmax.f32 %v377_v56, 0.0  ;;  %v571_v56 = vld [vmem:[%s1173_s12 + $0x18] sm:$0xff] }
  0x22   : > { %v379_v10 = vadd.f32 %v1109_v15, %v359_v63  ;;  %v850_v11 = vunpack.c.h.bf16 %v857_v54  ;;  %v386_v12 = vmax.f32 %v370_v58, 0.0  ;;  %v352_v13 = vmul.f32 %v833_v60, %v1105_v14 }
  0x23   : > { %v353_v16 = vmul.f32 %v834_v61, %v1105_v14  ;;  %v360_v17 = vmul.f32 %v849_v0, %v1105_v14  ;;  %887 = vmatpush3.bf16.msra.mxu0 %v968_v49  ;;  %920 = vmatpush3.bf16.msra.mxu1 %v968_v49  ;;  %v387_v18 = vmax.f32 %v371_v62, 0.0  ;;  %v394_v19 = vmax.f32 %v378_v5, 0.0  ;;  %v576_v49 = vld [vmem:[%s1173_s12 + $0x40] sm:$0xff]  ;;  %v569_v0 = vld [vmem:[%s1173_s12 + $0x8] sm:$0xff] }
  0x24   : > { %v395_v20 = vmax.f32 %v379_v10, 0.0  ;;  %v361_v21 = vmul.f32 %v850_v11, %v1105_v14  ;;  %888 = vmatprep.subr.bf16.mxu0 %v969_v1  ;;  %913 = vmatprep.subr.bf16.mxu1 %v969_v1  ;;  %v399_v22 = vpack.c.bf16 %v385_v3, %v384_v2  ;;  %v403_v23 = vpack.c.bf16 %v393_v9, %v392_v6 }
  0x25   : > { %v372_v24 = vadd.f32 %v1109_v15, %v352_v13  ;;  %v373_v25 = vadd.f32 %v1109_v15, %v353_v16  ;;  %v380_v26 = vadd.f32 %v1109_v15, %v360_v17  ;;  %v400_v28 = vpack.c.bf16 %v387_v18, %v386_v12 }
  0x26   : > { %v381_v27 = vadd.f32 %v1109_v15, %v361_v21  ;;  %v404_v29 = vpack.c.bf16 %v395_v20, %v394_v19  ;;  %v567_v15 = vld [vmem:[%s1268_s3] sm:$0x3] }
  0x27   : > { %889 = vmatpush3.bf16.msra.mxu0 %v969_v1  ;;  %921 = vmatpush3.bf16.msra.mxu1 %v969_v1  ;;  %v388_v14 = vmax.f32 %v372_v24, 0.0  ;;  %v389_v30 = vmax.f32 %v373_v25, 0.0  ;;  %v396_v31 = vmax.f32 %v380_v26, 0.0  ;;  %v1166_v35 = vrot.slane %v567_v15, %v344_v7  ;;  %v577_v1 = vld [vmem:[%s1173_s12 + $0x48] sm:$0xff] }
  0x28   : > { %v397_v32 = vmax.f32 %v381_v27, 0.0  ;;  %v1177_v36 = vrot.slane %v567_v15, %v364_v8 }
  0x29   : > { %v401_v33 = vpack.c.bf16 %v389_v30, %v388_v14  ;;  %v582_v14 = vld [vmem:[%s1173_s12 + $0x70] sm:$0xff] }
  0x2a   : > { %891 = vmatmul.mubr.bf16.vlgmr.msra.gmra.mrb[0].mxu0 %v399_v22  ;;  %899 = vmatmul.mubr.bf16.vlgmr.msra.gmra.mrb[0].mxu1 %v403_v23  ;;  %v405_v34 = vpack.c.bf16 %v397_v32, %v396_v31 }
  0x2b   : > { %894 = vmatprep.mubr.bf16.mxu0 %v400_v28  ;;  %902 = vmatprep.mubr.bf16.mxu1 %v404_v29  ;;  %v574_v29 = vld [vmem:[%s1173_s12 + $0x30] sm:$0xff] }
  0x32   : > { %895 = vmatmul.mubr.bf16.gmra.mrb[4].mxu0 %v401_v33  ;;  %903 = vmatmul.mubr.bf16.gmra.mrb[4].mxu1 %v405_v34 }
  0xfd   : > { %v892_v37 = vpop.f32.mrb[0].mxu0  ;;  %v900_v38 = vpop.f32.mrb[0].mxu1 }
  0xfe   : > { %v590_v39 = vmul.f32 %v892_v37, %v1166_v35  ;;  %v598_v7 = vmul.f32 %v900_v38, %v1166_v35  ;;  %v504_v40 = vpop.f32.mrb[1].mxu0  ;;  %v536_v41 = vpop.f32.mrb[1].mxu1  ;;  %v572_v37 = vld [vmem:[%s1173_s12 + $0x20] sm:$0xff] }
  0xff   : > { %v588_v4 = vmul.f32 %v1166_v35, %v504_v40  ;;  %v596_v44 = vmul.f32 %v1166_v35, %v536_v41  ;;  %v893_v45 = vpop.f32.mrb[2].mxu0  ;;  %v901_v8 = vpop.f32.mrb[2].mxu1  ;;  %v580_v38 = vld [vmem:[%s1173_s12 + $0x60] sm:$0xff] }
 0x100   : > { %v610_v46 = vadd.f32 %v1177_v36, %v590_v39  ;;  %v618_v47 = vadd.f32 %v1177_v36, %v598_v7  ;;  %v591_v50 = vmul.f32 %v893_v45, %v1166_v35  ;;  %v599_v51 = vmul.f32 %v901_v8, %v1166_v35  ;;  %v507_v52 = vpop.f32.mrb[3].mxu0  ;;  %v539_v53 = vpop.f32.mrb[3].mxu1 }
 0x101   : > { %v608_v54 = vadd.f32 %v1177_v36, %v588_v4  ;;  %v616_v55 = vadd.f32 %v1177_v36, %v596_v44  ;;  %v589_v58 = vmul.f32 %v1166_v35, %v507_v52  ;;  %v597_v59 = vmul.f32 %v1166_v35, %v539_v53  ;;  %v575_v4 = vld [vmem:[%s1173_s12 + $0x38] sm:$0xff] }
 0x102   : > { %v626_v60 = vadd.f32 %v610_v46, %v570_v42  ;;  %v634_v61 = vadd.f32 %v618_v47, %v578_v43  ;;  %v611_v62 = vadd.f32 %v1177_v36, %v591_v50  ;;  %v619_v63 = vadd.f32 %v1177_v36, %v599_v51  ;;  %v583_v44 = vld [vmem:[%s1173_s12 + $0x78] sm:$0xff]  ;;  %v573_v50 = vld [vmem:[%s1173_s12 + $0x28] sm:$0xff] }
 0x103   : > { %v624_v2 = vadd.f32 %v608_v54, %v568_v48  ;;  %v632_v3 = vadd.f32 %v616_v55, %v576_v49  ;;  %v609_v5 = vadd.f32 %v1177_v36, %v589_v58  ;;  %v617_v6 = vadd.f32 %v1177_v36, %v597_v59  ;;  %v581_v51 = vld [vmem:[%s1173_s12 + $0x68] sm:$0xff] }
 0x104   : > { %v642_v9 = vmax.f32 %v626_v60, 0.0  ;;  %v650_v10 = vmax.f32 %v634_v61, 0.0  ;;  %v627_v11 = vadd.f32 %v611_v62, %v571_v56  ;;  %v635_v12 = vadd.f32 %v619_v63, %v579_v57 }
 0x105   : > { %v640_v13 = vmax.f32 %v624_v2, 0.0  ;;  %v648_v16 = vmax.f32 %v632_v3, 0.0  ;;  %v625_v17 = vadd.f32 %v609_v5, %v569_v0  ;;  %v633_v18 = vadd.f32 %v617_v6, %v577_v1  ;;  %v896_v19 = vpop.f32.mrb[4].mxu0  ;;  %v904_v20 = vpop.f32.mrb[4].mxu1 }
 0x106   : > { %658 = vst [vmem:[%s1206_s15 + $0x10] sm:$0xff] %v642_v9  ;;  %666 = vst [vmem:[%s1206_s15 + $0x50] sm:$0xff] %v650_v10  ;;  %v643_v21 = vmax.f32 %v627_v11, 0.0  ;;  %v651_v22 = vmax.f32 %v635_v12, 0.0  ;;  %v594_v23 = vmul.f32 %v896_v19, %v1166_v35  ;;  %v602_v24 = vmul.f32 %v904_v20, %v1166_v35  ;;  %v520_v25 = vpop.f32.mrb[5].mxu0  ;;  %v552_v26 = vpop.f32.mrb[5].mxu1 }
 0x107   : > { %656 = vst [vmem:[%s1206_s15] sm:$0xff] %v640_v13  ;;  %664 = vst [vmem:[%s1206_s15 + $0x40] sm:$0xff] %v648_v16  ;;  %v641_v27 = vmax.f32 %v625_v17, 0.0  ;;  %v649_v28 = vmax.f32 %v633_v18, 0.0  ;;  %v592_v30 = vmul.f32 %v1166_v35, %v520_v25  ;;  %v600_v31 = vmul.f32 %v1166_v35, %v552_v26  ;;  %v897_v32 = vpop.f32.mrb[6].mxu0  ;;  %v905_v33 = vpop.f32.mrb[6].mxu1 }
 0x108   : > { %659 = vst [vmem:[%s1206_s15 + $0x18] sm:$0xff] %v643_v21  ;;  %667 = vst [vmem:[%s1206_s15 + $0x58] sm:$0xff] %v651_v22  ;;  %v614_v34 = vadd.f32 %v1177_v36, %v594_v23  ;;  %v622_v15 = vadd.f32 %v1177_v36, %v602_v24  ;;  %v595_v39 = vmul.f32 %v897_v32, %v1166_v35  ;;  %v523_v40 = vpop.f32.mrb[7].mxu0  ;;  %v555_v41 = vpop.f32.mrb[7].mxu1 }
 0x109   : > { %v603_v7 = vmul.f32 %v905_v33, %v1166_v35  ;;  %657 = vst [vmem:[%s1206_s15 + $0x8] sm:$0xff] %v641_v27  ;;  %665 = vst [vmem:[%s1206_s15 + $0x48] sm:$0xff] %v649_v28  ;;  %v612_v42 = vadd.f32 %v1177_v36, %v592_v30  ;;  %v620_v43 = vadd.f32 %v1177_v36, %v600_v31 }
 0x10a   : > { %v593_v45 = vmul.f32 %v1166_v35, %v523_v40  ;;  %v601_v8 = vmul.f32 %v1166_v35, %v555_v41  ;;  %v630_v46 = vadd.f32 %v614_v34, %v574_v29  ;;  %v638_v47 = vadd.f32 %v622_v15, %v582_v14 }
 0x10b   : > { %v615_v48 = vadd.f32 %v1177_v36, %v595_v39  ;;  %v623_v49 = vadd.f32 %v1177_v36, %v603_v7  ;;  %v628_v52 = vadd.f32 %v612_v42, %v572_v37  ;;  %v636_v53 = vadd.f32 %v620_v43, %v580_v38 }
 0x10c   : > { %v613_v54 = vadd.f32 %v1177_v36, %v593_v45  ;;  %v621_v55 = vadd.f32 %v1177_v36, %v601_v8  ;;  %v646_v56 = vmax.f32 %v630_v46, 0.0  ;;  %v654_v35 = vmax.f32 %v638_v47, 0.0 }
 0x10d   : > { %v631_v57 = vadd.f32 %v615_v48, %v575_v4  ;;  %v639_v58 = vadd.f32 %v623_v49, %v583_v44  ;;  %v644_v59 = vmax.f32 %v628_v52, 0.0  ;;  %v652_v60 = vmax.f32 %v636_v53, 0.0 }
 0x10e   : > { %v629_v61 = vadd.f32 %v613_v54, %v573_v50  ;;  %v637_v62 = vadd.f32 %v621_v55, %v581_v51  ;;  %662 = vst [vmem:[%s1206_s15 + $0x30] sm:$0xff] %v646_v56  ;;  %670 = vst [vmem:[%s1206_s15 + $0x70] sm:$0xff] %v654_v35 }
 0x10f   : > { %v647_v63 = vmax.f32 %v631_v57, 0.0  ;;  %v655_v0 = vmax.f32 %v639_v58, 0.0  ;;  %660 = vst [vmem:[%s1206_s15 + $0x20] sm:$0xff] %v644_v59  ;;  %668 = vst [vmem:[%s1206_s15 + $0x60] sm:$0xff] %v652_v60 }
 0x110   : > { %v645_v1 = vmax.f32 %v629_v61, 0.0  ;;  %v653_v36 = vmax.f32 %v637_v62, 0.0 }
 0x111   : > { %663 = vst [vmem:[%s1206_s15 + $0x38] sm:$0xff] %v647_v63  ;;  %671 = vst [vmem:[%s1206_s15 + $0x78] sm:$0xff] %v655_v0 }
 0x112   : > { %661 = vst [vmem:[%s1206_s15 + $0x28] sm:$0xff] %v645_v1  ;;  %669 = vst [vmem:[%s1206_s15 + $0x68] sm:$0xff] %v653_v36 }
 0x113 PF: > { %s15_s22 = sadd.s32 1, %s1008_s22   ;;  %s1271_s18 = smov %s1000_s20 }
 0x114   : > { %p12_p7 = scmp.ge.s32.totalorder %s15_s22, 6   ;;  %s1272_s19 = smov %s1004_s21 }
 0x115   : > { %s1273_s20 = smov %s1276_s23  ;;  %s1274_s21 = smov %s1280_s24 }
 0x116   :  { %14 = sbr.rel (!%p12_p7) target bundleno = 3 (0x3), region = 73 }

// kernel: _lambda_.5
= control target key start
LH: loop header
LB: loop body
LE: loop exit
PB: predicated region body
PF: predicated region fallthrough
CT: control target
= control target key end

     0   :  { %s3247_s18 = smov 0   ;;  %s3249_s19 = smov 0   ;;  %s4074_s0 = inlined_call_operand.vmem [shape: bf16[2,16,16,128], index: 0, kind: input, shape index: {}, may-alias: {0,3}]   ;;  %s4075_s1 = inlined_call_operand.vmem [shape: f32[2,128], index: 1, kind: input, shape index: {}]   ;;  %s4076_s2 = inlined_call_operand.vmem [shape: bf16[3,384,128], index: 2, kind: input, shape index: {}]   ;;  %s4077_s3 = inlined_call_operand.vmem [shape: bf16[2,16,16,128], index: 3, kind: input, shape index: {}, may-alias: {0,3}]   ;;  %s4078_s4 = inlined_call_operand.vmem [shape: bf16[2,16,16,128], index: 4, kind: output, shape index: {0}]   ;;  %s4079_s5 = inlined_call_operand.vmem [shape: f32[2,2,2,128], index: 5, kind: output, shape index: {1}]  }
   0x1   :  { %s3251_s20 = smov 0   ;;  %s3253_s21 = smov 0  }
   0x2   :  { %s3255_s22 = smov 0  }
   0x3 LB: > { %s25_s23 = sadd.s32 1, %s3207_s20  ;;  %s28_s24 = sadd.s32 1, %s3211_s21  ;;  %s3215_s22 = sphi %s3255_s22, %s16_s22   ;;  %s3211_s21 = sphi %s3253_s21, %s4087_s21   ;;  %s3207_s20 = sphi %s3251_s20, %s4086_s20   ;;  %s3203_s19 = sphi %s3249_s19, %s4085_s19   ;;  %s3199_s18 = sphi %s3247_s18, %s4084_s18  }
   0x4   : > { %p26_p0 = scmp.ge.s32.totalorder %s25_s23, 2  ;;  %p2259_p1 = scmp.ge.s32.totalorder %s3215_s22, 1 }
   0x5   : > { %p190_p2 = scmp.lt.s32.totalorder %s3215_s22, 5 }
   0x6   : > { %s4089_s23 = smov (%p26_p0, %s25_s23), 0  ;;  %s4091_s24 = smov (!%p26_p0, %s28_s24), %s3211_s21 }
   0x7   : > { %p191_p3 = pnand %p2259_p1, %p190_p2  ;;  %p30_p4 = scmp.ge.s32.totalorder %s4091_s24, 2 }
   0x8   : > { %s2260_s25 = sshll.u32 (!%p191_p3), %s3199_s18, 3  ;;  %p235_p5 = scmp.lt.s32.totalorder (!%p191_p3), %s3203_s19, 1 }
   0x9   : > { %s4093_s24 = smov (%p30_p4, %s4091_s24), 0  ;;  %194 = sbr.rel (%p191_p3) target bundleno = 494 (0x1ee), region = 32 }
   0xa   : > { %p237_p6 = scmp.lt.s32.totalorder (!%p191_p3), %s2260_s25, 15  ;;  %p258_p7 = scmp.lt.s32.totalorder (!%p191_p3), %s3199_s18, 1 }
   0xb   : > { %s3285_s6 = sadd.s32 (!%p191_p3), 4294967294, %s2260_s25  ;;  %s3301_s17 = sadd.s32 (!%p191_p3), 8, %s2260_s25 }
   0xc   : > { %p267_p8 = scmp.gt.s32.totalorder (!%p191_p3), %s3285_s6, 0  ;;  %p2272_p9 = scmp.lt.s32.totalorder (!%p191_p3), %s3285_s6, 14 }
   0xd   : > { %p272_p10 = scmp.gt.s32.totalorder (!%p191_p3), %s3301_s17, 0  ;;  %p2277_p11 = scmp.lt.s32.totalorder (!%p191_p3), %s3301_s17, 14 }
   0xe   : > { %s2283_s9 = sshll.u32 (!%p191_p3), %s3203_s19, 5 }
  0x10   : > { %s236_s26 = scalar_select %p235_p5, %s3203_s19, 1 }
  0x11   : > { %s238_s27 = scalar_select %p237_p6, %s2260_s25, 15 }
  0x12   : > { %s2262_s28 = sshll.u32 %s236_s26, 5  ;;  %s2268_s29 = sshll.u32 %s236_s26, 1 }
  0x13   : > { %s2261_s30 = sshll.u32 %s238_s27, 1  ;;  %s4095_s18 = smov (!%p258_p7, %s3199_s18), 1 }
  0x14   : > { %s241_s7 = sadd.s32 %s2262_s28, %s2261_s30  ;;  %s261_s16 = sadd.s32 %s2268_s29, %s4095_s18 }
  0x15   : > { %s2263_s8 = sshll.u32 %s241_s7, 2  ;;  %s2269_s26 = sshll.u32 %s261_s16, 1 }
  0x16   : > { %s3292_s11 = scalar_lea.vmem %s4074_s0, %s2263_s8  ;;  %s3297_s14 = scalar_lea.vmem %s4078_s4, %s2263_s8 }
  0x17   : > { %s268_s15 = scalar_select %p267_p8, %s3285_s6, 0 }
  0x18   : > { %s3307_s30 = scalar_lea.vmem %s4079_s5, %s2269_s26 }
  0x19   : > { %s4097_s15 = smov (!%p2272_p9, %s268_s15), 14 }
  0x1a   : > { %s273_s7 = scalar_select %p272_p10, %s3301_s17, 0 }
  0x1b   : > { %s2282_s8 = sshll.u32 %s4097_s15, 1 }
  0x1c   : > { %s4099_s7 = smov (!%p2277_p11, %s273_s7), 14  ;;  %s278_s10 = sadd.s32 %s2283_s9, %s2282_s8 }
  0x1d   : > { %s2284_s18 = sshll.u32 %s278_s10, 2 }
  0x1e   : > { %s280_s12 = scalar_lea.vmem %s4077_s3, %s2284_s18 }
  0x1f   : > { %v3315_v0 = vld [vmem:[%s280_s12] sm:$0xff]  ;;  %v3317_v1 = vld [vmem:[%s280_s12 + $0x8] sm:$0xff] }
  0x20   : > { %324 = vsyncadd [#allocation4], 256  ;;  %s2285_s13 = sshll.u32 %s4099_s7, 1 }
  0x21   : > { %s326_s16 = sadd.s32 %s2285_s13, %s2283_s9 }
  0x22   : > { %s2286_s26 = sshll.u32 %s326_s16, 2 }
  0x23   : > { %s328_s15 = scalar_lea.vmem %s4077_s3, %s2286_s26 }
  0x24   : > { %v3322_v2 = vld [vmem:[%s328_s15] sm:$0xff]  ;;  %v3324_v3 = vld [vmem:[%s328_s15 + $0x8] sm:$0xff] }
  0x25   : > { %373 = vsyncadd [#allocation4 + $0x1], 256  ;;  %v407_v4 = vlaneseq  ;;  %v2544_v5 = vld [vmem:[%s3292_s11] sm:$0xff]   ;;  %v2615_v6 = vld [vmem:[%s3292_s11 + $0x8] sm:$0xff]  }
  0x26   : > { %v2616_v7 = vld [vmem:[%s3292_s11 + $0x10] sm:$0xff]   ;;  %v2617_v8 = vld [vmem:[%s3292_s11 + $0x18] sm:$0xff]   ;;  %v2618_v9 = vld [vmem:[%s3292_s11 + $0x20] sm:$0xff]   ;;  %v2545_v12 = vunpack.c.l.bf16 %v2544_v5  ;;  %v2546_v13 = vunpack.c.h.bf16 %v2544_v5  ;;  %v2549_v14 = vunpack.c.l.bf16 %v2615_v6  ;;  %v2550_v15 = vunpack.c.h.bf16 %v2615_v6 }
  0x27   : > { %v408_v10 = vshrl.u32 %v407_v4, 7  ;;  %v374_v11 = vld [vmem:[%s4075_s1] sm:$0x3]  ;;  %v2619_v16 = vld [vmem:[%s3292_s11 + $0x28] sm:$0xff]   ;;  %v2620_v17 = vld [vmem:[%s3292_s11 + $0x30] sm:$0xff]   ;;  %v2553_v18 = vunpack.c.l.bf16 %v2616_v7  ;;  %v2554_v19 = vunpack.c.h.bf16 %v2616_v7  ;;  %v2557_v23 = vunpack.c.l.bf16 %v2617_v8 }
  0x28   : > { %v2621_v20 = vld [vmem:[%s3292_s11 + $0x38] sm:$0xff]   ;;  %v2558_v24 = vunpack.c.h.bf16 %v2617_v8  ;;  %v2561_v25 = vunpack.c.l.bf16 %v2618_v9  ;;  %v2562_v26 = vunpack.c.h.bf16 %v2618_v9  ;;  %v2565_v27 = vunpack.c.l.bf16 %v2619_v16 }
  0x29   : > { %v409_v21 = vsub.s32 0, %v408_v10  ;;  %v429_v22 = vsub.s32 1, %v408_v10  ;;  %v2566_v28 = vunpack.c.h.bf16 %v2619_v16  ;;  %v2569_v29 = vunpack.c.l.bf16 %v2620_v17 }
  0x2a   : > { %v2570_v31 = vunpack.c.h.bf16 %v2620_v17  ;;  %v2573_v32 = vunpack.c.l.bf16 %v2621_v20  ;;  %v2574_v33 = vunpack.c.h.bf16 %v2621_v20 }
  0x2b   : > { %v3337_v30 = vrot.slane %v374_v11, %v409_v21  ;;  %v3339_v34 = vrot.slane %v374_v11, %v429_v22 }
  0x2d   : > { %v411_v35 = vmul.f32 %v2545_v12, %v3337_v30  ;;  %v412_v36 = vmul.f32 %v2546_v13, %v3337_v30  ;;  %v413_v37 = vmul.f32 %v2549_v14, %v3337_v30  ;;  %v414_v38 = vmul.f32 %v2550_v15, %v3337_v30 }
  0x2e   : > { %v415_v39 = vmul.f32 %v2553_v18, %v3337_v30  ;;  %v416_v40 = vmul.f32 %v2554_v19, %v3337_v30  ;;  %v417_v41 = vmul.f32 %v2557_v23, %v3337_v30  ;;  %v418_v42 = vmul.f32 %v2558_v24, %v3337_v30 }
  0x2f   : > { %v419_v43 = vmul.f32 %v2561_v25, %v3337_v30  ;;  %v420_v44 = vmul.f32 %v2562_v26, %v3337_v30  ;;  %v421_v45 = vmul.f32 %v2565_v27, %v3337_v30  ;;  %v422_v46 = vmul.f32 %v2566_v28, %v3337_v30 }
  0x30   : > { %v423_v47 = vmul.f32 %v2569_v29, %v3337_v30  ;;  %v424_v48 = vmul.f32 %v2570_v31, %v3337_v30  ;;  %v425_v49 = vmul.f32 %v2573_v32, %v3337_v30  ;;  %v426_v50 = vmul.f32 %v2574_v33, %v3337_v30 }
  0x31   : > { %v431_v51 = vadd.f32 %v3339_v34, %v411_v35  ;;  %v432_v52 = vadd.f32 %v3339_v34, %v412_v36  ;;  %v433_v53 = vadd.f32 %v3339_v34, %v413_v37  ;;  %v434_v54 = vadd.f32 %v3339_v34, %v414_v38 }
  0x32   : > { %v435_v55 = vadd.f32 %v3339_v34, %v415_v39  ;;  %v436_v56 = vadd.f32 %v3339_v34, %v416_v40  ;;  %v437_v57 = vadd.f32 %v3339_v34, %v417_v41  ;;  %v438_v58 = vadd.f32 %v3339_v34, %v418_v42 }
  0x33   : > { %v439_v59 = vadd.f32 %v3339_v34, %v419_v43  ;;  %v440_v60 = vadd.f32 %v3339_v34, %v420_v44  ;;  %v441_v61 = vadd.f32 %v3339_v34, %v421_v45  ;;  %v442_v62 = vadd.f32 %v3339_v34, %v422_v46 }
  0x34   : > { %v443_v63 = vadd.f32 %v3339_v34, %v423_v47  ;;  %v444_v4 = vadd.f32 %v3339_v34, %v424_v48  ;;  %v445_v5 = vadd.f32 %v3339_v34, %v425_v49  ;;  %v446_v6 = vadd.f32 %v3339_v34, %v426_v50 }
  0x35   : > { %v447_v7 = vmax.f32 %v431_v51, 0.0  ;;  %v448_v8 = vmax.f32 %v432_v52, 0.0  ;;  %v449_v9 = vmax.f32 %v433_v53, 0.0  ;;  %v450_v10 = vmax.f32 %v434_v54, 0.0 }
  0x36   : > { %v451_v11 = vmax.f32 %v435_v55, 0.0  ;;  %v452_v12 = vmax.f32 %v436_v56, 0.0  ;;  %v453_v13 = vmax.f32 %v437_v57, 0.0  ;;  %v454_v14 = vmax.f32 %v438_v58, 0.0 }
  0x37   : > { %v455_v15 = vmax.f32 %v439_v59, 0.0  ;;  %v456_v16 = vmax.f32 %v440_v60, 0.0  ;;  %v457_v17 = vmax.f32 %v441_v61, 0.0  ;;  %v458_v18 = vmax.f32 %v442_v62, 0.0 }
  0x38   : > { %v459_v19 = vmax.f32 %v443_v63, 0.0  ;;  %v460_v20 = vmax.f32 %v444_v4, 0.0  ;;  %v461_v21 = vmax.f32 %v445_v5, 0.0  ;;  %v462_v22 = vmax.f32 %v446_v6, 0.0 }
  0x39   : > { %v463_v23 = vpack.c.bf16 %v448_v8, %v447_v7  ;;  %v464_v24 = vpack.c.bf16 %v450_v10, %v449_v9  ;;  %v465_v25 = vpack.c.bf16 %v452_v12, %v451_v11  ;;  %v466_v26 = vpack.c.bf16 %v454_v14, %v453_v13 }
  0x3a   : > { %v467_v27 = vpack.c.bf16 %v456_v16, %v455_v15  ;;  %v468_v28 = vpack.c.bf16 %v458_v18, %v457_v17  ;;  %v469_v29 = vpack.c.bf16 %v460_v20, %v459_v19  ;;  %v3373_v31 = vpack.c.bf16 %v462_v22, %v461_v21 }
  0x3b   : > { %3193 = dma.done.wait [#allocation4], 256 }
  0x3c   : > { %3194 = vsyncadd [#allocation4], 4294967040 }
  0x3d   : > { %3195 = dma.done.wait [#allocation4 + $0x1], 256 }
  0x3e   : > { %3196 = vsyncadd [#allocation4 + $0x1], 4294967040  ;;  %v3375_v32 = vrot.slane %v463_v23, 7  ;;  %vm566_vm0 = vcmask 1040384   ;;  %vm640_vm1 = vcmask 1046528   ;;  %vm689_vm2 = vcmask 1045504  }
  0x3f   : > { %v3101_v42 = vld [vmem:[%s4076_s2 + $0x100] sm:$0xff]   ;;  %v3104_v45 = vld [vmem:[%s4076_s2 + $0x108] sm:$0xff]   ;;  %v3404_v47 = vrot.slane %v464_v24, 7  ;;  %v3409_v49 = vrot.slane %v465_v25, 7  ;;  %v3107_v50 = vld [vmem:[%s4076_s2 + $0x110] sm:$0xff]   ;;  %v3414_v51 = vrot.slane %v466_v26, 7  ;;  %v482_v20 = vunpack.c.l.bf16 %v3315_v0 }
  0x40   : > { %v575_v33 = vsel %vm566_vm0, 0, %v3375_v32  ;;  %v606_v35 = vsel %vm566_vm0, %v3375_v32, 0  ;;  %v3102_v43 = vld [vmem:[%s4076_s2 + $0x140] sm:$0xff]   ;;  %2629 = vmatprep.subr.bf16.mxu0 %v3101_v42  ;;  %v3105_v46 = vld [vmem:[%s4076_s2 + $0x148] sm:$0xff]   ;;  %v3108_v52 = vld [vmem:[%s4076_s2 + $0x150] sm:$0xff]   ;;  %v3419_v53 = vrot.slane %v467_v27, 7  ;;  %v483_v23 = vunpack.c.h.bf16 %v3315_v0 }
  0x41   : > { %v647_v36 = vrot.slane %v575_v33, 1  ;;  %v648_v37 = vrot.slane %v606_v35, 1  ;;  %v696_v38 = vrot.slane %v575_v33, 2  ;;  %v697_v39 = vrot.slane %v606_v35, 2  ;;  %v3103_v44 = vld [vmem:[%s4076_s2 + $0xc0] sm:$0xff]   ;;  %2869 = vmatprep.subr.bf16.mxu1 %v3102_v43  ;;  %v3106_v48 = vld [vmem:[%s4076_s2 + $0xc8] sm:$0xff]   ;;  %vm3521_vm3 = vmneg %vm566_vm0 }
  0x42   : > { %2630 = vmatpush3.bf16.msra.mxu0 %v3103_v44  ;;  %2870 = vmatpush3.bf16.msra.mxu1 %v3102_v43  ;;  %v3109_v54 = vld [vmem:[%s4076_s2 + $0xd0] sm:$0xff]   ;;  %v3424_v55 = vrot.slane %v468_v28, 7  ;;  %v3110_v56 = vld [vmem:[%s4076_s2 + $0x118] sm:$0xff]   ;;  %v3429_v57 = vrot.slane %v469_v29, 7  ;;  %v3436_v59 = vsel %vm566_vm0, 0, %v3404_v47  ;;  %v3443_v61 = vsel %vm566_vm0, %v3404_v47, 0 }
  0x43   : > { %v3382_v40 = vsel %vm640_vm1, %v647_v36, %v648_v37  ;;  %v3385_v41 = vsel %vm689_vm2, %v696_v38, %v697_v39  ;;  %2631 = vmatprep.subr.bf16.mxu0 %v3104_v45  ;;  %2871 = vmatprep.subr.bf16.mxu1 %v3105_v46  ;;  %v3111_v58 = vld [vmem:[%s4076_s2 + $0x158] sm:$0xff]   ;;  %v3113_v62 = vld [vmem:[%s4076_s2 + $0x120] sm:$0xff]   ;;  %v3450_v63 = vsel %vm566_vm0, 0, %v3409_v49  ;;  %v3457_v5 = vsel %vm566_vm0, %v3409_v49, 0  ;;  %v3116_v10 = vld [vmem:[%s4076_s2 + $0x128] sm:$0xff]  }
  0x44   : > { %1011 = vmatprep.mubr.bf16.mxu0 %v3382_v40  ;;  %2885 = vmatprep.mubr.bf16.mxu1 %v3385_v41  ;;  %v3112_v60 = vld [vmem:[%s4076_s2 + $0xd8] sm:$0xff]   ;;  %v3114_v4 = vld [vmem:[%s4076_s2 + $0x160] sm:$0xff]   ;;  %v699_v6 = vrot.slane %v3436_v59, 2  ;;  %v700_v7 = vrot.slane %v3443_v61, 2  ;;  %v650_v9 = vrot.slane %v3436_v59, 1  ;;  %v651_v11 = vrot.slane %v3443_v61, 1 }
  0x45   : > { %v3115_v8 = vld [vmem:[%s4076_s2 + $0xe0] sm:$0xff]   ;;  %v3117_v12 = vld [vmem:[%s4076_s2 + $0x168] sm:$0xff]   ;;  %v3474_v13 = vsel %vm566_vm0, 0, %v3414_v51  ;;  %v702_v14 = vrot.slane %v3450_v63, 2  ;;  %v3479_v15 = vsel %vm566_vm0, %v3414_v51, 0  ;;  %v703_v17 = vrot.slane %v3457_v5, 2 }
  0x46   : > { %2632 = vmatpush3.bf16.msra.mxu0 %v3106_v48  ;;  %2872 = vmatpush3.bf16.msra.mxu1 %v3105_v46  ;;  %v3118_v16 = vld [vmem:[%s4076_s2 + $0xe8] sm:$0xff]   ;;  %v3119_v18 = vld [vmem:[%s4076_s2 + $0x130] sm:$0xff]   ;;  %v705_v19 = vrot.slane %v3474_v13, 2  ;;  %v706_v22 = vrot.slane %v3479_v15, 2  ;;  %v653_v24 = vrot.slane %v3450_v63, 1  ;;  %v654_v25 = vrot.slane %v3457_v5, 1 }
  0x47   : > { %2633 = vmatprep.subr.bf16.mxu0 %v3107_v50  ;;  %2873 = vmatprep.subr.bf16.mxu1 %v3108_v52  ;;  %v3120_v21 = vld [vmem:[%s4076_s2 + $0x170] sm:$0xff]   ;;  %v3502_v27 = vsel %vm566_vm0, 0, %v3419_v53  ;;  %v3122_v28 = vld [vmem:[%s4076_s2 + $0x138] sm:$0xff]   ;;  %v3509_v0 = vsel %vm566_vm0, %v3419_v53, 0  ;;  %v486_v29 = vmul.f32 %v482_v20, %v3337_v30  ;;  %v3517_v35 = vsel %vm566_vm0, 0, %v3424_v55  ;;  %v3125_v44 = vld [vmem:[%s4076_s2 + $0x40] sm:$0xff]  }
  0x48   : > { %v3121_v26 = vld [vmem:[%s4076_s2 + $0xf0] sm:$0xff]   ;;  %v3123_v33 = vld [vmem:[%s4076_s2 + $0x178] sm:$0xff]   ;;  %v487_v36 = vmul.f32 %v483_v23, %v3337_v30  ;;  %v708_v38 = vrot.slane %v3502_v27, 2  ;;  %v3528_v39 = vsel %vm566_vm0, %v3424_v55, 0  ;;  %v709_v43 = vrot.slane %v3509_v0, 2  ;;  %v3126_v48 = vld [vmem:[%s4076_s2 + $0x1c0] sm:$0xff]  }
  0x49   : > { %v3124_v42 = vld [vmem:[%s4076_s2 + $0xf8] sm:$0xff]   ;;  %v711_v45 = vrot.slane %v3517_v35, 2  ;;  %v490_v46 = vadd.f32 %v486_v29, %v3339_v34  ;;  %v712_v50 = vrot.slane %v3528_v39, 2  ;;  %v3585_v23 = vsel %vm566_vm0, 0, %v3429_v57  ;;  %v3131_v61 = vld [vmem:[%s4076_s2 + $0x50] sm:$0xff]  }
  0x4a   : > { %2634 = vmatpush3.bf16.msra.mxu0 %v3109_v54  ;;  %2874 = vmatpush3.bf16.msra.mxu1 %v3108_v52  ;;  %v491_v52 = vadd.f32 %v487_v36, %v3339_v34  ;;  %v484_v54 = vunpack.c.l.bf16 %v3317_v1  ;;  %v3597_v59 = vsel %vm689_vm2, %v702_v14, %v703_v17  ;;  %v3138_v14 = vld [vmem:[%s4076_s2 + $0x1d0] sm:$0xff]   ;;  %v3144_v5 = vld [vmem:[%s4076_s2 + $0x1d8] sm:$0xff]  }
  0x4b   : > { %2635 = vmatprep.subr.bf16.mxu0 %v3110_v56  ;;  %2875 = vmatprep.subr.bf16.mxu1 %v3111_v58  ;;  %v3127_v56 = vld [vmem:[%s4076_s2] sm:$0xff]  }
  0x4c   : > { %v488_v20 = vmul.f32 %v484_v54, %v3337_v30 }
  0x4e   : > { %2636 = vmatpush3.bf16.msra.mxu0 %v3112_v60  ;;  %2876 = vmatpush3.bf16.msra.mxu1 %v3111_v58  ;;  %v656_v58 = vrot.slane %v3474_v13, 1  ;;  %v478_v60 = vstv %s3285_s6  ;;  %v492_v29 = vadd.f32 %v488_v20, %v3339_v34  ;;  %v659_v20 = vrot.slane %v3502_v27, 1  ;;  %v3149_v13 = vld [vmem:[%s4076_s2 + $0x1e0] sm:$0xff]  }
  0x4f   : > { %2637 = vmatprep.subr.bf16.mxu0 %v3113_v62  ;;  %2877 = vmatprep.subr.bf16.mxu1 %v3114_v4  ;;  %v485_v62 = vunpack.c.h.bf16 %v3317_v1  ;;  %v494_v1 = vmax.f32 %v490_v46, 0.0  ;;  %vm3565_vm4 = vcmp.ge.s32.totalorder %v478_v60, 0  ;;  %v479_v36 = vadd.s32 1, %v478_v60 }
  0x50   : > { %v3625_v46 = vrot.slane %v3373_v31, 7  ;;  %v3643_v31 = vsel %vm640_vm1, %v653_v24, %v654_v25  ;;  %v3653_v60 = vsel %vm689_vm2, %v708_v38, %v709_v43  ;;  %v3136_v24 = vld [vmem:[%s4076_s2 + $0x18] sm:$0xff]   ;;  %v3137_v38 = vld [vmem:[%s4076_s2 + $0x60] sm:$0xff]  }
  0x51   : > { %vm499_vm5 = vcmp.ge.s32.totalorder %v479_v36, 0  ;;  %v3145_v36 = vld [vmem:[%s4076_s2 + $0x30] sm:$0xff]  }
  0x52   : > { %2638 = vmatpush3.bf16.msra.mxu0 %v3115_v8  ;;  %2878 = vmatpush3.bf16.msra.mxu1 %v3114_v4  ;;  %v3128_v4 = vld [vmem:[%s4076_s2 + $0x180] sm:$0xff]   ;;  %v657_v8 = vrot.slane %v3479_v15, 1  ;;  %v3661_v63 = vsel %vm566_vm0, 0, %v3625_v46 }
  0x53   : > { %2639 = vmatprep.subr.bf16.mxu0 %v3116_v10  ;;  %2879 = vmatprep.subr.bf16.mxu1 %v3117_v12  ;;  %v3560_v10 = vsel %vm689_vm2, %v699_v6, %v700_v7  ;;  %v3578_v6 = vsel %vm640_vm1, %v650_v9, %v651_v11  ;;  %v3132_v7 = vld [vmem:[%s4076_s2 + $0x1c8] sm:$0xff]   ;;  %v3604_v9 = vsel %vm566_vm0, %v3429_v57, 0 }
  0x54   : > { %v3134_v11 = vld [vmem:[%s4076_s2 + $0x188] sm:$0xff]   ;;  %v715_v54 = vrot.slane %v3604_v9, 2 }
  0x56   : > { %2640 = vmatpush3.bf16.msra.mxu0 %v3118_v16  ;;  %2880 = vmatpush3.bf16.msra.mxu1 %v3117_v12  ;;  %v3129_v12 = vld [vmem:[%s4076_s2 + $0x48] sm:$0xff]   ;;  %v495_v16 = vmax.f32 %v491_v52, 0.0  ;;  %v3135_v52 = vld [vmem:[%s4076_s2 + $0x58] sm:$0xff]  }
  0x57   : > { %2641 = vmatprep.subr.bf16.mxu0 %v3119_v18  ;;  %2881 = vmatprep.subr.bf16.mxu1 %v3120_v21  ;;  %v3139_v18 = vld [vmem:[%s4076_s2 + $0x20] sm:$0xff]  }
  0x58   : > { %v505_v17 = vsel %vm3565_vm4, %v495_v16, 0.0  ;;  %v3688_v16 = vsel %vm689_vm2, %v711_v45, %v712_v50  ;;  %v717_v45 = vrot.slane %v3661_v63, 2 }
  0x5a   : > { %2642 = vmatpush3.bf16.msra.mxu0 %v3121_v26  ;;  %2882 = vmatpush3.bf16.msra.mxu1 %v3120_v21  ;;  %v3130_v21 = vld [vmem:[%s4076_s2 + $0x8] sm:$0xff]   ;;  %v489_v26 = vmul.f32 %v485_v62, %v3337_v30 }
  0x5b   : > { %2643 = vmatprep.subr.bf16.mxu0 %v3122_v28  ;;  %2883 = vmatprep.subr.bf16.mxu1 %v3123_v33  ;;  %v504_v28 = vsel %vm3565_vm4, %v494_v1, 0.0  ;;  %v3681_v1 = vsel %vm566_vm0, %v3625_v46, 0 }
  0x5e   : > { %2644 = vmatpush3.bf16.msra.mxu0 %v3124_v42  ;;  %2884 = vmatpush3.bf16.msra.mxu1 %v3123_v33  ;;  %v714_v33 = vrot.slane %v3585_v23, 2  ;;  %v493_v42 = vadd.f32 %v489_v26, %v3339_v34  ;;  %v3142_v26 = vld [vmem:[%s4076_s2 + $0x28] sm:$0xff]  }
  0x5f   : > { %2709 = vmatprep.subr.bf16.mxu1 %v3125_v44  ;;  %2789 = vmatprep.subr.bf16.mxu0 %v3126_v48  ;;  %v3133_v44 = vld [vmem:[%s4076_s2 + $0x10] sm:$0xff]   ;;  %v3632_v48 = vsel %vm689_vm2, %v705_v19, %v706_v22  ;;  %v496_v22 = vmax.f32 %v492_v29, 0.0 }
  0x60   : > { %v3140_v19 = vld [vmem:[%s4076_s2 + $0x190] sm:$0xff]   ;;  %v497_v62 = vmax.f32 %v493_v42, 0.0  ;;  %v3709_v27 = vsel %vm689_vm2, %v714_v33, %v715_v54  ;;  %v662_v42 = vrot.slane %v3517_v35, 1  ;;  %v3152_v35 = vld [vmem:[%s4076_s2 + $0x1a8] sm:$0xff]  }
  0x61   : > { %2360 = vmatmul.mubr.msk.bf16.vlgmr.msra.gmra.mrb[0].mxu0 %vm3521_vm3, %v3375_v32  ;;  %2886 = vmatmul.mubr.bf16.vlgmr.msra.gmra.mrb[0].mxu1 %v3560_v10  ;;  %v506_v43 = vsel %vm499_vm5, %v496_v22, 0.0  ;;  %v663_v22 = vrot.slane %v3528_v39, 1  ;;  %v3153_v39 = vld [vmem:[%s4076_s2 + $0x80] sm:$0xff]  }
  0x62   : > { %2710 = vmatpush3.bf16.msra.mxu1 %v3127_v56  ;;  %2790 = vmatpush3.bf16.msra.mxu0 %v3128_v4  ;;  %v508_v56 = vpack.c.bf16 %v505_v17, %v504_v28  ;;  %v3146_v4 = vld [vmem:[%s4076_s2 + $0x198] sm:$0xff]   ;;  %v3151_v28 = vld [vmem:[%s4076_s2 + $0x1e8] sm:$0xff]  }
  0x63   : > { %2711 = vmatprep.subr.bf16.mxu1 %v3129_v12  ;;  %1019 = vmatprep.mubr.bf16.mxu0 %v3578_v6  ;;  %v507_v12 = vsel %vm499_vm5, %v497_v62, 0.0  ;;  %v3154_v62 = vld [vmem:[%s4076_s2 + $0x1f0] sm:$0xff]  }
  0x64   : > { %2889 = vmatprep.mubr.bf16.mxu1 %v3597_v59  ;;  %2791 = vmatprep.subr.bf16.mxu0 %v3132_v7  ;;  %v3670_v25 = vrot.slane %v508_v56, 7  ;;  %v3702_v7 = vsel %vm640_vm1, %v656_v58, %v657_v8  ;;  %v509_v50 = vpack.c.bf16 %v507_v12, %v506_v43  ;;  %v3150_v8 = vld [vmem:[%s4076_s2 + $0x1a0] sm:$0xff]   ;;  %v3155_v43 = vld [vmem:[%s4076_s2 + $0x1b0] sm:$0xff]   ;;  %v3788_v12 = vsel %vm640_vm1, %v662_v42, %v663_v22 }
  0x66   : > { %2712 = vmatpush3.bf16.msra.mxu1 %v3130_v21  ;;  %2792 = vmatpush3.bf16.msra.mxu0 %v3134_v11  ;;  %v3141_v21 = vld [vmem:[%s4076_s2 + $0x68] sm:$0xff]   ;;  %v3714_v15 = vsel %vm566_vm0, 0, %v3670_v25  ;;  %v3725_v58 = vsel %vm566_vm0, %v3670_v25, 0  ;;  %v660_v11 = vrot.slane %v3509_v0, 1  ;;  %v555_v17 = vrot.slane %v509_v50, 7 }
  0x67   : > { %2713 = vmatprep.subr.bf16.mxu1 %v3131_v61  ;;  %2793 = vmatprep.subr.bf16.mxu0 %v3138_v14  ;;  %v718_v61 = vrot.slane %v3681_v1, 2  ;;  %v3143_v14 = vld [vmem:[%s4076_s2 + $0x70] sm:$0xff]   ;;  %v641_v29 = vrot.slane %v3714_v15, 1  ;;  %v642_v33 = vrot.slane %v3725_v58, 1  ;;  %v665_v50 = vrot.slane %v3585_v23, 1  ;;  %v3161_v23 = vld [vmem:[%s4076_s2 + $0x98] sm:$0xff]  }
  0x68   : > { %v3755_v54 = vsel %vm566_vm0, 0, %v555_v17 }
  0x69   : > { %2362 = vmatmul.mubr.msk.bf16.gmra.mrb[4].mxu0 %vm3521_vm3, %v3404_v47  ;;  %2890 = vmatmul.mubr.bf16.gmra.mrb[4].mxu1 %v3632_v48  ;;  %v3742_v0 = vsel %vm689_vm2, %v717_v45, %v718_v61  ;;  %v643_v56 = vsel %vm640_vm1, %v641_v29, %v642_v33  ;;  %v3806_v45 = vld [vmem:[%s4076_s2 + $0x200] sm:$0xff]   ;;  %v517_v29 = vunpack.c.h.bf16 %v3324_v3  ;;  %v3917_v33 = vld [vmem:[%s4076_s2 + $0x228] sm:$0xff]  }
  0x6a   : > { %2714 = vmatpush3.bf16.msra.mxu1 %v3133_v44  ;;  %1027 = vmatprep.mubr.bf16.mxu0 %v3643_v31  ;;  %v3147_v44 = vld [vmem:[%s4076_s2 + $0x78] sm:$0xff]  }
  0x6b   : > { %2715 = vmatprep.subr.bf16.mxu1 %v3135_v52  ;;  %2893 = vmatprep.mubr.bf16.mxu1 %v3653_v60  ;;  %v3752_v52 = vsel %vm640_vm1, %v659_v20, %v660_v11  ;;  %v3157_v20 = vld [vmem:[%s4076_s2 + $0x1f8] sm:$0xff]  }
  0x6c   : > { %2794 = vmatpush3.bf16.msra.mxu0 %v3140_v19  ;;  %v3759_v19 = vsel %vm566_vm0, %v555_v17, 0 }
  0x6d   : > { %2795 = vmatprep.subr.bf16.mxu0 %v3144_v5  ;;  %v3148_v5 = vld [vmem:[%s4076_s2 + $0x38] sm:$0xff]  }
  0x6e   : > { %2716 = vmatpush3.bf16.msra.mxu1 %v3136_v24  ;;  %v644_v24 = vrot.slane %v3755_v54, 1 }
  0x6f   : > { %2717 = vmatprep.subr.bf16.mxu1 %v3137_v38  ;;  %v645_v38 = vrot.slane %v3759_v19, 1 }
  0x70   : > { %2796 = vmatpush3.bf16.msra.mxu0 %v3146_v4  ;;  %v3156_v4 = vld [vmem:[%s4076_s2 + $0x88] sm:$0xff]  }
  0x71   : > { %2364 = vmatmul.mubr.msk.bf16.gmra.mrb[8].mxu0 %vm3521_vm3, %v3409_v49  ;;  %2894 = vmatmul.mubr.bf16.gmra.mrb[8].mxu1 %v3688_v16 }
  0x72   : > { %2718 = vmatpush3.bf16.msra.mxu1 %v3139_v18  ;;  %1035 = vmatprep.mubr.bf16.mxu0 %v3702_v7  ;;  %v646_v18 = vsel %vm640_vm1, %v644_v24, %v645_v38  ;;  %v3172_v24 = vld [vmem:[%s4076_s2 + $0x238] sm:$0xff]   ;;  %v693_v38 = vrot.slane %v3755_v54, 2 }
  0x73   : > { %2719 = vmatprep.subr.bf16.mxu1 %v3141_v21  ;;  %2897 = vmatprep.mubr.bf16.mxu1 %v3709_v27  ;;  %v3158_v21 = vld [vmem:[%s4076_s2 + $0x1b8] sm:$0xff]  }
  0x74   : > { %2797 = vmatprep.subr.bf16.mxu0 %v3149_v13  ;;  %v669_v13 = vrot.slane %v3681_v1, 1 }
  0x75   : > { %2798 = vmatpush3.bf16.msra.mxu0 %v3150_v8  ;;  %v3163_v8 = vld [vmem:[%s4076_s2 + $0xa0] sm:$0xff]  }
  0x76   : > { %2720 = vmatpush3.bf16.msra.mxu1 %v3142_v26  ;;  %2799 = vmatprep.subr.bf16.mxu0 %v3151_v28  ;;  %v666_v26 = vrot.slane %v3604_v9, 1  ;;  %v668_v9 = vrot.slane %v3661_v63, 1  ;;  %v3165_v28 = vld [vmem:[%s4076_s2 + $0xa8] sm:$0xff]   ;;  %v3168_v63 = vld [vmem:[%s4076_s2 + $0xb8] sm:$0xff]  }
  0x77   : > { %2721 = vmatprep.subr.bf16.mxu1 %v3143_v14 }
  0x78   : > { %v3816_v61 = vsel %vm640_vm1, %v665_v50, %v666_v26  ;;  %v3834_v11 = vsel %vm640_vm1, %v668_v9, %v669_v13 }
  0x79   : > { %2366 = vmatmul.mubr.msk.bf16.gmra.mrb[12].mxu0 %vm3521_vm3, %v3414_v51  ;;  %2898 = vmatmul.mubr.bf16.gmra.mrb[12].mxu1 %v3742_v0 }
  0x7a   : > { %2722 = vmatpush3.bf16.msra.mxu1 %v3145_v36  ;;  %1043 = vmatprep.mubr.bf16.mxu0 %v3752_v52  ;;  %v510_v36 = vstv %s3301_s17 }
  0x7b   : > { %2723 = vmatprep.subr.bf16.mxu1 %v3147_v44  ;;  %1349 = vmatprep.mubr.bf16.mxu1 %v643_v56  ;;  %v690_v56 = vrot.slane %v3714_v15, 2  ;;  %vm530_vm6 = vcmp.lt.s32.totalorder %v510_v36, 16 }
  0x7c   : > { %2800 = vmatpush3.bf16.msra.mxu0 %v3152_v35  ;;  %v691_v35 = vrot.slane %v3725_v58, 2  ;;  %v511_v58 = vadd.s32 1, %v510_v36 }
  0x7d   : > { %2801 = vmatprep.subr.bf16.mxu0 %v3154_v62 }
  0x7e   : > { %2724 = vmatpush3.bf16.msra.mxu1 %v3148_v5  ;;  %v692_v15 = vsel %vm689_vm2, %v690_v56, %v691_v35  ;;  %vm531_vm7 = vcmp.lt.s32.totalorder %v511_v58, 16 }
  0x7f   : > { %2901 = vmatprep.subr.bf16.mxu1 %v3153_v39 }
  0x80   : > { %2802 = vmatpush3.bf16.msra.mxu0 %v3155_v43 }
  0x81   : > { %2368 = vmatmul.mubr.msk.bf16.gmra.mrb[16].mxu0 %vm3521_vm3, %v3419_v53  ;;  %2400 = vmatmul.mubr.msk.bf16.vlgmr.msra.gmra.mrb[16].mxu1 %vm3521_vm3, %v3670_v25  ;;  %v3159_v25 = vld [vmem:[%s4076_s2 + $0x90] sm:$0xff]  }
  0x82   : > { %1051 = vmatprep.mubr.bf16.mxu0 %v3788_v12  ;;  %1357 = vmatprep.mubr.bf16.mxu1 %v646_v18 }
  0x83   : > { %2902 = vmatpush3.bf16.msra.mxu1 %v3153_v39  ;;  %2803 = vmatprep.subr.bf16.mxu0 %v3157_v20  ;;  %v694_v39 = vrot.slane %v3759_v19, 2 }
  0x84   : > { %2903 = vmatprep.subr.bf16.mxu1 %v3156_v4  ;;  %2804 = vmatpush3.bf16.msra.mxu0 %v3158_v21 }
  0x85   : > { %2933 = vmatprep.subr.bf16.mxu0 %v3806_v45  ;;  %v695_v18 = vsel %vm689_vm2, %v693_v38, %v694_v39 }
  0x87   : > { %2904 = vmatpush3.bf16.msra.mxu1 %v3156_v4 }
  0x88   : > { %2905 = vmatprep.subr.bf16.mxu1 %v3159_v25 }
  0x89   : > { %2370 = vmatmul.mubr.msk.bf16.gmra.mrb[20].mxu0 %vm3521_vm3, %v3424_v55  ;;  %2402 = vmatmul.mubr.msk.bf16.gmra.mrb[20].mxu1 %vm3521_vm3, %v555_v17  ;;  %v516_v17 = vunpack.c.l.bf16 %v3324_v3 }
  0x8a   : > { %1059 = vmatprep.mubr.bf16.mxu0 %v3816_v61  ;;  %1365 = vmatprep.mubr.bf16.mxu1 %v3382_v40  ;;  %v3166_v40 = vld [vmem:[%s4076_s2 + $0xb0] sm:$0xff]  }
  0x8b   : > { %2906 = vmatpush3.bf16.msra.mxu1 %v3159_v25  ;;  %v520_v44 = vmul.f32 %v516_v17, %v3337_v30 }
  0x8c   : > { %2907 = vmatprep.subr.bf16.mxu1 %v3161_v23 }
  0x8d   : > { %v524_v5 = vadd.f32 %v520_v44, %v3339_v34 }
  0x8f   : > { %2908 = vmatpush3.bf16.msra.mxu1 %v3161_v23  ;;  %v528_v43 = vmax.f32 %v524_v5, 0.0 }
  0x90   : > { %2909 = vmatprep.subr.bf16.mxu1 %v3163_v8 }
  0x91   : > { %2372 = vmatmul.mubr.msk.bf16.gmra.mrb[24].mxu0 %vm3521_vm3, %v3429_v57  ;;  %2404 = vmatmul.mubr.msk.bf16.gmra.mrb[24].mxu1 %vm3521_vm3, %v3375_v32  ;;  %v3864_v32 = vld [vmem:[%s4076_s2 + $0x208] sm:$0xff]   ;;  %v538_v20 = vsel %vm531_vm7, %v528_v43, 0.0 }
  0x92   : > { %1067 = vmatprep.mubr.bf16.mxu0 %v3834_v11  ;;  %1373 = vmatprep.mubr.bf16.mxu1 %v3578_v6  ;;  %v514_v6 = vunpack.c.l.bf16 %v3322_v2 }
  0x93   : > { %2910 = vmatpush3.bf16.msra.mxu1 %v3163_v8 }
  0x94   : > { %2911 = vmatprep.subr.bf16.mxu1 %v3165_v28 }
  0x97   : > { %2912 = vmatpush3.bf16.msra.mxu1 %v3165_v28 }
  0x98   : > { %2913 = vmatprep.subr.bf16.mxu1 %v3166_v40 }
  0x99   : > { %2374 = vmatmul.mubr.msk.bf16.gmra.mrb[28].mxu0 %vm3521_vm3, %v3625_v46  ;;  %2406 = vmatmul.mubr.msk.bf16.gmra.mrb[28].mxu1 %vm3521_vm3, %v3404_v47  ;;  %v3880_v47 = vld [vmem:[%s4076_s2 + $0x210] sm:$0xff]  }
  0x9a   : > { %1381 = vmatprep.mubr.bf16.mxu1 %v3643_v31  ;;  %1736 = vmatprep.mubr.bf16.mxu0 %v3643_v31  ;;  %v515_v31 = vunpack.c.h.bf16 %v3322_v2  ;;  %v518_v2 = vmul.f32 %v514_v6, %v3337_v30 }
  0x9b   : > { %2914 = vmatpush3.bf16.msra.mxu1 %v3166_v40 }
  0x9c   : > { %2915 = vmatprep.subr.bf16.mxu1 %v3168_v63  ;;  %v519_v1 = vmul.f32 %v515_v31, %v3337_v30  ;;  %v522_v14 = vadd.f32 %v518_v2, %v3339_v34 }
  0x9e   : > { %v526_v3 = vmax.f32 %v522_v14, 0.0 }
  0x9f   : > { %2916 = vmatpush3.bf16.msra.mxu1 %v3168_v63 }
  0xa0   : > { %2965 = vmatprep.subr.bf16.mxu1 %v3806_v45  ;;  %v536_v22 = vsel %vm530_vm6, %v526_v3, 0.0 }
  0xa1   : > { %2408 = vmatmul.mubr.msk.bf16.gmra.mrb[32].mxu1 %vm3521_vm3, %v3409_v49  ;;  %2488 = vmatmul.mubr.msk.bf16.vlgmr.msra.gmra.mrb[32].mxu0 %vm3521_vm3, %v3409_v49  ;;  %v3889_v49 = vld [vmem:[%s4076_s2 + $0x218] sm:$0xff]  }
  0xa2   : > { %2934 = vmatpush3.bf16.msra.mxu0 %v3806_v45  ;;  %1389 = vmatprep.mubr.bf16.mxu1 %v3702_v7 }
  0xa3   : > { %1744 = vmatprep.mubr.bf16.mxu0 %v3702_v7  ;;  %2935 = vmatprep.subr.bf16.mxu0 %v3864_v32  ;;  %v3906_v7 = vld [vmem:[%s4076_s2 + $0x220] sm:$0xff]  }
  0xa6   : > { %2936 = vmatpush3.bf16.msra.mxu0 %v3864_v32 }
  0xa7   : > { %2937 = vmatprep.subr.bf16.mxu0 %v3880_v47 }
  0xa9   : > { %2410 = vmatmul.mubr.msk.bf16.gmra.mrb[36].mxu1 %vm3521_vm3, %v3414_v51  ;;  %2490 = vmatmul.mubr.msk.bf16.gmra.mrb[36].mxu0 %vm3521_vm3, %v3414_v51  ;;  %v523_v51 = vadd.f32 %v519_v1, %v3339_v34 }
  0xaa   : > { %1397 = vmatprep.mubr.bf16.mxu1 %v3752_v52  ;;  %1752 = vmatprep.mubr.bf16.mxu0 %v3752_v52  ;;  %v521_v52 = vmul.f32 %v517_v29, %v3337_v30 }
  0xab   : > { %2938 = vmatpush3.bf16.msra.mxu0 %v3880_v47  ;;  %v527_v42 = vmax.f32 %v523_v51, 0.0 }
  0xac   : > { %2939 = vmatprep.subr.bf16.mxu0 %v3889_v49  ;;  %v525_v30 = vadd.f32 %v521_v52, %v3339_v34 }
  0xad   : > { %v537_v62 = vsel %vm530_vm6, %v527_v42, 0.0 }
  0xae   : > { %v540_v34 = vpack.c.bf16 %v537_v62, %v536_v22  ;;  %v529_v4 = vmax.f32 %v525_v30, 0.0 }
  0xaf   : > { %2940 = vmatpush3.bf16.msra.mxu0 %v3889_v49 }
  0xb0   : > { %2941 = vmatprep.subr.bf16.mxu0 %v3906_v7  ;;  %v539_v21 = vsel %vm531_vm7, %v529_v4, 0.0 }
  0xb1   : > { %2412 = vmatmul.mubr.msk.bf16.gmra.mrb[40].mxu1 %vm3521_vm3, %v3419_v53  ;;  %2492 = vmatmul.mubr.msk.bf16.gmra.mrb[40].mxu0 %vm3521_vm3, %v3419_v53  ;;  %v3937_v53 = vld [vmem:[%s4076_s2 + $0x230] sm:$0xff]   ;;  %v541_v19 = vpack.c.bf16 %v539_v21, %v538_v20 }
  0xb2   : > { %1405 = vmatprep.mubr.bf16.mxu1 %v3788_v12  ;;  %1760 = vmatprep.mubr.bf16.mxu0 %v3788_v12  ;;  %v564_v12 = vrot.slane %v540_v34, 7 }
  0xb3   : > { %2942 = vmatpush3.bf16.msra.mxu0 %v3906_v7  ;;  %v565_v25 = vrot.slane %v541_v19, 7 }
  0xb4   : > { %2943 = vmatprep.subr.bf16.mxu0 %v3917_v33  ;;  %v614_v54 = vsel %vm566_vm0, %v564_v12, 0 }
  0xb5   : > { %v672_v26 = vrot.slane %v614_v54, 1  ;;  %v721_v9 = vrot.slane %v614_v54, 2 }
  0xb7   : > { %2944 = vmatpush3.bf16.msra.mxu0 %v3917_v33 }
  0xb8   : > { %2945 = vmatprep.subr.bf16.mxu0 %v3937_v53 }
  0xb9   : > { %2414 = vmatmul.mubr.msk.bf16.gmra.mrb[44].mxu1 %vm3521_vm3, %v3424_v55  ;;  %2494 = vmatmul.mubr.msk.bf16.gmra.mrb[44].mxu0 %vm3521_vm3, %v3424_v55  ;;  %v599_v55 = vsel %vm566_vm0, 0, %v564_v12 }
  0xba   : > { %2917 = vmatprep.mubr.bf16.mxu1 %v692_v15  ;;  %1768 = vmatprep.mubr.bf16.mxu0 %v3816_v61  ;;  %v671_v50 = vrot.slane %v599_v55, 1 }
  0xbb   : > { %2946 = vmatpush3.bf16.msra.mxu0 %v3937_v53 }
  0xbc   : > { %2947 = vmatprep.subr.bf16.mxu0 %v3172_v24 }
  0xbf   : > { %2948 = vmatpush3.bf16.msra.mxu0 %v3172_v24 }
  0xc1   : > { %2918 = vmatmul.mubr.bf16.vlgmr.msra.gmra.mrb[0].mxu1 %v695_v18  ;;  %2496 = vmatmul.mubr.msk.bf16.gmra.mrb[48].mxu0 %vm3521_vm3, %v3429_v57  ;;  %v673_v57 = vsel %vm640_vm1, %v671_v50, %v672_v26 }
  0xc2   : > { %2973 = vmatpush3.bf16.msra.mxu1 %v3806_v45  ;;  %2921 = vmatprep.mubr.bf16.mxu1 %v3385_v41  ;;  %v602_v41 = vsel %vm566_vm0, 0, %v565_v25  ;;  %v615_v45 = vsel %vm566_vm0, %v565_v25, 0 }
  0xc3   : > { %2966 = vmatprep.subr.bf16.mxu1 %v3864_v32  ;;  %1776 = vmatprep.mubr.bf16.mxu0 %v3834_v11  ;;  %v674_v61 = vrot.slane %v602_v41, 1  ;;  %v675_v23 = vrot.slane %v615_v45, 1  ;;  %v723_v37 = vrot.slane %v602_v41, 2  ;;  %v724_v8 = vrot.slane %v615_v45, 2 }
  0xc5   : > { %v725_v11 = vsel %vm689_vm2, %v723_v37, %v724_v8 }
  0xc6   : > { %2974 = vmatpush3.bf16.msra.mxu1 %v3864_v32 }
  0xc7   : > { %2967 = vmatprep.subr.bf16.mxu1 %v3880_v47 }
  0xc9   : > { %2922 = vmatmul.mubr.bf16.gmra.mrb[4].mxu1 %v3560_v10  ;;  %2498 = vmatmul.mubr.msk.bf16.gmra.mrb[52].mxu0 %vm3521_vm3, %v3625_v46  ;;  %v676_v10 = vsel %vm640_vm1, %v674_v61, %v675_v23  ;;  %v720_v46 = vrot.slane %v599_v55, 2 }
  0xca   : > { %2975 = vmatpush3.bf16.msra.mxu1 %v3880_v47  ;;  %2925 = vmatprep.mubr.bf16.mxu1 %v3597_v59 }
  0xcb   : > { %2968 = vmatprep.subr.bf16.mxu1 %v3889_v49  ;;  %1784 = vmatprep.mubr.bf16.mxu0 %v673_v57  ;;  %v722_v13 = vsel %vm689_vm2, %v720_v46, %v721_v9 }
  0xce   : > { %2976 = vmatpush3.bf16.msra.mxu1 %v3889_v49 }
  0xcf   : > { %2969 = vmatprep.subr.bf16.mxu1 %v3906_v7 }
  0xd1   : > { %2926 = vmatmul.mubr.bf16.gmra.mrb[8].mxu1 %v3632_v48  ;;  %2500 = vmatmul.mubr.msk.bf16.gmra.mrb[56].mxu0 %vm3521_vm3, %v564_v12 }
  0xd2   : > { %2977 = vmatpush3.bf16.msra.mxu1 %v3906_v7  ;;  %2929 = vmatprep.mubr.bf16.mxu1 %v3653_v60 }
  0xd3   : > { %2970 = vmatprep.subr.bf16.mxu1 %v3917_v33  ;;  %1792 = vmatprep.mubr.bf16.mxu0 %v676_v10 }
  0xd6   : > { %2978 = vmatpush3.bf16.msra.mxu1 %v3917_v33 }
  0xd7   : > { %2971 = vmatprep.subr.bf16.mxu1 %v3937_v53 }
  0xd9   : > { %2930 = vmatmul.mubr.bf16.gmra.mrb[12].mxu1 %v3688_v16  ;;  %2502 = vmatmul.mubr.msk.bf16.gmra.mrb[60].mxu0 %vm3521_vm3, %v565_v25 }
  0xda   : > { %2979 = vmatpush3.bf16.msra.mxu1 %v3937_v53  ;;  %2949 = vmatprep.mubr.bf16.mxu0 %v3597_v59 }
  0xdb   : > { %2972 = vmatprep.subr.bf16.mxu1 %v3172_v24  ;;  %2957 = vmatprep.mubr.bf16.mxu1 %v3709_v27 }
  0xde   : > { %2980 = vmatpush3.bf16.msra.mxu1 %v3172_v24 }
  0xe1   : > { %2950 = vmatmul.mubr.bf16.vlgmr.msra.gmra.mrb[64].mxu0 %v3632_v48  ;;  %2958 = vmatmul.mubr.bf16.vlgmr.msra.gmra.mrb[8].mxu1 %v3742_v0 }
  0xe2   : > { %2953 = vmatprep.mubr.bf16.mxu0 %v3653_v60  ;;  %2961 = vmatprep.mubr.bf16.mxu1 %v722_v13 }
  0xe9   : > { %2954 = vmatmul.mubr.bf16.gmra.mrb[68].mxu0 %v3688_v16  ;;  %2962 = vmatmul.mubr.bf16.gmra.mrb[12].mxu1 %v725_v11 }
 0x134   : > { %v2645_v59 = vpop.f32.mrb[0].mxu0 }
 0x135   : > { %v2646_v27 = vpop.f32.mrb[1].mxu0 }
 0x136   : > { %v2647_v28 = vadd.f32 %v2646_v27, %v2645_v59  ;;  %v2648_v40 = vpop.f32.mrb[2].mxu0 }
 0x137   : > { %v2649_v63 = vpop.f32.mrb[3].mxu0 }
 0x138   : > { %v2650_v32 = vadd.f32 %v2649_v63, %v2648_v40 }
 0x13c   : > { %v2651_v47 = vpop.f32.mrb[4].mxu0 }
 0x13d   : > { %v2652_v48 = vpop.f32.mrb[5].mxu0 }
 0x13e   : > { %v2653_v6 = vadd.f32 %v2652_v48, %v2651_v47  ;;  %v2654_v0 = vpop.f32.mrb[6].mxu0 }
 0x13f   : > { %v2655_v31 = vpop.f32.mrb[7].mxu0 }
 0x140   : > { %v2656_v60 = vadd.f32 %v2655_v31, %v2654_v0 }
 0x144   : > { %v2657_v49 = vpop.f32.mrb[8].mxu0 }
 0x145   : > { %v2658_v2 = vpop.f32.mrb[9].mxu0 }
 0x146   : > { %v2659_v1 = vadd.f32 %v2658_v2, %v2657_v49  ;;  %v2660_v7 = vpop.f32.mrb[10].mxu0 }
 0x147   : > { %v2661_v14 = vpop.f32.mrb[11].mxu0 }
 0x148   : > { %v2662_v51 = vadd.f32 %v2661_v14, %v2660_v7 }
 0x14c   : > { %v2663_v16 = vpop.f32.mrb[12].mxu0 }
 0x14d   : > { %v2664_v17 = vpop.f32.mrb[13].mxu0 }
 0x14e   : > { %v2665_v29 = vadd.f32 %v2664_v17, %v2663_v16  ;;  %v2666_v33 = vpop.f32.mrb[14].mxu0 }
 0x14f   : > { %v2667_v36 = vpop.f32.mrb[15].mxu0 }
 0x150   : > { %v2668_v3 = vadd.f32 %v2667_v36, %v2666_v33 }
 0x154   : > { %v2669_v42 = vpop.f32.mrb[16].mxu0  ;;  %v2725_v44 = vpop.f32.mrb[16].mxu1 }
 0x155   : > { %v2670_v52 = vpop.f32.mrb[17].mxu0  ;;  %v2726_v56 = vpop.f32.mrb[17].mxu1 }
 0x156   : > { %v2671_v35 = vadd.f32 %v2670_v52, %v2669_v42  ;;  %v2727_v53 = vadd.f32 %v2726_v56, %v2725_v44  ;;  %v2672_v22 = vpop.f32.mrb[18].mxu0  ;;  %v2728_v62 = vpop.f32.mrb[18].mxu1 }
 0x157   : > { %v2673_v5 = vpop.f32.mrb[19].mxu0  ;;  %v2729_v30 = vpop.f32.mrb[19].mxu1 }
 0x158   : > { %v2674_v15 = vadd.f32 %v2673_v5, %v2672_v22  ;;  %v2730_v58 = vadd.f32 %v2729_v30, %v2728_v62  ;;  %v4002_v24 = vadd.f32 %v2727_v53, %v2647_v28 }
 0x15a   : > { %v4004_v34 = vadd.f32 %v2730_v58, %v2650_v32 }
 0x15c   : > { %v2675_v38 = vpop.f32.mrb[20].mxu0  ;;  %v2731_v39 = vpop.f32.mrb[20].mxu1 }
 0x15d   : > { %v2676_v43 = vpop.f32.mrb[21].mxu0  ;;  %v2732_v4 = vpop.f32.mrb[21].mxu1 }
 0x15e   : > { %v2677_v12 = vadd.f32 %v2676_v43, %v2675_v38  ;;  %v2733_v18 = vadd.f32 %v2732_v4, %v2731_v39  ;;  %v2678_v20 = vpop.f32.mrb[22].mxu0  ;;  %v2734_v21 = vpop.f32.mrb[22].mxu1 }
 0x15f   : > { %v2679_v55 = vpop.f32.mrb[23].mxu0  ;;  %v2735_v54 = vpop.f32.mrb[23].mxu1 }
 0x160   : > { %v2680_v19 = vadd.f32 %v2679_v55, %v2678_v20  ;;  %v2736_v50 = vadd.f32 %v2735_v54, %v2734_v21  ;;  %v4006_v26 = vadd.f32 %v2733_v18, %v2653_v6 }
 0x162   : > { %v4008_v25 = vadd.f32 %v2736_v50, %v2656_v60 }
 0x164   : > { %v2681_v57 = vpop.f32.mrb[24].mxu0  ;;  %v2737_v41 = vpop.f32.mrb[24].mxu1 }
 0x165   : > { %v2682_v45 = vpop.f32.mrb[25].mxu0  ;;  %v2738_v61 = vpop.f32.mrb[25].mxu1 }
 0x166   : > { %v2683_v23 = vadd.f32 %v2682_v45, %v2681_v57  ;;  %v2739_v10 = vadd.f32 %v2738_v61, %v2737_v41  ;;  %v2684_v46 = vpop.f32.mrb[26].mxu0  ;;  %v2740_v9 = vpop.f32.mrb[26].mxu1 }
 0x167   : > { %v2685_v13 = vpop.f32.mrb[27].mxu0  ;;  %v2741_v37 = vpop.f32.mrb[27].mxu1 }
 0x168   : > { %v2686_v8 = vadd.f32 %v2685_v13, %v2684_v46  ;;  %v2742_v11 = vadd.f32 %v2741_v37, %v2740_v9  ;;  %v4010_v59 = vadd.f32 %v2739_v10, %v2659_v1 }
 0x16a   : > { %v4012_v27 = vadd.f32 %v2742_v11, %v2662_v51 }
 0x16c   : > { %v2687_v28 = vpop.f32.mrb[28].mxu0  ;;  %v2743_v40 = vpop.f32.mrb[28].mxu1 }
 0x16d   : > { %v2688_v63 = vpop.f32.mrb[29].mxu0  ;;  %v2744_v32 = vpop.f32.mrb[29].mxu1 }
 0x16e   : > { %v2689_v47 = vadd.f32 %v2688_v63, %v2687_v28  ;;  %v2745_v48 = vadd.f32 %v2744_v32, %v2743_v40  ;;  %v2690_v6 = vpop.f32.mrb[30].mxu0  ;;  %v2746_v0 = vpop.f32.mrb[30].mxu1 }
 0x16f   : > { %v2691_v31 = vpop.f32.mrb[31].mxu0  ;;  %v2747_v60 = vpop.f32.mrb[31].mxu1 }
 0x170   : > { %v2692_v49 = vadd.f32 %v2691_v31, %v2690_v6  ;;  %v2748_v2 = vadd.f32 %v2747_v60, %v2746_v0  ;;  %v4014_v7 = vadd.f32 %v2745_v48, %v2665_v29 }
 0x172   : > { %v4016_v14 = vadd.f32 %v2748_v2, %v2668_v3 }
 0x174   : > { %v2749_v1 = vpop.f32.mrb[32].mxu1  ;;  %v2805_v16 = vpop.f32.mrb[32].mxu0 }
 0x175   : > { %v2750_v51 = vpop.f32.mrb[33].mxu1  ;;  %v2806_v17 = vpop.f32.mrb[33].mxu0 }
 0x176   : > { %v2751_v33 = vadd.f32 %v2750_v51, %v2749_v1  ;;  %v4018_v36 = vadd.f32 %v2806_v17, %v2805_v16  ;;  %v2752_v42 = vpop.f32.mrb[34].mxu1  ;;  %v2808_v44 = vpop.f32.mrb[34].mxu0 }
 0x177   : > { %v2753_v52 = vpop.f32.mrb[35].mxu1  ;;  %v2809_v56 = vpop.f32.mrb[35].mxu0 }
 0x178   : > { %v3016_v53 = vadd.f32 %v2751_v33, %v2671_v35  ;;  %v2754_v22 = vadd.f32 %v2753_v52, %v2752_v42  ;;  %v2810_v62 = vadd.f32 %v2809_v56, %v2808_v44 }
 0x17a   : > { %v3022_v5 = vadd.f32 %v2754_v22, %v2674_v15 }
 0x17c   : > { %v2755_v30 = vpop.f32.mrb[36].mxu1  ;;  %v2811_v29 = vpop.f32.mrb[36].mxu0 }
 0x17d   : > { %v2756_v58 = vpop.f32.mrb[37].mxu1  ;;  %v2812_v3 = vpop.f32.mrb[37].mxu0 }
 0x17e   : > { %v2757_v38 = vadd.f32 %v2756_v58, %v2755_v30  ;;  %v2813_v39 = vadd.f32 %v2812_v3, %v2811_v29  ;;  %v2758_v43 = vpop.f32.mrb[38].mxu1  ;;  %v2814_v4 = vpop.f32.mrb[38].mxu0 }
 0x17f   : > { %v2759_v18 = vpop.f32.mrb[39].mxu1  ;;  %v2815_v20 = vpop.f32.mrb[39].mxu0 }
 0x180   : > { %v4020_v21 = vadd.f32 %v2757_v38, %v2677_v12  ;;  %v2760_v55 = vadd.f32 %v2759_v18, %v2758_v43  ;;  %v2816_v54 = vadd.f32 %v2815_v20, %v2814_v4 }
 0x182   : > { %v4022_v50 = vadd.f32 %v2760_v55, %v2680_v19 }
 0x184   : > { %v2761_v35 = vpop.f32.mrb[40].mxu1  ;;  %v2817_v57 = vpop.f32.mrb[40].mxu0 }
 0x185   : > { %v2762_v41 = vpop.f32.mrb[41].mxu1  ;;  %v2818_v15 = vpop.f32.mrb[41].mxu0 }
 0x186   : > { %v2763_v45 = vadd.f32 %v2762_v41, %v2761_v35  ;;  %v2819_v61 = vadd.f32 %v2818_v15, %v2817_v57  ;;  %v2764_v10 = vpop.f32.mrb[42].mxu1  ;;  %v2820_v46 = vpop.f32.mrb[42].mxu0 }
 0x187   : > { %v2765_v9 = vpop.f32.mrb[43].mxu1  ;;  %v2821_v13 = vpop.f32.mrb[43].mxu0 }
 0x188   : > { %v4024_v37 = vadd.f32 %v2763_v45, %v2683_v23  ;;  %v2766_v11 = vadd.f32 %v2765_v9, %v2764_v10  ;;  %v2822_v28 = vadd.f32 %v2821_v13, %v2820_v46 }
 0x18a   : > { %v3034_v12 = vadd.f32 %v2766_v11, %v2686_v8 }
 0x18c   : > { %v2767_v40 = vpop.f32.mrb[44].mxu1  ;;  %v2823_v63 = vpop.f32.mrb[44].mxu0 }
 0x18d   : > { %v2768_v32 = vpop.f32.mrb[45].mxu1  ;;  %v2824_v19 = vpop.f32.mrb[45].mxu0 }
 0x18e   : > { %v2769_v48 = vadd.f32 %v2768_v32, %v2767_v40  ;;  %v2825_v6 = vadd.f32 %v2824_v19, %v2823_v63  ;;  %v2770_v0 = vpop.f32.mrb[46].mxu1  ;;  %v2826_v31 = vpop.f32.mrb[46].mxu0 }
 0x18f   : > { %v2771_v60 = vpop.f32.mrb[47].mxu1  ;;  %v2827_v2 = vpop.f32.mrb[47].mxu0 }
 0x190   : > { %v3025_v1 = vadd.f32 %v2769_v48, %v2689_v47  ;;  %v2772_v16 = vadd.f32 %v2771_v60, %v2770_v0  ;;  %v2828_v51 = vadd.f32 %v2827_v2, %v2826_v31 }
 0x192   : > { %v3031_v17 = vadd.f32 %v2772_v16, %v2692_v49 }
 0x194   : > { %v2919_v33 = vpop.f32.mrb[0].mxu1  ;;  %v2829_v23 = vpop.f32.mrb[48].mxu0 }
 0x195   : > { %v2982_v42 = vadd.f32 %v4006_v26, %v2919_v33  ;;  %v1448_v44 = vpop.f32.mrb[1].mxu1  ;;  %v2830_v8 = vpop.f32.mrb[49].mxu0 }
 0x196   : > { %v2986_v52 = vadd.f32 %v4002_v24, %v1448_v44  ;;  %v2831_v56 = vadd.f32 %v2830_v8, %v2829_v23  ;;  %v2920_v22 = vpop.f32.mrb[2].mxu1  ;;  %v2832_v30 = vpop.f32.mrb[50].mxu0 }
 0x197   : > { %v2990_v29 = vadd.f32 %v4008_v25, %v2920_v22  ;;  %v1451_v58 = vpop.f32.mrb[3].mxu1  ;;  %v2833_v3 = vpop.f32.mrb[51].mxu0  ;;  %v2983_v38 = vadd.f32 %v2982_v42, %v2813_v39 }
 0x198   : > { %v2994_v47 = vadd.f32 %v4004_v34, %v1451_v58  ;;  %v2834_v43 = vadd.f32 %v2833_v3, %v2832_v30  ;;  %v2987_v49 = vadd.f32 %v2986_v52, %v4018_v36  ;;  %v3017_v4 = vadd.f32 %v3016_v53, %v2831_v56 }
 0x199   : > { %v2991_v18 = vadd.f32 %v2990_v29, %v2816_v54 }
 0x19a   : > { %v2995_v26 = vadd.f32 %v2994_v47, %v2810_v62  ;;  %v3023_v20 = vadd.f32 %v3022_v5, %v2834_v43 }
 0x19c   : > { %v2923_v55 = vpop.f32.mrb[4].mxu1  ;;  %v2835_v35 = vpop.f32.mrb[52].mxu0 }
 0x19d   : > { %v2998_v24 = vadd.f32 %v4014_v7, %v2923_v55  ;;  %v1464_v57 = vpop.f32.mrb[5].mxu1  ;;  %v2836_v41 = vpop.f32.mrb[53].mxu0 }
 0x19e   : > { %v3002_v25 = vadd.f32 %v4010_v59, %v1464_v57  ;;  %v2837_v15 = vadd.f32 %v2836_v41, %v2835_v35  ;;  %v2924_v45 = vpop.f32.mrb[6].mxu1  ;;  %v2838_v39 = vpop.f32.mrb[54].mxu0 }
 0x19f   : > { %v3006_v34 = vadd.f32 %v4016_v14, %v2924_v45  ;;  %v1467_v10 = vpop.f32.mrb[7].mxu1  ;;  %v2839_v46 = vpop.f32.mrb[55].mxu0  ;;  %v2999_v36 = vadd.f32 %v2998_v24, %v2825_v6 }
 0x1a0   : > { %v3010_v53 = vadd.f32 %v4012_v27, %v1467_v10  ;;  %v2840_v62 = vadd.f32 %v2839_v46, %v2838_v39  ;;  %v3014_v5 = vadd.f32 %v4020_v21, %v2837_v15  ;;  %v3003_v54 = vadd.f32 %v3002_v25, %v2819_v61 }
 0x1a1   : > { %v4036_v9 = vadd.f32 %v3006_v34, %v2828_v51 }
 0x1a2   : > { %v3020_v7 = vadd.f32 %v4022_v50, %v2840_v62  ;;  %v4039_v13 = vadd.f32 %v3010_v53, %v2822_v28 }
 0x1a4   : > { %v2841_v59 = vpop.f32.mrb[56].mxu0 }
 0x1a5   : > { %v2842_v11 = vpop.f32.mrb[57].mxu0 }
 0x1a6   : > { %v2843_v40 = vadd.f32 %v2842_v11, %v2841_v59  ;;  %v2844_v63 = vpop.f32.mrb[58].mxu0 }
 0x1a7   : > { %v2845_v14 = vpop.f32.mrb[59].mxu0 }
 0x1a8   : > { %v2846_v32 = vadd.f32 %v2845_v14, %v2844_v63  ;;  %v3029_v19 = vadd.f32 %v4024_v37, %v2843_v40 }
 0x1aa   : > { %v3035_v48 = vadd.f32 %v3034_v12, %v2846_v32 }
 0x1ac   : > { %v2847_v27 = vpop.f32.mrb[60].mxu0 }
 0x1ad   : > { %v2848_v6 = vpop.f32.mrb[61].mxu0 }
 0x1ae   : > { %v2849_v0 = vadd.f32 %v2848_v6, %v2847_v27  ;;  %v2850_v21 = vpop.f32.mrb[62].mxu0 }
 0x1af   : > { %v2851_v61 = vpop.f32.mrb[63].mxu0 }
 0x1b0   : > { %v2852_v31 = vadd.f32 %v2851_v61, %v2850_v21  ;;  %v3026_v60 = vadd.f32 %v3025_v1, %v2849_v0 }
 0x1b2   : > { %v3032_v2 = vadd.f32 %v3031_v17, %v2852_v31 }
 0x1b4   : > { %v2951_v50 = vpop.f32.mrb[64].mxu0  ;;  %v2959_v28 = vpop.f32.mrb[8].mxu1 }
 0x1b5   : > { %v2984_v16 = vadd.f32 %v2983_v38, %v2951_v50  ;;  %v3015_v51 = vadd.f32 %v3014_v5, %v2959_v28  ;;  %v1835_v33 = vpop.f32.mrb[65].mxu0  ;;  %v1867_v23 = vpop.f32.mrb[9].mxu1 }
 0x1b6   : > { %v2988_v42 = vadd.f32 %v2987_v49, %v1835_v33  ;;  %v3018_v44 = vadd.f32 %v3017_v4, %v1867_v23  ;;  %v2952_v37 = vpop.f32.mrb[66].mxu0  ;;  %v2960_v12 = vpop.f32.mrb[10].mxu1 }
 0x1b7   : > { %v2992_v8 = vadd.f32 %v2991_v18, %v2952_v37  ;;  %v3021_v52 = vadd.f32 %v3020_v7, %v2960_v12  ;;  %v1838_v56 = vpop.f32.mrb[67].mxu0  ;;  %v1870_v22 = vpop.f32.mrb[11].mxu1 }
 0x1b8   : > { %v2996_v1 = vadd.f32 %v2995_v26, %v1838_v56  ;;  %v3024_v17 = vadd.f32 %v3023_v20, %v1870_v22 }
 0x1b9   : > { %v1915_v30 = vpack.c.bf16 %v2992_v8, %v2984_v16  ;;  %v4042_v29 = vpack.c.bf16 %v3021_v52, %v3015_v51 }
 0x1ba   : > { %v1914_v58 = vpack.c.bf16 %v2996_v1, %v2988_v42  ;;  %v1918_v3 = vpack.c.bf16 %v3024_v17, %v3018_v44 }
 0x1bb   : > { %v1924_v38 = vunpack.c.l.bf16 %v1915_v30  ;;  %2622 = vst [vmem:[%s3297_s14 + $0x8] sm:$0xff] %v1915_v30   ;;  %2626 = vst [vmem:[%s3297_s14 + $0x28] sm:$0xff] %v4042_v29   ;;  %v1925_v35 = vunpack.c.h.bf16 %v1915_v30  ;;  %v1932_v44 = vunpack.c.l.bf16 %v4042_v29  ;;  %v1933_v52 = vunpack.c.h.bf16 %v4042_v29 }
 0x1bc   : > { %v1922_v47 = vunpack.c.l.bf16 %v1914_v58  ;;  %v1923_v43 = vunpack.c.h.bf16 %v1914_v58  ;;  %2579 = vst [vmem:[%s3297_s14] sm:$0xff] %v1914_v58   ;;  %2625 = vst [vmem:[%s3297_s14 + $0x20] sm:$0xff] %v1918_v3   ;;  %v2955_v49 = vpop.f32.mrb[68].mxu0  ;;  %v2963_v4 = vpop.f32.mrb[12].mxu1  ;;  %v1931_v51 = vunpack.c.h.bf16 %v1918_v3 }
 0x1bd   : > { %v1851_v18 = vpop.f32.mrb[69].mxu0  ;;  %v1883_v55 = vpop.f32.mrb[13].mxu1  ;;  %v1961_v25 = vmul.f32 %v1924_v38, %v1924_v38  ;;  %v3000_v15 = vadd.f32 %v2999_v36, %v2955_v49  ;;  %v3027_v45 = vadd.f32 %v3026_v60, %v2963_v4  ;;  %v1962_v40 = vmul.f32 %v1925_v35, %v1925_v35 }
 0x1be   : > { %v1938_v26 = vadd.f32 %v1923_v43, %v1922_v47  ;;  %v1959_v20 = vmul.f32 %v1922_v47, %v1922_v47  ;;  %v1960_v24 = vmul.f32 %v1923_v43, %v1923_v43  ;;  %v2956_v57 = vpop.f32.mrb[70].mxu0  ;;  %v2964_v41 = vpop.f32.mrb[14].mxu1  ;;  %v3004_v39 = vadd.f32 %v3003_v54, %v1851_v18 }
 0x1bf   : > { %v1854_v34 = vpop.f32.mrb[71].mxu0  ;;  %v1886_v10 = vpop.f32.mrb[15].mxu1  ;;  %v3030_v62 = vadd.f32 %v3029_v19, %v1883_v55  ;;  %v3008_v5 = vadd.f32 %v4036_v9, %v2956_v57  ;;  %v3033_v7 = vadd.f32 %v3032_v2, %v2964_v41  ;;  %v1930_v2 = vunpack.c.l.bf16 %v1918_v3 }
 0x1c0   : > { %v1939_v46 = vadd.f32 %v1938_v26, %v1924_v38  ;;  %v1975_v53 = vadd.f32 %v1960_v24, %v1959_v20  ;;  %v3012_v59 = vadd.f32 %v4039_v13, %v1854_v34  ;;  %v3036_v11 = vadd.f32 %v3035_v48, %v1886_v10 }
 0x1c1   : > { %v1917_v36 = vpack.c.bf16 %v3008_v5, %v3000_v15  ;;  %v1921_v54 = vpack.c.bf16 %v3033_v7, %v3027_v45  ;;  %v1967_v37 = vmul.f32 %v1930_v2, %v1930_v2  ;;  %v1968_v56 = vmul.f32 %v1931_v51, %v1931_v51 }
 0x1c2   : > { %v1976_v63 = vadd.f32 %v1975_v53, %v1961_v25  ;;  %v1940_v14 = vadd.f32 %v1939_v46, %v1925_v35  ;;  %v1916_v32 = vpack.c.bf16 %v3012_v59, %v3004_v39  ;;  %v1920_v27 = vpack.c.bf16 %v3036_v11, %v3030_v62 }
 0x1c3   : > { %2624 = vst [vmem:[%s3297_s14 + $0x18] sm:$0xff] %v1917_v36   ;;  %2628 = vst [vmem:[%s3297_s14 + $0x38] sm:$0xff] %v1921_v54   ;;  %v1928_v9 = vunpack.c.l.bf16 %v1917_v36  ;;  %v1929_v31 = vunpack.c.h.bf16 %v1917_v36  ;;  %v1969_v17 = vmul.f32 %v1932_v44, %v1932_v44  ;;  %v1970_v47 = vmul.f32 %v1933_v52, %v1933_v52 }
 0x1c4   : > { %v1977_v6 = vadd.f32 %v1976_v63, %v1962_v40  ;;  %v1926_v0 = vunpack.c.l.bf16 %v1916_v32  ;;  %v1927_v19 = vunpack.c.h.bf16 %v1916_v32  ;;  %2623 = vst [vmem:[%s3297_s14 + $0x10] sm:$0xff] %v1916_v32   ;;  %2627 = vst [vmem:[%s3297_s14 + $0x30] sm:$0xff] %v1920_v27   ;;  %v1934_v30 = vunpack.c.l.bf16 %v1920_v27 }
 0x1c5   : > { %v1965_v50 = vmul.f32 %v1928_v9, %v1928_v9  ;;  %v1966_v33 = vmul.f32 %v1929_v31, %v1929_v31  ;;  %v1935_v43 = vunpack.c.h.bf16 %v1920_v27  ;;  %v1936_v4 = vunpack.c.l.bf16 %v1921_v54 }
 0x1c6   : > { %v1941_v21 = vadd.f32 %v1940_v14, %v1926_v0  ;;  %v1963_v61 = vmul.f32 %v1926_v0, %v1926_v0  ;;  %v1964_v48 = vmul.f32 %v1927_v19, %v1927_v19  ;;  %v1971_v55 = vmul.f32 %v1934_v30, %v1934_v30 }
 0x1c7   : > { %v1937_v26 = vunpack.c.h.bf16 %v1921_v54  ;;  %v1972_v24 = vmul.f32 %v1935_v43, %v1935_v43  ;;  %v1973_v29 = vmul.f32 %v1936_v4, %v1936_v4 }
 0x1c8   : > { %v1942_v13 = vadd.f32 %v1941_v21, %v1927_v19  ;;  %v1978_v60 = vadd.f32 %v1977_v6, %v1963_v61 }
 0x1c9   : > { %v1974_v15 = vmul.f32 %v1937_v26, %v1937_v26 }
 0x1ca   : > { %v1943_v28 = vadd.f32 %v1942_v13, %v1928_v9  ;;  %v1979_v16 = vadd.f32 %v1978_v60, %v1964_v48 }
 0x1cc   : > { %v1944_v23 = vadd.f32 %v1943_v28, %v1929_v31  ;;  %v1980_v42 = vadd.f32 %v1979_v16, %v1965_v50 }
 0x1ce   : > { %v1945_v12 = vadd.f32 %v1944_v23, %v1930_v2  ;;  %v1981_v8 = vadd.f32 %v1980_v42, %v1966_v33 }
 0x1d0   : > { %v1982_v22 = vadd.f32 %v1981_v8, %v1967_v37  ;;  %v1946_v1 = vadd.f32 %v1945_v12, %v1931_v51 }
 0x1d2   : > { %v1947_v58 = vadd.f32 %v1946_v1, %v1932_v44  ;;  %v1983_v38 = vadd.f32 %v1982_v22, %v1968_v56 }
 0x1d4   : > { %v1948_v3 = vadd.f32 %v1947_v58, %v1933_v52  ;;  %v1984_v49 = vadd.f32 %v1983_v38, %v1969_v17 }
 0x1d6   : > { %v1949_v18 = vadd.f32 %v1948_v3, %v1934_v30  ;;  %v1985_v35 = vadd.f32 %v1984_v49, %v1970_v47 }
 0x1d8   : > { %v1950_v20 = vadd.f32 %v1949_v18, %v1935_v43  ;;  %v1986_v57 = vadd.f32 %v1985_v35, %v1971_v55 }
 0x1da   : > { %v1951_v41 = vadd.f32 %v1950_v20, %v1936_v4  ;;  %v1987_v25 = vadd.f32 %v1986_v57, %v1972_v24 }
 0x1dc   : > { %v1952_v45 = vadd.f32 %v1951_v41, %v1937_v26  ;;  %v1988_v39 = vadd.f32 %v1987_v25, %v1973_v29 }
 0x1de   : > { %v1953_v34 = vrot.slane %v1952_v45, 4  ;;  %v1989_v10 = vadd.f32 %v1988_v39, %v1974_v15 }
 0x1e0   : > { %v1954_v46 = vadd.f32 %v1953_v34, %v1952_v45  ;;  %v1990_v53 = vrot.slane %v1989_v10, 4 }
 0x1e2   : > { %v1955_v62 = vrot.slane %v1954_v46, 2  ;;  %v1991_v5 = vadd.f32 %v1990_v53, %v1989_v10 }
 0x1e4   : > { %v1956_v7 = vadd.f32 %v1955_v62, %v1954_v46  ;;  %v1992_v59 = vrot.slane %v1991_v5, 2 }
 0x1e6   : > { %v1957_v11 = vrot.slane %v1956_v7, 1  ;;  %v1993_v40 = vadd.f32 %v1992_v59, %v1991_v5 }
 0x1e8   : > { %v1994_v63 = vrot.slane %v1993_v40, 1  ;;  %v1958_v36 = vadd.f32 %v1957_v11, %v1956_v7 }
 0x1ea   : > { %v1995_v14 = vadd.f32 %v1994_v63, %v1993_v40 }
 0x1ec   : > { %v1996_v54 = vsel %vm566_vm0, %v1958_v36, %v1995_v14 }
 0x1ed   : > { %1997 = vst [vmem:[%s3307_s30] sm:$0x3] %v1996_v54 }
 0x1ee PF: > { %s16_s22 = sadd.s32 1, %s3215_s22   ;;  %s4084_s18 = smov %s3207_s20 }
 0x1ef   : > { %p13_p12 = scmp.ge.s32.totalorder %s16_s22, 6   ;;  %s4085_s19 = smov %s3211_s21 }
 0x1f0   : > { %s4086_s20 = smov %s4089_s23  ;;  %s4087_s21 = smov %s4093_s24 }
 0x1f1   :  { %15 = sbr.rel (!%p13_p12) target bundleno = 3 (0x3), region = 164 }
 0x1f8   :  { %2124 = vsyncmov [#allocation4] }
 0x1fb   :  { %s2125_s14 = vpop.sfrf %2124 }
 0x1fc   :  { %p2521_p13 = scmp.ne.s32.totalorder %s2125_s14, 0 }
 0x1fe   :  { %2129 = shalt.err (%p2521_p13)  }
 0x1ff   :  { %2131 = vsyncmov [#allocation4 + $0x1] }
 0x202   :  { %s2132_s30 = vpop.sfrf %2131 }
 0x203   :  { %p2522_p0 = scmp.ne.s32.totalorder %s2132_s30, 0 }
 0x205   :  { %2136 = shalt.err (%p2522_p0)  }

</bundles_post_ra>
